<compile_context>
chip_gen: v7x
topology: tpu7x:2x2x1
jax: 0.10.0
libtpu: 0.0.40
codegen_flags: <defaults>
</compile_context>

<pallas_src>
import functools

import jax
import jax.numpy as jnp
from jax import lax
from jax.experimental import pallas as pl
from jax.experimental.pallas import tpu as pltpu


# ------------------------------- utilities -------------------------------- #
def _round_up(v, m):
    return ((v + m - 1) // m) * m


@functools.lru_cache(maxsize=None)
def _vmem_limit_bytes():
    """Generation-aware scoped-VMEM budget (~48 MiB v7x, ~96 MiB v5e/v6e)."""
    cap = 64 * 1024 * 1024
    try:
        info = pltpu.get_tpu_info()
        cap = int(getattr(info, "vmem_capacity_bytes", cap))
    except Exception:
        pass
    return int(max(32 * 1024 * 1024, min(cap * 3 // 4, 100 * 1024 * 1024)))


def _pick_tile_m(mfull, fuse_k, k_total):
    """Output-row tile: big enough to amortize grid-step overhead, small
    enough that the tap matrix / accumulator stay cheap."""
    cap = 512 if fuse_k else 256
    while cap > 8 and cap * k_total * 2 > 6 * 1024 * 1024:
        cap //= 2
    cap = max(cap, 8)
    if mfull <= cap:
        return _round_up(mfull, 8)
    n_tiles = -(-mfull // cap)
    return _round_up(-(-mfull // n_tiles), 8)


# ----------------------------- Pallas kernel ------------------------------ #
def _conv_tap_kernel(x_ref, w_ref, b_ref, o_ref, *scratch,
                     kc, wi, tile_m, cin, act, fuse_k):
    """Direct conv over one (sample, M-tile) block.

    x_ref : (1, Lin, Cin)          padded, flattened per-sample input (resident)
    w_ref : (kc*kc*Cin, Cout)      packed weights, BN scale folded in
    b_ref : (1, Cout)              folded conv-bias / BN shift (f32)
    o_ref : (1, tile_m, Cout)      one M tile of the flattened output
    scratch (fuse_k only): (tile_m, kc*kc*Cin) VMEM tap matrix
    """
    m0 = pl.multiple_of(pl.program_id(1) * tile_m, tile_m)

    if fuse_k:
        tap_ref = scratch[0]
        t = 0
        for a in range(kc):
            for b in range(kc):
                start = a * wi + b
                # Cin is 128-aligned here -> lane-aligned scratch stores.
                tap_ref[:, t * cin:(t + 1) * cin] = x_ref[0, pl.ds(m0 + start, tile_m), :]
                t += 1
        acc = jnp.dot(tap_ref[...], w_ref[...], preferred_element_type=jnp.float32)
    else:
        cout = o_ref.shape[-1]
        acc = jnp.zeros((tile_m, cout), jnp.float32)
        t = 0
        for a in range(kc):
            for b in range(kc):
                start = a * wi + b
                p = x_ref[0, pl.ds(m0 + start, tile_m), :]          # (tile_m, Cin)
                acc = acc + jnp.dot(p, w_ref[t * cin:(t + 1) * cin, :],
                                    preferred_element_type=jnp.float32)
                t += 1

    y = acc + b_ref[...]
    if act == "elu":
        y = jnp.where(y > 0, y, jnp.expm1(jnp.minimum(y, 0.0)))
    elif act == "scaled_sigmoid":
        y = 0.3 * jax.nn.sigmoid(y)
    # act == "none": linear
    o_ref[0] = y.astype(o_ref.dtype)


# ------------------------------- conv wrapper ------------------------------ #
def conv2d_bn_act(x, w_packed, shift, *, k, stride, act, out_dtype=None):
    """x: (N,H,W,Cin) -> (N,H/stride,W/stride,Cout). One fused pallas_call."""
    n, h, w, cin = x.shape
    pad = (k - 1) // 2
    x = x.astype(w_packed.dtype)
    xp = jnp.pad(x, ((0, 0), (pad, pad), (pad, pad), (0, 0)))

    if stride == 2:
        # space-to-depth: fold the 2x2 stride phases into channels so the
        # kernel only ever does stride-1 windows.
        hp, wp = xp.shape[1], xp.shape[2]
        xp = xp.reshape(n, hp // 2, 2, wp // 2, 2, cin)
        xp = jnp.transpose(xp, (0, 1, 3, 2, 4, 5)).reshape(n, hp // 2, wp // 2, 4 * cin)
        kc = (k + 1) // 2
    else:
        kc = k

    hi, wi, cin_eff = xp.shape[1], xp.shape[2], xp.shape[3]
    ho, wo = h // stride, w // stride
    assert hi == ho + kc - 1 and wi == wo + kc - 1
    k_total, cout = w_packed.shape
    assert k_total == kc * kc * cin_eff

    mfull = ho * wi
    fuse_k = (cin_eff % 128 == 0)          # lane-aligned tap matrix only
    tile_m = _pick_tile_m(mfull, fuse_k, k_total)
    num_mt = -(-mfull // tile_m)
    mpad = num_mt * tile_m

    # rows the last tile may read: mpad + (kc-1)*wi + (kc-1)
    lin = mpad + (kc - 1) * (wi + 1)
    xf = xp.reshape(n, hi * wi, cin_eff)
    if lin > hi * wi:
        xf = jnp.pad(xf, ((0, 0), (0, lin - hi * wi), (0, 0)))

    if out_dtype is None:
        out_dtype = x.dtype

    scratch = []
    if fuse_k:
        scratch = [pltpu.VMEM((tile_m, k_total), w_packed.dtype)]

    cost = pl.CostEstimate(
        flops=int(2 * n * mpad * k_total * cout),
        transcendentals=int(n * mpad * cout),
        bytes_accessed=int(xf.size * xf.dtype.itemsize
                           + w_packed.size * w_packed.dtype.itemsize
                           + shift.size * 4
                           + n * mpad * cout * jnp.dtype(out_dtype).itemsize))

    out = pl.pallas_call(
        functools.partial(_conv_tap_kernel, kc=kc, wi=wi, tile_m=tile_m,
                          cin=cin_eff, act=act, fuse_k=fuse_k),
        out_shape=jax.ShapeDtypeStruct((n, mpad, cout), out_dtype),
        grid=(n, num_mt),
        in_specs=[
            pl.BlockSpec((1, lin, cin_eff), lambda i, j: (i, 0, 0)),   # resident sample
            pl.BlockSpec((k_total, cout), lambda i, j: (0, 0)),        # packed weights
            pl.BlockSpec((1, cout), lambda i, j: (0, 0)),              # folded shift
        ],
        out_specs=pl.BlockSpec((1, tile_m, cout), lambda i, j: (i, j, 0)),
        scratch_shapes=scratch,
        compiler_params=pltpu.CompilerParams(
            dimension_semantics=("parallel", "parallel"),
            vmem_limit_bytes=_vmem_limit_bytes(),
        ),
        cost_estimate=cost,
    )(xf, w_packed, shift)

    # drop padded rows and the (kc-1) garbage columns per output row
    return out[:, :mfull, :].reshape(n, ho, wi, cout)[:, :, :wo, :]


def _upsample2(x):
    """Nearest-neighbor x2 upsample in NHWC (== F.upsample(..., mode='nearest'))."""
    return jnp.repeat(jnp.repeat(x, 2, axis=1), 2, axis=2)


# --------------------------- parameter creation ---------------------------- #
def _pack_weight(w, scale, stride, dtype=jnp.bfloat16):
    """(Cout,Cin,k,k) torch weights -> (kc*kc*Cin_eff, Cout), BN scale folded."""
    cout, cin, k, _ = w.shape
    w = jnp.transpose(w, (2, 3, 1, 0)) * scale          # (k, k, Cin, Cout)
    if stride == 1:
        wp = w.reshape(k * k * cin, cout)
    else:
        kc = (k + 1) // 2
        wz = jnp.zeros((2 * kc, 2 * kc, cin, cout), w.dtype).at[:k, :k].set(w)
        wz = wz.reshape(kc, 2, kc, 2, cin, cout)         # (a, di, b, dj, Cin, Cout)
        wz = jnp.transpose(wz, (0, 2, 1, 3, 4, 5))       # (a, b, di, dj, Cin, Cout)
        wp = wz.reshape(kc * kc * 4 * cin, cout)         # matches s2d channel order
    return wp.astype(dtype)


def _init_conv_bn(key, cin, cout, k, stride, with_bn=True, dtype=jnp.bfloat16):
    ks = jax.random.split(key, 5)
    fan_in = cin * k * k
    w = jax.random.normal(ks[0], (cout, cin, k, k), jnp.float32) * (2.0 / fan_in) ** 0.5
    b = 0.01 * jax.random.normal(ks[1], (cout,), jnp.float32)
    if with_bn:
        gamma = 1.0 + 0.1 * jax.random.normal(ks[2], (cout,), jnp.float32)
        beta = 0.1 * jax.random.normal(ks[3], (cout,), jnp.float32)
        mean = 0.05 * jax.random.normal(ks[4], (cout,), jnp.float32)
        var = jnp.ones((cout,), jnp.float32)
        s = gamma / jnp.sqrt(var + 1e-5)
        scale, shift = s, (b - mean) * s + beta
    else:
        scale, shift = jnp.ones((cout,), jnp.float32), b
    return {"w": _pack_weight(w, scale, stride, dtype),
            "b": shift.reshape(1, cout).astype(jnp.float32)}


_DOWN_K = {1: 7, 2: 5, 3: 3, 4: 3, 5: 3}


def init_mono_net_params(key, input_nc=3, output_nc=2):
    keys = iter(jax.random.split(key, 64))
    p = {}
    down_cfg = [(input_nc, 32, 7), (32, 64, 5), (64, 128, 3), (128, 256, 3), (256, 512, 3)]
    for idx, (ci, co, k) in enumerate(down_cfg, start=1):
        p[f"down{idx}_a"] = _init_conv_bn(next(keys), ci, co, k, 1)
        p[f"down{idx}_b"] = _init_conv_bn(next(keys), co, co, k, 2)
    for idx, (ci, co) in {5: (512, 256), 4: (256, 128), 3: (128, 64),
                          2: (64, 32), 1: (32, 16)}.items():
        p[f"up{idx}"] = _init_conv_bn(next(keys), ci, co, 3, 1)
    for idx, (ci, co) in {5: (512, 256), 4: (256, 128), 3: (130, 64),
                          2: (66, 32), 1: (18, 16)}.items():
        p[f"iconv{idx}"] = _init_conv_bn(next(keys), ci, co, 3, 1)
    for idx, ci in {4: 128, 3: 64, 2: 32, 1: 16}.items():
        p[f"disp{idx}"] = _init_conv_bn(next(keys), ci, output_nc, 3, 1, with_bn=False)
    return p


# ------------------------------ forward pass ------------------------------- #
def mono_net_forward(params, x_nchw):
    x = jnp.transpose(x_nchw, (0, 2, 3, 1)).astype(jnp.bfloat16)  # NCHW -> NHWC

    def layer(h, name, *, k=3, stride=1, act="elu", out_dtype=jnp.bfloat16):
        lp = params[name]
        return conv2d_bn_act(h, lp["w"], lp["b"], k=k, stride=stride,
                             act=act, out_dtype=out_dtype)

    def down(h, idx):
        k = _DOWN_K[idx]
        h = layer(h, f"down{idx}_a", k=k, stride=1)
        h = layer(h, f"down{idx}_b", k=k, stride=2)
        return h

    conv_1 = down(x, 1)       # 32  x H/2
    conv_2 = down(conv_1, 2)  # 64  x H/4
    conv_3 = down(conv_2, 3)  # 128 x H/8
    conv_4 = down(conv_3, 4)  # 256 x H/16
    conv_5 = down(conv_4, 5)  # 512 x H/32

    iconv6_up = _upsample2(conv_5)
    upconv_5 = layer(iconv6_up, "up5")
    concat_5 = jnp.concatenate([upconv_5, conv_4], axis=-1)
    iconv_5 = layer(concat_5, "iconv5")
    iconv5_up = _upsample2(iconv_5)

    upconv_4 = layer(iconv5_up, "up4")
    concat_4 = jnp.concatenate([upconv_4, conv_3], axis=-1)
    iconv_4 = layer(concat_4, "iconv4")
    disp4 = layer(iconv_4, "disp4", act="scaled_sigmoid", out_dtype=jnp.float32)
    udisp4 = _upsample2(disp4)
    iconv4_up = _upsample2(iconv_4)

    upconv_3 = layer(iconv4_up, "up3")
    concat_3 = jnp.concatenate([upconv_3, conv_2, udisp4.astype(jnp.bfloat16)], axis=-1)
    iconv_3 = layer(concat_3, "iconv3")
    disp3 = layer(iconv_3, "disp3", act="scaled_sigmoid", out_dtype=jnp.float32)
    udisp3 = _upsample2(disp3)
    iconv3_up = _upsample2(iconv_3)

    upconv_2 = layer(iconv3_up, "up2")
    concat_2 = jnp.concatenate([upconv_2, conv_1, udisp3.astype(jnp.bfloat16)], axis=-1)
    iconv_2 = layer(concat_2, "iconv2")
    disp2 = layer(iconv_2, "disp2", act="scaled_sigmoid", out_dtype=jnp.float32)
    udisp2 = _upsample2(disp2)
    iconv2_up = _upsample2(iconv_2)

    upconv_1 = layer(iconv2_up, "up1")
    concat_1 = jnp.concatenate([upconv_1, udisp2.astype(jnp.bfloat16)], axis=-1)
    iconv_1 = layer(concat_1, "iconv1")
    disp1 = layer(iconv_1, "disp1", act="scaled_sigmoid", out_dtype=jnp.float32)

    to_nchw = lambda t: jnp.transpose(t, (0, 3, 1, 2))
    return [to_nchw(disp1), to_nchw(disp2), to_nchw(disp3), to_nchw(disp4)]


# ------------------------------- self test --------------------------------- #
def _self_test_conv():
    """Validate both the fused-K and per-tap conv paths (incl. stride-2
    space-to-depth packing) against lax.conv."""
    key = jax.random.PRNGKey(42)
    cases = [(3, 8, 7, 1),      # unfused, tiny Cin
             (5, 16, 5, 2),     # unfused, stride 2
             (32, 8, 3, 2),     # fused (Cin_eff = 128), stride 2
             (128, 16, 3, 1)]   # fused, stride 1
    for cin, cout, k, stride in cases:
        key, k1, k2, k3, k4 = jax.random.split(key, 5)
        h, w = 8, 12
        x = jax.random.normal(k1, (2, h, w, cin), jnp.float32)
        wt = 0.2 * jax.random.normal(k2, (cout, cin, k, k), jnp.float32)
        scale = 1.0 + 0.2 * jax.random.normal(k3, (cout,), jnp.float32)
        shift = 0.3 * jax.random.normal(k4, (cout,), jnp.float32)
        wp = _pack_weight(wt, scale, stride, dtype=jnp.float32)
        got = conv2d_bn_act(x, wp, shift.reshape(1, cout), k=k, stride=stride,
                            act="none", out_dtype=jnp.float32)
        pad = (k - 1) // 2
        ref = lax.conv_general_dilated(
            x, jnp.transpose(wt, (2, 3, 1, 0)), window_strides=(stride, stride),
            padding=[(pad, pad), (pad, pad)],
            dimension_numbers=("NHWC", "HWIO", "NHWC"))
        ref = ref * scale + shift
        err = float(jnp.max(jnp.abs(got - ref)))
        tol = 2e-2 * (float(jnp.max(jnp.abs(ref))) + 1e-6)
        assert err <= tol, (cin, cout, k, stride, err, tol)


# ---------------------------------- main ----------------------------------- #
if __name__ == "__main__":
    _self_test_conv()

    key = jax.random.PRNGKey(0)
    k_params, k_x = jax.random.split(key)

    input_nc, output_nc = 3, 2   # output_nc must be 2 (conv_3 block expects 130 in-channels)
    batch, H, W = 2, 64, 64      # H, W divisible by 32 (5 stride-2 stages)

    params = init_mono_net_params(k_params, input_nc=input_nc, output_nc=output_nc)
    x = jax.random.normal(k_x, (batch, input_nc, H, W), jnp.float32)

    fwd = jax.jit(mono_net_forward)
    disps = jax.block_until_ready(fwd(params, x))

    expected = [(batch, output_nc, H, W),
                (batch, output_nc, H // 2, W // 2),
                (batch, output_nc, H // 4, W // 4),
                (batch, output_nc, H // 8, W // 8)]
    assert [tuple(d.shape) for d in disps] == expected, [d.shape for d in disps]
    assert all(bool(jnp.all(jnp.isfinite(d))) for d in disps)
    assert all(bool(jnp.all((d >= 0.0) & (d <= 0.3))) for d in disps)

    print("KERNEL_OK")
</pallas_src>

<mosaic_0001>
module attributes {stable_mosaic.version = 11 : i64} {
  func.func @_conv_tap_kernel(%arg0: i32, %arg1: i32, %arg2: memref<1x258x3xf32, #tpu.memory_space<vmem>>, %arg3: memref<147x8xf32, #tpu.memory_space<vmem>>, %arg4: memref<1x8xf32, #tpu.memory_space<vmem>>, %arg5: memref<1x144x8xf32, #tpu.memory_space<vmem>>) attributes {dimension_semantics = [#tpu.dimension_semantics<parallel>, #tpu.dimension_semantics<parallel>], iteration_bounds = array<i64: 2, 1>, scalar_prefetch = 0 : i64, scratch_operands = 0 : i64, tpu.core_type = #tpu.core_type<tc>, window_params = [{transform_indices = @transform_0, window_bounds = array<i64: 1, 258, 3>}, {pipeline_mode = #tpu.pipeline_mode<synchronous>, transform_indices = @transform_1, window_bounds = array<i64: 147, 8>}, {pipeline_mode = #tpu.pipeline_mode<synchronous>, transform_indices = @transform_2, window_bounds = array<i64: 1, 8>}, {transform_indices = @transform_3, window_bounds = array<i64: 1, 144, 8>}]} {
    %c144_i32 = arith.constant 144 : i32
    %0 = arith.muli %arg1, %c144_i32 : i32
    %1 = tpu.assume_multiple %0, 144 : i32
    %cst = arith.constant 0.000000e+00 : f32
    %2 = vector.broadcast %cst : f32 to vector<144x8xf32>
    %c0_i32 = arith.constant 0 : i32
    %3 = arith.addi %1, %c0_i32 : i32
    %c0 = arith.constant 0 : index
    %4 = arith.index_cast %3 : i32 to index
    %c0_0 = arith.constant 0 : index
    %5 = vector.load %arg2[%c0, %4, %c0_0] : memref<1x258x3xf32, #tpu.memory_space<vmem>>, vector<1x144x3xf32>
    %6 = vector.shape_cast %5 : vector<1x144x3xf32> to vector<144x3xf32>
    %c0_1 = arith.constant 0 : index
    %c0_2 = arith.constant 0 : index
    %7 = vector.load %arg3[%c0_1, %c0_2] : memref<147x8xf32, #tpu.memory_space<vmem>>, vector<3x8xf32>
    %cst_3 = arith.constant dense<0.000000e+00> : vector<144x8xf32>
    %8 = tpu.matmul %6, %7, %cst_3 {dimension_numbers = #tpu.dot_dimension_numbers<[1], [0], [0], [1], [0, 0, 1, 1], [], []>} : vector<144x3xf32>, vector<3x8xf32>, vector<144x8xf32> -> vector<144x8xf32>
    %9 = arith.addf %2, %8 : vector<144x8xf32>
    %c1_i32 = arith.constant 1 : i32
    %10 = arith.addi %1, %c1_i32 : i32
    %c0_4 = arith.constant 0 : index
    %11 = arith.index_cast %10 : i32 to index
    %c0_5 = arith.constant 0 : index
    %12 = vector.load %arg2[%c0_4, %11, %c0_5] : memref<1x258x3xf32, #tpu.memory_space<vmem>>, vector<1x144x3xf32>
    %13 = vector.shape_cast %12 : vector<1x144x3xf32> to vector<144x3xf32>
    %c3 = arith.constant 3 : index
    %c0_6 = arith.constant 0 : index
    %14 = vector.load %arg3[%c3, %c0_6] : memref<147x8xf32, #tpu.memory_space<vmem>>, vector<3x8xf32>
    %cst_7 = arith.constant dense<0.000000e+00> : vector<144x8xf32>
    %15 = tpu.matmul %13, %14, %cst_7 {dimension_numbers = #tpu.dot_dimension_numbers<[1], [0], [0], [1], [0, 0, 1, 1], [], []>} : vector<144x3xf32>, vector<3x8xf32>, vector<144x8xf32> -> vector<144x8xf32>
    %16 = arith.addf %9, %15 : vector<144x8xf32>
    %c2_i32 = arith.constant 2 : i32
    %17 = arith.addi %1, %c2_i32 : i32
    %c0_8 = arith.constant 0 : index
    %18 = arith.index_cast %17 : i32 to index
    %c0_9 = arith.constant 0 : index
    %19 = vector.load %arg2[%c0_8, %18, %c0_9] : memref<1x258x3xf32, #tpu.memory_space<vmem>>, vector<1x144x3xf32>
    %20 = vector.shape_cast %19 : vector<1x144x3xf32> to vector<144x3xf32>
    %c6 = arith.constant 6 : index
    %c0_10 = arith.constant 0 : index
    %21 = vector.load %arg3[%c6, %c0_10] : memref<147x8xf32, #tpu.memory_space<vmem>>, vector<3x8xf32>
    %cst_11 = arith.constant dense<0.000000e+00> : vector<144x8xf32>
    %22 = tpu.matmul %20, %21, %cst_11 {dimension_numbers = #tpu.dot_dimension_numbers<[1], [0], [0], [1], [0, 0, 1, 1], [], []>} : vector<144x3xf32>, vector<3x8xf32>, vector<144x8xf32> -> vector<144x8xf32>
    %23 = arith.addf %16, %22 : vector<144x8xf32>
    %c3_i32 = arith.constant 3 : i32
    %24 = arith.addi %1, %c3_i32 : i32
    %c0_12 = arith.constant 0 : index
    %25 = arith.index_cast %24 : i32 to index
    %c0_13 = arith.constant 0 : index
    %26 = vector.load %arg2[%c0_12, %25, %c0_13] : memref<1x258x3xf32, #tpu.memory_space<vmem>>, vector<1x144x3xf32>
    %27 = vector.shape_cast %26 : vector<1x144x3xf32> to vector<144x3xf32>
    %c9 = arith.constant 9 : index
    %c0_14 = arith.constant 0 : index
    %28 = vector.load %arg3[%c9, %c0_14] : memref<147x8xf32, #tpu.memory_space<vmem>>, vector<3x8xf32>
    %cst_15 = arith.constant dense<0.000000e+00> : vector<144x8xf32>
    %29 = tpu.matmul %27, %28, %cst_15 {dimension_numbers = #tpu.dot_dimension_numbers<[1], [0], [0], [1], [0, 0, 1, 1], [], []>} : vector<144x3xf32>, vector<3x8xf32>, vector<144x8xf32> -> vector<144x8xf32>
    %30 = arith.addf %23, %29 : vector<144x8xf32>
    %c4_i32 = arith.constant 4 : i32
    %31 = arith.addi %1, %c4_i32 : i32
    %c0_16 = arith.constant 0 : index
    %32 = arith.index_cast %31 : i32 to index
    %c0_17 = arith.constant 0 : index
    %33 = vector.load %arg2[%c0_16, %32, %c0_17] : memref<1x258x3xf32, #tpu.memory_space<vmem>>, vector<1x144x3xf32>
    %34 = vector.shape_cast %33 : vector<1x144x3xf32> to vector<144x3xf32>
    %c12 = arith.constant 12 : index
    %c0_18 = arith.constant 0 : index
    %35 = vector.load %arg3[%c12, %c0_18] : memref<147x8xf32, #tpu.memory_space<vmem>>, vector<3x8xf32>
    %cst_19 = arith.constant dense<0.000000e+00> : vector<144x8xf32>
    %36 = tpu.matmul %34, %35, %cst_19 {dimension_numbers = #tpu.dot_dimension_numbers<[1], [0], [0], [1], [0, 0, 1, 1], [], []>} : vector<144x3xf32>, vector<3x8xf32>, vector<144x8xf32> -> vector<144x8xf32>
    %37 = arith.addf %30, %36 : vector<144x8xf32>
    %c5_i32 = arith.constant 5 : i32
    %38 = arith.addi %1, %c5_i32 : i32
    %c0_20 = arith.constant 0 : index
    %39 = arith.index_cast %38 : i32 to index
    %c0_21 = arith.constant 0 : index
    %40 = vector.load %arg2[%c0_20, %39, %c0_21] : memref<1x258x3xf32, #tpu.memory_space<vmem>>, vector<1x144x3xf32>
    %41 = vector.shape_cast %40 : vector<1x144x3xf32> to vector<144x3xf32>
    %c15 = arith.constant 15 : index
    %c0_22 = arith.constant 0 : index
    %42 = vector.load %arg3[%c15, %c0_22] : memref<147x8xf32, #tpu.memory_space<vmem>>, vector<3x8xf32>
    %cst_23 = arith.constant dense<0.000000e+00> : vector<144x8xf32>
    %43 = tpu.matmul %41, %42, %cst_23 {dimension_numbers = #tpu.dot_dimension_numbers<[1], [0], [0], [1], [0, 0, 1, 1], [], []>} : vector<144x3xf32>, vector<3x8xf32>, vector<144x8xf32> -> vector<144x8xf32>
    %44 = arith.addf %37, %43 : vector<144x8xf32>
    %c6_i32 = arith.constant 6 : i32
    %45 = arith.addi %1, %c6_i32 : i32
    %c0_24 = arith.constant 0 : index
    %46 = arith.index_cast %45 : i32 to index
    %c0_25 = arith.constant 0 : index
    %47 = vector.load %arg2[%c0_24, %46, %c0_25] : memref<1x258x3xf32, #tpu.memory_space<vmem>>, vector<1x144x3xf32>
    %48 = vector.shape_cast %47 : vector<1x144x3xf32> to vector<144x3xf32>
    %c18 = arith.constant 18 : index
    %c0_26 = arith.constant 0 : index
    %49 = vector.load %arg3[%c18, %c0_26] : memref<147x8xf32, #tpu.memory_space<vmem>>, vector<3x8xf32>
    %cst_27 = arith.constant dense<0.000000e+00> : vector<144x8xf32>
    %50 = tpu.matmul %48, %49, %cst_27 {dimension_numbers = #tpu.dot_dimension_numbers<[1], [0], [0], [1], [0, 0, 1, 1], [], []>} : vector<144x3xf32>, vector<3x8xf32>, vector<144x8xf32> -> vector<144x8xf32>
    %51 = arith.addf %44, %50 : vector<144x8xf32>
    %c18_i32 = arith.constant 18 : i32
    %52 = arith.addi %1, %c18_i32 : i32
    %c0_28 = arith.constant 0 : index
    %53 = arith.index_cast %52 : i32 to index
    %c0_29 = arith.constant 0 : index
    %54 = vector.load %arg2[%c0_28, %53, %c0_29] : memref<1x258x3xf32, #tpu.memory_space<vmem>>, vector<1x144x3xf32>
    %55 = vector.shape_cast %54 : vector<1x144x3xf32> to vector<144x3xf32>
    %c21 = arith.constant 21 : index
    %c0_30 = arith.constant 0 : index
    %56 = vector.load %arg3[%c21, %c0_30] : memref<147x8xf32, #tpu.memory_space<vmem>>, vector<3x8xf32>
    %cst_31 = arith.constant dense<0.000000e+00> : vector<144x8xf32>
    %57 = tpu.matmul %55, %56, %cst_31 {dimension_numbers = #tpu.dot_dimension_numbers<[1], [0], [0], [1], [0, 0, 1, 1], [], []>} : vector<144x3xf32>, vector<3x8xf32>, vector<144x8xf32> -> vector<144x8xf32>
    %58 = arith.addf %51, %57 : vector<144x8xf32>
    %c19_i32 = arith.constant 19 : i32
    %59 = arith.addi %1, %c19_i32 : i32
    %c0_32 = arith.constant 0 : index
    %60 = arith.index_cast %59 : i32 to index
    %c0_33 = arith.constant 0 : index
    %61 = vector.load %arg2[%c0_32, %60, %c0_33] : memref<1x258x3xf32, #tpu.memory_space<vmem>>, vector<1x144x3xf32>
    %62 = vector.shape_cast %61 : vector<1x144x3xf32> to vector<144x3xf32>
    %c24 = arith.constant 24 : index
    %c0_34 = arith.constant 0 : index
    %63 = vector.load %arg3[%c24, %c0_34] : memref<147x8xf32, #tpu.memory_space<vmem>>, vector<3x8xf32>
    %cst_35 = arith.constant dense<0.000000e+00> : vector<144x8xf32>
    %64 = tpu.matmul %62, %63, %cst_35 {dimension_numbers = #tpu.dot_dimension_numbers<[1], [0], [0], [1], [0, 0, 1, 1], [], []>} : vector<144x3xf32>, vector<3x8xf32>, vector<144x8xf32> -> vector<144x8xf32>
    %65 = arith.addf %58, %64 : vector<144x8xf32>
    %c20_i32 = arith.constant 20 : i32
    %66 = arith.addi %1, %c20_i32 : i32
    %c0_36 = arith.constant 0 : index
    %67 = arith.index_cast %66 : i32 to index
    %c0_37 = arith.constant 0 : index
    %68 = vector.load %arg2[%c0_36, %67, %c0_37] : memref<1x258x3xf32, #tpu.memory_space<vmem>>, vector<1x144x3xf32>
    %69 = vector.shape_cast %68 : vector<1x144x3xf32> to vector<144x3xf32>
    %c27 = arith.constant 27 : index
    %c0_38 = arith.constant 0 : index
    %70 = vector.load %arg3[%c27, %c0_38] : memref<147x8xf32, #tpu.memory_space<vmem>>, vector<3x8xf32>
    %cst_39 = arith.constant dense<0.000000e+00> : vector<144x8xf32>
    %71 = tpu.matmul %69, %70, %cst_39 {dimension_numbers = #tpu.dot_dimension_numbers<[1], [0], [0], [1], [0, 0, 1, 1], [], []>} : vector<144x3xf32>, vector<3x8xf32>, vector<144x8xf32> -> vector<144x8xf32>
    %72 = arith.addf %65, %71 : vector<144x8xf32>
    %c21_i32 = arith.constant 21 : i32
    %73 = arith.addi %1, %c21_i32 : i32
    %c0_40 = arith.constant 0 : index
    %74 = arith.index_cast %73 : i32 to index
    %c0_41 = arith.constant 0 : index
    %75 = vector.load %arg2[%c0_40, %74, %c0_41] : memref<1x258x3xf32, #tpu.memory_space<vmem>>, vector<1x144x3xf32>
    %76 = vector.shape_cast %75 : vector<1x144x3xf32> to vector<144x3xf32>
    %c30 = arith.constant 30 : index
    %c0_42 = arith.constant 0 : index
    %77 = vector.load %arg3[%c30, %c0_42] : memref<147x8xf32, #tpu.memory_space<vmem>>, vector<3x8xf32>
    %cst_43 = arith.constant dense<0.000000e+00> : vector<144x8xf32>
    %78 = tpu.matmul %76, %77, %cst_43 {dimension_numbers = #tpu.dot_dimension_numbers<[1], [0], [0], [1], [0, 0, 1, 1], [], []>} : vector<144x3xf32>, vector<3x8xf32>, vector<144x8xf32> -> vector<144x8xf32>
    %79 = arith.addf %72, %78 : vector<144x8xf32>
    %c22_i32 = arith.constant 22 : i32
    %80 = arith.addi %1, %c22_i32 : i32
    %c0_44 = arith.constant 0 : index
    %81 = arith.index_cast %80 : i32 to index
    %c0_45 = arith.constant 0 : index
    %82 = vector.load %arg2[%c0_44, %81, %c0_45] : memref<1x258x3xf32, #tpu.memory_space<vmem>>, vector<1x144x3xf32>
    %83 = vector.shape_cast %82 : vector<1x144x3xf32> to vector<144x3xf32>
    %c33 = arith.constant 33 : index
    %c0_46 = arith.constant 0 : index
    %84 = vector.load %arg3[%c33, %c0_46] : memref<147x8xf32, #tpu.memory_space<vmem>>, vector<3x8xf32>
    %cst_47 = arith.constant dense<0.000000e+00> : vector<144x8xf32>
    %85 = tpu.matmul %83, %84, %cst_47 {dimension_numbers = #tpu.dot_dimension_numbers<[1], [0], [0], [1], [0, 0, 1, 1], [], []>} : vector<144x3xf32>, vector<3x8xf32>, vector<144x8xf32> -> vector<144x8xf32>
    %86 = arith.addf %79, %85 : vector<144x8xf32>
    %c23_i32 = arith.constant 23 : i32
    %87 = arith.addi %1, %c23_i32 : i32
    %c0_48 = arith.constant 0 : index
    %88 = arith.index_cast %87 : i32 to index
    %c0_49 = arith.constant 0 : index
    %89 = vector.load %arg2[%c0_48, %88, %c0_49] : memref<1x258x3xf32, #tpu.memory_space<vmem>>, vector<1x144x3xf32>
    %90 = vector.shape_cast %89 : vector<1x144x3xf32> to vector<144x3xf32>
    %c36 = arith.constant 36 : index
    %c0_50 = arith.constant 0 : index
    %91 = vector.load %arg3[%c36, %c0_50] : memref<147x8xf32, #tpu.memory_space<vmem>>, vector<3x8xf32>
    %cst_51 = arith.constant dense<0.000000e+00> : vector<144x8xf32>
    %92 = tpu.matmul %90, %91, %cst_51 {dimension_numbers = #tpu.dot_dimension_numbers<[1], [0], [0], [1], [0, 0, 1, 1], [], []>} : vector<144x3xf32>, vector<3x8xf32>, vector<144x8xf32> -> vector<144x8xf32>
    %93 = arith.addf %86, %92 : vector<144x8xf32>
    %c24_i32 = arith.constant 24 : i32
    %94 = arith.addi %1, %c24_i32 : i32
    %c0_52 = arith.constant 0 : index
    %95 = arith.index_cast %94 : i32 to index
    %c0_53 = arith.constant 0 : index
    %96 = vector.load %arg2[%c0_52, %95, %c0_53] : memref<1x258x3xf32, #tpu.memory_space<vmem>>, vector<1x144x3xf32>
    %97 = vector.shape_cast %96 : vector<1x144x3xf32> to vector<144x3xf32>
    %c39 = arith.constant 39 : index
    %c0_54 = arith.constant 0 : index
    %98 = vector.load %arg3[%c39, %c0_54] : memref<147x8xf32, #tpu.memory_space<vmem>>, vector<3x8xf32>
    %cst_55 = arith.constant dense<0.000000e+00> : vector<144x8xf32>
    %99 = tpu.matmul %97, %98, %cst_55 {dimension_numbers = #tpu.dot_dimension_numbers<[1], [0], [0], [1], [0, 0, 1, 1], [], []>} : vector<144x3xf32>, vector<3x8xf32>, vector<144x8xf32> -> vector<144x8xf32>
    %100 = arith.addf %93, %99 : vector<144x8xf32>
    %c36_i32 = arith.constant 36 : i32
    %101 = arith.addi %1, %c36_i32 : i32
    %c0_56 = arith.constant 0 : index
    %102 = arith.index_cast %101 : i32 to index
    %c0_57 = arith.constant 0 : index
    %103 = vector.load %arg2[%c0_56, %102, %c0_57] : memref<1x258x3xf32, #tpu.memory_space<vmem>>, vector<1x144x3xf32>
    %104 = vector.shape_cast %103 : vector<1x144x3xf32> to vector<144x3xf32>
    %c42 = arith.constant 42 : index
    %c0_58 = arith.constant 0 : index
    %105 = vector.load %arg3[%c42, %c0_58] : memref<147x8xf32, #tpu.memory_space<vmem>>, vector<3x8xf32>
    %cst_59 = arith.constant dense<0.000000e+00> : vector<144x8xf32>
    %106 = tpu.matmul %104, %105, %cst_59 {dimension_numbers = #tpu.dot_dimension_numbers<[1], [0], [0], [1], [0, 0, 1, 1], [], []>} : vector<144x3xf32>, vector<3x8xf32>, vector<144x8xf32> -> vector<144x8xf32>
    %107 = arith.addf %100, %106 : vector<144x8xf32>
    %c37_i32 = arith.constant 37 : i32
    %108 = arith.addi %1, %c37_i32 : i32
    %c0_60 = arith.constant 0 : index
    %109 = arith.index_cast %108 : i32 to index
    %c0_61 = arith.constant 0 : index
    %110 = vector.load %arg2[%c0_60, %109, %c0_61] : memref<1x258x3xf32, #tpu.memory_space<vmem>>, vector<1x144x3xf32>
    %111 = vector.shape_cast %110 : vector<1x144x3xf32> to vector<144x3xf32>
    %c45 = arith.constant 45 : index
    %c0_62 = arith.constant 0 : index
    %112 = vector.load %arg3[%c45, %c0_62] : memref<147x8xf32, #tpu.memory_space<vmem>>, vector<3x8xf32>
    %cst_63 = arith.constant dense<0.000000e+00> : vector<144x8xf32>
    %113 = tpu.matmul %111, %112, %cst_63 {dimension_numbers = #tpu.dot_dimension_numbers<[1], [0], [0], [1], [0, 0, 1, 1], [], []>} : vector<144x3xf32>, vector<3x8xf32>, vector<144x8xf32> -> vector<144x8xf32>
    %114 = arith.addf %107, %113 : vector<144x8xf32>
    %c38_i32 = arith.constant 38 : i32
    %115 = arith.addi %1, %c38_i32 : i32
    %c0_64 = arith.constant 0 : index
    %116 = arith.index_cast %115 : i32 to index
    %c0_65 = arith.constant 0 : index
    %117 = vector.load %arg2[%c0_64, %116, %c0_65] : memref<1x258x3xf32, #tpu.memory_space<vmem>>, vector<1x144x3xf32>
    %118 = vector.shape_cast %117 : vector<1x144x3xf32> to vector<144x3xf32>
    %c48 = arith.constant 48 : index
    %c0_66 = arith.constant 0 : index
    %119 = vector.load %arg3[%c48, %c0_66] : memref<147x8xf32, #tpu.memory_space<vmem>>, vector<3x8xf32>
    %cst_67 = arith.constant dense<0.000000e+00> : vector<144x8xf32>
    %120 = tpu.matmul %118, %119, %cst_67 {dimension_numbers = #tpu.dot_dimension_numbers<[1], [0], [0], [1], [0, 0, 1, 1], [], []>} : vector<144x3xf32>, vector<3x8xf32>, vector<144x8xf32> -> vector<144x8xf32>
    %121 = arith.addf %114, %120 : vector<144x8xf32>
    %c39_i32 = arith.constant 39 : i32
    %122 = arith.addi %1, %c39_i32 : i32
    %c0_68 = arith.constant 0 : index
    %123 = arith.index_cast %122 : i32 to index
    %c0_69 = arith.constant 0 : index
    %124 = vector.load %arg2[%c0_68, %123, %c0_69] : memref<1x258x3xf32, #tpu.memory_space<vmem>>, vector<1x144x3xf32>
    %125 = vector.shape_cast %124 : vector<1x144x3xf32> to vector<144x3xf32>
    %c51 = arith.constant 51 : index
    %c0_70 = arith.constant 0 : index
    %126 = vector.load %arg3[%c51, %c0_70] : memref<147x8xf32, #tpu.memory_space<vmem>>, vector<3x8xf32>
    %cst_71 = arith.constant dense<0.000000e+00> : vector<144x8xf32>
    %127 = tpu.matmul %125, %126, %cst_71 {dimension_numbers = #tpu.dot_dimension_numbers<[1], [0], [0], [1], [0, 0, 1, 1], [], []>} : vector<144x3xf32>, vector<3x8xf32>, vector<144x8xf32> -> vector<144x8xf32>
    %128 = arith.addf %121, %127 : vector<144x8xf32>
    %c40_i32 = arith.constant 40 : i32
    %129 = arith.addi %1, %c40_i32 : i32
    %c0_72 = arith.constant 0 : index
    %130 = arith.index_cast %129 : i32 to index
    %c0_73 = arith.constant 0 : index
    %131 = vector.load %arg2[%c0_72, %130, %c0_73] : memref<1x258x3xf32, #tpu.memory_space<vmem>>, vector<1x144x3xf32>
    %132 = vector.shape_cast %131 : vector<1x144x3xf32> to vector<144x3xf32>
    %c54 = arith.constant 54 : index
    %c0_74 = arith.constant 0 : index
    %133 = vector.load %arg3[%c54, %c0_74] : memref<147x8xf32, #tpu.memory_space<vmem>>, vector<3x8xf32>
    %cst_75 = arith.constant dense<0.000000e+00> : vector<144x8xf32>
    %134 = tpu.matmul %132, %133, %cst_75 {dimension_numbers = #tpu.dot_dimension_numbers<[1], [0], [0], [1], [0, 0, 1, 1], [], []>} : vector<144x3xf32>, vector<3x8xf32>, vector<144x8xf32> -> vector<144x8xf32>
    %135 = arith.addf %128, %134 : vector<144x8xf32>
    %c41_i32 = arith.constant 41 : i32
    %136 = arith.addi %1, %c41_i32 : i32
    %c0_76 = arith.constant 0 : index
    %137 = arith.index_cast %136 : i32 to index
    %c0_77 = arith.constant 0 : index
    %138 = vector.load %arg2[%c0_76, %137, %c0_77] : memref<1x258x3xf32, #tpu.memory_space<vmem>>, vector<1x144x3xf32>
    %139 = vector.shape_cast %138 : vector<1x144x3xf32> to vector<144x3xf32>
    %c57 = arith.constant 57 : index
    %c0_78 = arith.constant 0 : index
    %140 = vector.load %arg3[%c57, %c0_78] : memref<147x8xf32, #tpu.memory_space<vmem>>, vector<3x8xf32>
    %cst_79 = arith.constant dense<0.000000e+00> : vector<144x8xf32>
    %141 = tpu.matmul %139, %140, %cst_79 {dimension_numbers = #tpu.dot_dimension_numbers<[1], [0], [0], [1], [0, 0, 1, 1], [], []>} : vector<144x3xf32>, vector<3x8xf32>, vector<144x8xf32> -> vector<144x8xf32>
    %142 = arith.addf %135, %141 : vector<144x8xf32>
    %c42_i32 = arith.constant 42 : i32
    %143 = arith.addi %1, %c42_i32 : i32
    %c0_80 = arith.constant 0 : index
    %144 = arith.index_cast %143 : i32 to index
    %c0_81 = arith.constant 0 : index
    %145 = vector.load %arg2[%c0_80, %144, %c0_81] : memref<1x258x3xf32, #tpu.memory_space<vmem>>, vector<1x144x3xf32>
    %146 = vector.shape_cast %145 : vector<1x144x3xf32> to vector<144x3xf32>
    %c60 = arith.constant 60 : index
    %c0_82 = arith.constant 0 : index
    %147 = vector.load %arg3[%c60, %c0_82] : memref<147x8xf32, #tpu.memory_space<vmem>>, vector<3x8xf32>
    %cst_83 = arith.constant dense<0.000000e+00> : vector<144x8xf32>
    %148 = tpu.matmul %146, %147, %cst_83 {dimension_numbers = #tpu.dot_dimension_numbers<[1], [0], [0], [1], [0, 0, 1, 1], [], []>} : vector<144x3xf32>, vector<3x8xf32>, vector<144x8xf32> -> vector<144x8xf32>
    %149 = arith.addf %142, %148 : vector<144x8xf32>
    %c54_i32 = arith.constant 54 : i32
    %150 = arith.addi %1, %c54_i32 : i32
    %c0_84 = arith.constant 0 : index
    %151 = arith.index_cast %150 : i32 to index
    %c0_85 = arith.constant 0 : index
    %152 = vector.load %arg2[%c0_84, %151, %c0_85] : memref<1x258x3xf32, #tpu.memory_space<vmem>>, vector<1x144x3xf32>
    %153 = vector.shape_cast %152 : vector<1x144x3xf32> to vector<144x3xf32>
    %c63 = arith.constant 63 : index
    %c0_86 = arith.constant 0 : index
    %154 = vector.load %arg3[%c63, %c0_86] : memref<147x8xf32, #tpu.memory_space<vmem>>, vector<3x8xf32>
    %cst_87 = arith.constant dense<0.000000e+00> : vector<144x8xf32>
    %155 = tpu.matmul %153, %154, %cst_87 {dimension_numbers = #tpu.dot_dimension_numbers<[1], [0], [0], [1], [0, 0, 1, 1], [], []>} : vector<144x3xf32>, vector<3x8xf32>, vector<144x8xf32> -> vector<144x8xf32>
    %156 = arith.addf %149, %155 : vector<144x8xf32>
    %c55_i32 = arith.constant 55 : i32
    %157 = arith.addi %1, %c55_i32 : i32
    %c0_88 = arith.constant 0 : index
    %158 = arith.index_cast %157 : i32 to index
    %c0_89 = arith.constant 0 : index
    %159 = vector.load %arg2[%c0_88, %158, %c0_89] : memref<1x258x3xf32, #tpu.memory_space<vmem>>, vector<1x144x3xf32>
    %160 = vector.shape_cast %159 : vector<1x144x3xf32> to vector<144x3xf32>
    %c66 = arith.constant 66 : index
    %c0_90 = arith.constant 0 : index
    %161 = vector.load %arg3[%c66, %c0_90] : memref<147x8xf32, #tpu.memory_space<vmem>>, vector<3x8xf32>
    %cst_91 = arith.constant dense<0.000000e+00> : vector<144x8xf32>
    %162 = tpu.matmul %160, %161, %cst_91 {dimension_numbers = #tpu.dot_dimension_numbers<[1], [0], [0], [1], [0, 0, 1, 1], [], []>} : vector<144x3xf32>, vector<3x8xf32>, vector<144x8xf32> -> vector<144x8xf32>
    %163 = arith.addf %156, %162 : vector<144x8xf32>
    %c56_i32 = arith.constant 56 : i32
    %164 = arith.addi %1, %c56_i32 : i32
    %c0_92 = arith.constant 0 : index
    %165 = arith.index_cast %164 : i32 to index
    %c0_93 = arith.constant 0 : index
    %166 = vector.load %arg2[%c0_92, %165, %c0_93] : memref<1x258x3xf32, #tpu.memory_space<vmem>>, vector<1x144x3xf32>
    %167 = vector.shape_cast %166 : vector<1x144x3xf32> to vector<144x3xf32>
    %c69 = arith.constant 69 : index
    %c0_94 = arith.constant 0 : index
    %168 = vector.load %arg3[%c69, %c0_94] : memref<147x8xf32, #tpu.memory_space<vmem>>, vector<3x8xf32>
    %cst_95 = arith.constant dense<0.000000e+00> : vector<144x8xf32>
    %169 = tpu.matmul %167, %168, %cst_95 {dimension_numbers = #tpu.dot_dimension_numbers<[1], [0], [0], [1], [0, 0, 1, 1], [], []>} : vector<144x3xf32>, vector<3x8xf32>, vector<144x8xf32> -> vector<144x8xf32>
    %170 = arith.addf %163, %169 : vector<144x8xf32>
    %c57_i32 = arith.constant 57 : i32
    %171 = arith.addi %1, %c57_i32 : i32
    %c0_96 = arith.constant 0 : index
    %172 = arith.index_cast %171 : i32 to index
    %c0_97 = arith.constant 0 : index
    %173 = vector.load %arg2[%c0_96, %172, %c0_97] : memref<1x258x3xf32, #tpu.memory_space<vmem>>, vector<1x144x3xf32>
    %174 = vector.shape_cast %173 : vector<1x144x3xf32> to vector<144x3xf32>
    %c72 = arith.constant 72 : index
    %c0_98 = arith.constant 0 : index
    %175 = vector.load %arg3[%c72, %c0_98] : memref<147x8xf32, #tpu.memory_space<vmem>>, vector<3x8xf32>
    %cst_99 = arith.constant dense<0.000000e+00> : vector<144x8xf32>
    %176 = tpu.matmul %174, %175, %cst_99 {dimension_numbers = #tpu.dot_dimension_numbers<[1], [0], [0], [1], [0, 0, 1, 1], [], []>} : vector<144x3xf32>, vector<3x8xf32>, vector<144x8xf32> -> vector<144x8xf32>
    %177 = arith.addf %170, %176 : vector<144x8xf32>
    %c58_i32 = arith.constant 58 : i32
    %178 = arith.addi %1, %c58_i32 : i32
    %c0_100 = arith.constant 0 : index
    %179 = arith.index_cast %178 : i32 to index
    %c0_101 = arith.constant 0 : index
    %180 = vector.load %arg2[%c0_100, %179, %c0_101] : memref<1x258x3xf32, #tpu.memory_space<vmem>>, vector<1x144x3xf32>
    %181 = vector.shape_cast %180 : vector<1x144x3xf32> to vector<144x3xf32>
    %c75 = arith.constant 75 : index
    %c0_102 = arith.constant 0 : index
    %182 = vector.load %arg3[%c75, %c0_102] : memref<147x8xf32, #tpu.memory_space<vmem>>, vector<3x8xf32>
    %cst_103 = arith.constant dense<0.000000e+00> : vector<144x8xf32>
    %183 = tpu.matmul %181, %182, %cst_103 {dimension_numbers = #tpu.dot_dimension_numbers<[1], [0], [0], [1], [0, 0, 1, 1], [], []>} : vector<144x3xf32>, vector<3x8xf32>, vector<144x8xf32> -> vector<144x8xf32>
    %184 = arith.addf %177, %183 : vector<144x8xf32>
    %c59_i32 = arith.constant 59 : i32
    %185 = arith.addi %1, %c59_i32 : i32
    %c0_104 = arith.constant 0 : index
    %186 = arith.index_cast %185 : i32 to index
    %c0_105 = arith.constant 0 : index
    %187 = vector.load %arg2[%c0_104, %186, %c0_105] : memref<1x258x3xf32, #tpu.memory_space<vmem>>, vector<1x144x3xf32>
    %188 = vector.shape_cast %187 : vector<1x144x3xf32> to vector<144x3xf32>
    %c78 = arith.constant 78 : index
    %c0_106 = arith.constant 0 : index
    %189 = vector.load %arg3[%c78, %c0_106] : memref<147x8xf32, #tpu.memory_space<vmem>>, vector<3x8xf32>
    %cst_107 = arith.constant dense<0.000000e+00> : vector<144x8xf32>
    %190 = tpu.matmul %188, %189, %cst_107 {dimension_numbers = #tpu.dot_dimension_numbers<[1], [0], [0], [1], [0, 0, 1, 1], [], []>} : vector<144x3xf32>, vector<3x8xf32>, vector<144x8xf32> -> vector<144x8xf32>
    %191 = arith.addf %184, %190 : vector<144x8xf32>
    %c60_i32 = arith.constant 60 : i32
    %192 = arith.addi %1, %c60_i32 : i32
    %c0_108 = arith.constant 0 : index
    %193 = arith.index_cast %192 : i32 to index
    %c0_109 = arith.constant 0 : index
    %194 = vector.load %arg2[%c0_108, %193, %c0_109] : memref<1x258x3xf32, #tpu.memory_space<vmem>>, vector<1x144x3xf32>
    %195 = vector.shape_cast %194 : vector<1x144x3xf32> to vector<144x3xf32>
    %c81 = arith.constant 81 : index
    %c0_110 = arith.constant 0 : index
    %196 = vector.load %arg3[%c81, %c0_110] : memref<147x8xf32, #tpu.memory_space<vmem>>, vector<3x8xf32>
    %cst_111 = arith.constant dense<0.000000e+00> : vector<144x8xf32>
    %197 = tpu.matmul %195, %196, %cst_111 {dimension_numbers = #tpu.dot_dimension_numbers<[1], [0], [0], [1], [0, 0, 1, 1], [], []>} : vector<144x3xf32>, vector<3x8xf32>, vector<144x8xf32> -> vector<144x8xf32>
    %198 = arith.addf %191, %197 : vector<144x8xf32>
    %c72_i32 = arith.constant 72 : i32
    %199 = arith.addi %1, %c72_i32 : i32
    %c0_112 = arith.constant 0 : index
    %200 = arith.index_cast %199 : i32 to index
    %c0_113 = arith.constant 0 : index
    %201 = vector.load %arg2[%c0_112, %200, %c0_113] : memref<1x258x3xf32, #tpu.memory_space<vmem>>, vector<1x144x3xf32>
    %202 = vector.shape_cast %201 : vector<1x144x3xf32> to vector<144x3xf32>
    %c84 = arith.constant 84 : index
    %c0_114 = arith.constant 0 : index
    %203 = vector.load %arg3[%c84, %c0_114] : memref<147x8xf32, #tpu.memory_space<vmem>>, vector<3x8xf32>
    %cst_115 = arith.constant dense<0.000000e+00> : vector<144x8xf32>
    %204 = tpu.matmul %202, %203, %cst_115 {dimension_numbers = #tpu.dot_dimension_numbers<[1], [0], [0], [1], [0, 0, 1, 1], [], []>} : vector<144x3xf32>, vector<3x8xf32>, vector<144x8xf32> -> vector<144x8xf32>
    %205 = arith.addf %198, %204 : vector<144x8xf32>
    %c73_i32 = arith.constant 73 : i32
    %206 = arith.addi %1, %c73_i32 : i32
    %c0_116 = arith.constant 0 : index
    %207 = arith.index_cast %206 : i32 to index
    %c0_117 = arith.constant 0 : index
    %208 = vector.load %arg2[%c0_116, %207, %c0_117] : memref<1x258x3xf32, #tpu.memory_space<vmem>>, vector<1x144x3xf32>
    %209 = vector.shape_cast %208 : vector<1x144x3xf32> to vector<144x3xf32>
    %c87 = arith.constant 87 : index
    %c0_118 = arith.constant 0 : index
    %210 = vector.load %arg3[%c87, %c0_118] : memref<147x8xf32, #tpu.memory_space<vmem>>, vector<3x8xf32>
    %cst_119 = arith.constant dense<0.000000e+00> : vector<144x8xf32>
    %211 = tpu.matmul %209, %210, %cst_119 {dimension_numbers = #tpu.dot_dimension_numbers<[1], [0], [0], [1], [0, 0, 1, 1], [], []>} : vector<144x3xf32>, vector<3x8xf32>, vector<144x8xf32> -> vector<144x8xf32>
    %212 = arith.addf %205, %211 : vector<144x8xf32>
    %c74_i32 = arith.constant 74 : i32
    %213 = arith.addi %1, %c74_i32 : i32
    %c0_120 = arith.constant 0 : index
    %214 = arith.index_cast %213 : i32 to index
    %c0_121 = arith.constant 0 : index
    %215 = vector.load %arg2[%c0_120, %214, %c0_121] : memref<1x258x3xf32, #tpu.memory_space<vmem>>, vector<1x144x3xf32>
    %216 = vector.shape_cast %215 : vector<1x144x3xf32> to vector<144x3xf32>
    %c90 = arith.constant 90 : index
    %c0_122 = arith.constant 0 : index
    %217 = vector.load %arg3[%c90, %c0_122] : memref<147x8xf32, #tpu.memory_space<vmem>>, vector<3x8xf32>
    %cst_123 = arith.constant dense<0.000000e+00> : vector<144x8xf32>
    %218 = tpu.matmul %216, %217, %cst_123 {dimension_numbers = #tpu.dot_dimension_numbers<[1], [0], [0], [1], [0, 0, 1, 1], [], []>} : vector<144x3xf32>, vector<3x8xf32>, vector<144x8xf32> -> vector<144x8xf32>
    %219 = arith.addf %212, %218 : vector<144x8xf32>
    %c75_i32 = arith.constant 75 : i32
    %220 = arith.addi %1, %c75_i32 : i32
    %c0_124 = arith.constant 0 : index
    %221 = arith.index_cast %220 : i32 to index
    %c0_125 = arith.constant 0 : index
    %222 = vector.load %arg2[%c0_124, %221, %c0_125] : memref<1x258x3xf32, #tpu.memory_space<vmem>>, vector<1x144x3xf32>
    %223 = vector.shape_cast %222 : vector<1x144x3xf32> to vector<144x3xf32>
    %c93 = arith.constant 93 : index
    %c0_126 = arith.constant 0 : index
    %224 = vector.load %arg3[%c93, %c0_126] : memref<147x8xf32, #tpu.memory_space<vmem>>, vector<3x8xf32>
    %cst_127 = arith.constant dense<0.000000e+00> : vector<144x8xf32>
    %225 = tpu.matmul %223, %224, %cst_127 {dimension_numbers = #tpu.dot_dimension_numbers<[1], [0], [0], [1], [0, 0, 1, 1], [], []>} : vector<144x3xf32>, vector<3x8xf32>, vector<144x8xf32> -> vector<144x8xf32>
    %226 = arith.addf %219, %225 : vector<144x8xf32>
    %c76_i32 = arith.constant 76 : i32
    %227 = arith.addi %1, %c76_i32 : i32
    %c0_128 = arith.constant 0 : index
    %228 = arith.index_cast %227 : i32 to index
    %c0_129 = arith.constant 0 : index
    %229 = vector.load %arg2[%c0_128, %228, %c0_129] : memref<1x258x3xf32, #tpu.memory_space<vmem>>, vector<1x144x3xf32>
    %230 = vector.shape_cast %229 : vector<1x144x3xf32> to vector<144x3xf32>
    %c96 = arith.constant 96 : index
    %c0_130 = arith.constant 0 : index
    %231 = vector.load %arg3[%c96, %c0_130] : memref<147x8xf32, #tpu.memory_space<vmem>>, vector<3x8xf32>
    %cst_131 = arith.constant dense<0.000000e+00> : vector<144x8xf32>
    %232 = tpu.matmul %230, %231, %cst_131 {dimension_numbers = #tpu.dot_dimension_numbers<[1], [0], [0], [1], [0, 0, 1, 1], [], []>} : vector<144x3xf32>, vector<3x8xf32>, vector<144x8xf32> -> vector<144x8xf32>
    %233 = arith.addf %226, %232 : vector<144x8xf32>
    %c77_i32 = arith.constant 77 : i32
    %234 = arith.addi %1, %c77_i32 : i32
    %c0_132 = arith.constant 0 : index
    %235 = arith.index_cast %234 : i32 to index
    %c0_133 = arith.constant 0 : index
    %236 = vector.load %arg2[%c0_132, %235, %c0_133] : memref<1x258x3xf32, #tpu.memory_space<vmem>>, vector<1x144x3xf32>
    %237 = vector.shape_cast %236 : vector<1x144x3xf32> to vector<144x3xf32>
    %c99 = arith.constant 99 : index
    %c0_134 = arith.constant 0 : index
    %238 = vector.load %arg3[%c99, %c0_134] : memref<147x8xf32, #tpu.memory_space<vmem>>, vector<3x8xf32>
    %cst_135 = arith.constant dense<0.000000e+00> : vector<144x8xf32>
    %239 = tpu.matmul %237, %238, %cst_135 {dimension_numbers = #tpu.dot_dimension_numbers<[1], [0], [0], [1], [0, 0, 1, 1], [], []>} : vector<144x3xf32>, vector<3x8xf32>, vector<144x8xf32> -> vector<144x8xf32>
    %240 = arith.addf %233, %239 : vector<144x8xf32>
    %c78_i32 = arith.constant 78 : i32
    %241 = arith.addi %1, %c78_i32 : i32
    %c0_136 = arith.constant 0 : index
    %242 = arith.index_cast %241 : i32 to index
    %c0_137 = arith.constant 0 : index
    %243 = vector.load %arg2[%c0_136, %242, %c0_137] : memref<1x258x3xf32, #tpu.memory_space<vmem>>, vector<1x144x3xf32>
    %244 = vector.shape_cast %243 : vector<1x144x3xf32> to vector<144x3xf32>
    %c102 = arith.constant 102 : index
    %c0_138 = arith.constant 0 : index
    %245 = vector.load %arg3[%c102, %c0_138] : memref<147x8xf32, #tpu.memory_space<vmem>>, vector<3x8xf32>
    %cst_139 = arith.constant dense<0.000000e+00> : vector<144x8xf32>
    %246 = tpu.matmul %244, %245, %cst_139 {dimension_numbers = #tpu.dot_dimension_numbers<[1], [0], [0], [1], [0, 0, 1, 1], [], []>} : vector<144x3xf32>, vector<3x8xf32>, vector<144x8xf32> -> vector<144x8xf32>
    %247 = arith.addf %240, %246 : vector<144x8xf32>
    %c90_i32 = arith.constant 90 : i32
    %248 = arith.addi %1, %c90_i32 : i32
    %c0_140 = arith.constant 0 : index
    %249 = arith.index_cast %248 : i32 to index
    %c0_141 = arith.constant 0 : index
    %250 = vector.load %arg2[%c0_140, %249, %c0_141] : memref<1x258x3xf32, #tpu.memory_space<vmem>>, vector<1x144x3xf32>
    %251 = vector.shape_cast %250 : vector<1x144x3xf32> to vector<144x3xf32>
    %c105 = arith.constant 105 : index
    %c0_142 = arith.constant 0 : index
    %252 = vector.load %arg3[%c105, %c0_142] : memref<147x8xf32, #tpu.memory_space<vmem>>, vector<3x8xf32>
    %cst_143 = arith.constant dense<0.000000e+00> : vector<144x8xf32>
    %253 = tpu.matmul %251, %252, %cst_143 {dimension_numbers = #tpu.dot_dimension_numbers<[1], [0], [0], [1], [0, 0, 1, 1], [], []>} : vector<144x3xf32>, vector<3x8xf32>, vector<144x8xf32> -> vector<144x8xf32>
    %254 = arith.addf %247, %253 : vector<144x8xf32>
    %c91_i32 = arith.constant 91 : i32
    %255 = arith.addi %1, %c91_i32 : i32
    %c0_144 = arith.constant 0 : index
    %256 = arith.index_cast %255 : i32 to index
    %c0_145 = arith.constant 0 : index
    %257 = vector.load %arg2[%c0_144, %256, %c0_145] : memref<1x258x3xf32, #tpu.memory_space<vmem>>, vector<1x144x3xf32>
    %258 = vector.shape_cast %257 : vector<1x144x3xf32> to vector<144x3xf32>
    %c108 = arith.constant 108 : index
    %c0_146 = arith.constant 0 : index
    %259 = vector.load %arg3[%c108, %c0_146] : memref<147x8xf32, #tpu.memory_space<vmem>>, vector<3x8xf32>
    %cst_147 = arith.constant dense<0.000000e+00> : vector<144x8xf32>
    %260 = tpu.matmul %258, %259, %cst_147 {dimension_numbers = #tpu.dot_dimension_numbers<[1], [0], [0], [1], [0, 0, 1, 1], [], []>} : vector<144x3xf32>, vector<3x8xf32>, vector<144x8xf32> -> vector<144x8xf32>
    %261 = arith.addf %254, %260 : vector<144x8xf32>
    %c92_i32 = arith.constant 92 : i32
    %262 = arith.addi %1, %c92_i32 : i32
    %c0_148 = arith.constant 0 : index
    %263 = arith.index_cast %262 : i32 to index
    %c0_149 = arith.constant 0 : index
    %264 = vector.load %arg2[%c0_148, %263, %c0_149] : memref<1x258x3xf32, #tpu.memory_space<vmem>>, vector<1x144x3xf32>
    %265 = vector.shape_cast %264 : vector<1x144x3xf32> to vector<144x3xf32>
    %c111 = arith.constant 111 : index
    %c0_150 = arith.constant 0 : index
    %266 = vector.load %arg3[%c111, %c0_150] : memref<147x8xf32, #tpu.memory_space<vmem>>, vector<3x8xf32>
    %cst_151 = arith.constant dense<0.000000e+00> : vector<144x8xf32>
    %267 = tpu.matmul %265, %266, %cst_151 {dimension_numbers = #tpu.dot_dimension_numbers<[1], [0], [0], [1], [0, 0, 1, 1], [], []>} : vector<144x3xf32>, vector<3x8xf32>, vector<144x8xf32> -> vector<144x8xf32>
    %268 = arith.addf %261, %267 : vector<144x8xf32>
    %c93_i32 = arith.constant 93 : i32
    %269 = arith.addi %1, %c93_i32 : i32
    %c0_152 = arith.constant 0 : index
    %270 = arith.index_cast %269 : i32 to index
    %c0_153 = arith.constant 0 : index
    %271 = vector.load %arg2[%c0_152, %270, %c0_153] : memref<1x258x3xf32, #tpu.memory_space<vmem>>, vector<1x144x3xf32>
    %272 = vector.shape_cast %271 : vector<1x144x3xf32> to vector<144x3xf32>
    %c114 = arith.constant 114 : index
    %c0_154 = arith.constant 0 : index
    %273 = vector.load %arg3[%c114, %c0_154] : memref<147x8xf32, #tpu.memory_space<vmem>>, vector<3x8xf32>
    %cst_155 = arith.constant dense<0.000000e+00> : vector<144x8xf32>
    %274 = tpu.matmul %272, %273, %cst_155 {dimension_numbers = #tpu.dot_dimension_numbers<[1], [0], [0], [1], [0, 0, 1, 1], [], []>} : vector<144x3xf32>, vector<3x8xf32>, vector<144x8xf32> -> vector<144x8xf32>
    %275 = arith.addf %268, %274 : vector<144x8xf32>
    %c94_i32 = arith.constant 94 : i32
    %276 = arith.addi %1, %c94_i32 : i32
    %c0_156 = arith.constant 0 : index
    %277 = arith.index_cast %276 : i32 to index
    %c0_157 = arith.constant 0 : index
    %278 = vector.load %arg2[%c0_156, %277, %c0_157] : memref<1x258x3xf32, #tpu.memory_space<vmem>>, vector<1x144x3xf32>
    %279 = vector.shape_cast %278 : vector<1x144x3xf32> to vector<144x3xf32>
    %c117 = arith.constant 117 : index
    %c0_158 = arith.constant 0 : index
    %280 = vector.load %arg3[%c117, %c0_158] : memref<147x8xf32, #tpu.memory_space<vmem>>, vector<3x8xf32>
    %cst_159 = arith.constant dense<0.000000e+00> : vector<144x8xf32>
    %281 = tpu.matmul %279, %280, %cst_159 {dimension_numbers = #tpu.dot_dimension_numbers<[1], [0], [0], [1], [0, 0, 1, 1], [], []>} : vector<144x3xf32>, vector<3x8xf32>, vector<144x8xf32> -> vector<144x8xf32>
    %282 = arith.addf %275, %281 : vector<144x8xf32>
    %c95_i32 = arith.constant 95 : i32
    %283 = arith.addi %1, %c95_i32 : i32
    %c0_160 = arith.constant 0 : index
    %284 = arith.index_cast %283 : i32 to index
    %c0_161 = arith.constant 0 : index
    %285 = vector.load %arg2[%c0_160, %284, %c0_161] : memref<1x258x3xf32, #tpu.memory_space<vmem>>, vector<1x144x3xf32>
    %286 = vector.shape_cast %285 : vector<1x144x3xf32> to vector<144x3xf32>
    %c120 = arith.constant 120 : index
    %c0_162 = arith.constant 0 : index
    %287 = vector.load %arg3[%c120, %c0_162] : memref<147x8xf32, #tpu.memory_space<vmem>>, vector<3x8xf32>
    %cst_163 = arith.constant dense<0.000000e+00> : vector<144x8xf32>
    %288 = tpu.matmul %286, %287, %cst_163 {dimension_numbers = #tpu.dot_dimension_numbers<[1], [0], [0], [1], [0, 0, 1, 1], [], []>} : vector<144x3xf32>, vector<3x8xf32>, vector<144x8xf32> -> vector<144x8xf32>
    %289 = arith.addf %282, %288 : vector<144x8xf32>
    %c96_i32 = arith.constant 96 : i32
    %290 = arith.addi %1, %c96_i32 : i32
    %c0_164 = arith.constant 0 : index
    %291 = arith.index_cast %290 : i32 to index
    %c0_165 = arith.constant 0 : index
    %292 = vector.load %arg2[%c0_164, %291, %c0_165] : memref<1x258x3xf32, #tpu.memory_space<vmem>>, vector<1x144x3xf32>
    %293 = vector.shape_cast %292 : vector<1x144x3xf32> to vector<144x3xf32>
    %c123 = arith.constant 123 : index
    %c0_166 = arith.constant 0 : index
    %294 = vector.load %arg3[%c123, %c0_166] : memref<147x8xf32, #tpu.memory_space<vmem>>, vector<3x8xf32>
    %cst_167 = arith.constant dense<0.000000e+00> : vector<144x8xf32>
    %295 = tpu.matmul %293, %294, %cst_167 {dimension_numbers = #tpu.dot_dimension_numbers<[1], [0], [0], [1], [0, 0, 1, 1], [], []>} : vector<144x3xf32>, vector<3x8xf32>, vector<144x8xf32> -> vector<144x8xf32>
    %296 = arith.addf %289, %295 : vector<144x8xf32>
    %c108_i32 = arith.constant 108 : i32
    %297 = arith.addi %1, %c108_i32 : i32
    %c0_168 = arith.constant 0 : index
    %298 = arith.index_cast %297 : i32 to index
    %c0_169 = arith.constant 0 : index
    %299 = vector.load %arg2[%c0_168, %298, %c0_169] : memref<1x258x3xf32, #tpu.memory_space<vmem>>, vector<1x144x3xf32>
    %300 = vector.shape_cast %299 : vector<1x144x3xf32> to vector<144x3xf32>
    %c126 = arith.constant 126 : index
    %c0_170 = arith.constant 0 : index
    %301 = vector.load %arg3[%c126, %c0_170] : memref<147x8xf32, #tpu.memory_space<vmem>>, vector<3x8xf32>
    %cst_171 = arith.constant dense<0.000000e+00> : vector<144x8xf32>
    %302 = tpu.matmul %300, %301, %cst_171 {dimension_numbers = #tpu.dot_dimension_numbers<[1], [0], [0], [1], [0, 0, 1, 1], [], []>} : vector<144x3xf32>, vector<3x8xf32>, vector<144x8xf32> -> vector<144x8xf32>
    %303 = arith.addf %296, %302 : vector<144x8xf32>
    %c109_i32 = arith.constant 109 : i32
    %304 = arith.addi %1, %c109_i32 : i32
    %c0_172 = arith.constant 0 : index
    %305 = arith.index_cast %304 : i32 to index
    %c0_173 = arith.constant 0 : index
    %306 = vector.load %arg2[%c0_172, %305, %c0_173] : memref<1x258x3xf32, #tpu.memory_space<vmem>>, vector<1x144x3xf32>
    %307 = vector.shape_cast %306 : vector<1x144x3xf32> to vector<144x3xf32>
    %c129 = arith.constant 129 : index
    %c0_174 = arith.constant 0 : index
    %308 = vector.load %arg3[%c129, %c0_174] : memref<147x8xf32, #tpu.memory_space<vmem>>, vector<3x8xf32>
    %cst_175 = arith.constant dense<0.000000e+00> : vector<144x8xf32>
    %309 = tpu.matmul %307, %308, %cst_175 {dimension_numbers = #tpu.dot_dimension_numbers<[1], [0], [0], [1], [0, 0, 1, 1], [], []>} : vector<144x3xf32>, vector<3x8xf32>, vector<144x8xf32> -> vector<144x8xf32>
    %310 = arith.addf %303, %309 : vector<144x8xf32>
    %c110_i32 = arith.constant 110 : i32
    %311 = arith.addi %1, %c110_i32 : i32
    %c0_176 = arith.constant 0 : index
    %312 = arith.index_cast %311 : i32 to index
    %c0_177 = arith.constant 0 : index
    %313 = vector.load %arg2[%c0_176, %312, %c0_177] : memref<1x258x3xf32, #tpu.memory_space<vmem>>, vector<1x144x3xf32>
    %314 = vector.shape_cast %313 : vector<1x144x3xf32> to vector<144x3xf32>
    %c132 = arith.constant 132 : index
    %c0_178 = arith.constant 0 : index
    %315 = vector.load %arg3[%c132, %c0_178] : memref<147x8xf32, #tpu.memory_space<vmem>>, vector<3x8xf32>
    %cst_179 = arith.constant dense<0.000000e+00> : vector<144x8xf32>
    %316 = tpu.matmul %314, %315, %cst_179 {dimension_numbers = #tpu.dot_dimension_numbers<[1], [0], [0], [1], [0, 0, 1, 1], [], []>} : vector<144x3xf32>, vector<3x8xf32>, vector<144x8xf32> -> vector<144x8xf32>
    %317 = arith.addf %310, %316 : vector<144x8xf32>
    %c111_i32 = arith.constant 111 : i32
    %318 = arith.addi %1, %c111_i32 : i32
    %c0_180 = arith.constant 0 : index
    %319 = arith.index_cast %318 : i32 to index
    %c0_181 = arith.constant 0 : index
    %320 = vector.load %arg2[%c0_180, %319, %c0_181] : memref<1x258x3xf32, #tpu.memory_space<vmem>>, vector<1x144x3xf32>
    %321 = vector.shape_cast %320 : vector<1x144x3xf32> to vector<144x3xf32>
    %c135 = arith.constant 135 : index
    %c0_182 = arith.constant 0 : index
    %322 = vector.load %arg3[%c135, %c0_182] : memref<147x8xf32, #tpu.memory_space<vmem>>, vector<3x8xf32>
    %cst_183 = arith.constant dense<0.000000e+00> : vector<144x8xf32>
    %323 = tpu.matmul %321, %322, %cst_183 {dimension_numbers = #tpu.dot_dimension_numbers<[1], [0], [0], [1], [0, 0, 1, 1], [], []>} : vector<144x3xf32>, vector<3x8xf32>, vector<144x8xf32> -> vector<144x8xf32>
    %324 = arith.addf %317, %323 : vector<144x8xf32>
    %c112_i32 = arith.constant 112 : i32
    %325 = arith.addi %1, %c112_i32 : i32
    %c0_184 = arith.constant 0 : index
    %326 = arith.index_cast %325 : i32 to index
    %c0_185 = arith.constant 0 : index
    %327 = vector.load %arg2[%c0_184, %326, %c0_185] : memref<1x258x3xf32, #tpu.memory_space<vmem>>, vector<1x144x3xf32>
    %328 = vector.shape_cast %327 : vector<1x144x3xf32> to vector<144x3xf32>
    %c138 = arith.constant 138 : index
    %c0_186 = arith.constant 0 : index
    %329 = vector.load %arg3[%c138, %c0_186] : memref<147x8xf32, #tpu.memory_space<vmem>>, vector<3x8xf32>
    %cst_187 = arith.constant dense<0.000000e+00> : vector<144x8xf32>
    %330 = tpu.matmul %328, %329, %cst_187 {dimension_numbers = #tpu.dot_dimension_numbers<[1], [0], [0], [1], [0, 0, 1, 1], [], []>} : vector<144x3xf32>, vector<3x8xf32>, vector<144x8xf32> -> vector<144x8xf32>
    %331 = arith.addf %324, %330 : vector<144x8xf32>
    %c113_i32 = arith.constant 113 : i32
    %332 = arith.addi %1, %c113_i32 : i32
    %c0_188 = arith.constant 0 : index
    %333 = arith.index_cast %332 : i32 to index
    %c0_189 = arith.constant 0 : index
    %334 = vector.load %arg2[%c0_188, %333, %c0_189] : memref<1x258x3xf32, #tpu.memory_space<vmem>>, vector<1x144x3xf32>
    %335 = vector.shape_cast %334 : vector<1x144x3xf32> to vector<144x3xf32>
    %c141 = arith.constant 141 : index
    %c0_190 = arith.constant 0 : index
    %336 = vector.load %arg3[%c141, %c0_190] : memref<147x8xf32, #tpu.memory_space<vmem>>, vector<3x8xf32>
    %cst_191 = arith.constant dense<0.000000e+00> : vector<144x8xf32>
    %337 = tpu.matmul %335, %336, %cst_191 {dimension_numbers = #tpu.dot_dimension_numbers<[1], [0], [0], [1], [0, 0, 1, 1], [], []>} : vector<144x3xf32>, vector<3x8xf32>, vector<144x8xf32> -> vector<144x8xf32>
    %338 = arith.addf %331, %337 : vector<144x8xf32>
    %c114_i32 = arith.constant 114 : i32
    %339 = arith.addi %1, %c114_i32 : i32
    %c0_192 = arith.constant 0 : index
    %340 = arith.index_cast %339 : i32 to index
    %c0_193 = arith.constant 0 : index
    %341 = vector.load %arg2[%c0_192, %340, %c0_193] : memref<1x258x3xf32, #tpu.memory_space<vmem>>, vector<1x144x3xf32>
    %342 = vector.shape_cast %341 : vector<1x144x3xf32> to vector<144x3xf32>
    %c144 = arith.constant 144 : index
    %c0_194 = arith.constant 0 : index
    %343 = vector.load %arg3[%c144, %c0_194] : memref<147x8xf32, #tpu.memory_space<vmem>>, vector<3x8xf32>
    %cst_195 = arith.constant dense<0.000000e+00> : vector<144x8xf32>
    %344 = tpu.matmul %342, %343, %cst_195 {dimension_numbers = #tpu.dot_dimension_numbers<[1], [0], [0], [1], [0, 0, 1, 1], [], []>} : vector<144x3xf32>, vector<3x8xf32>, vector<144x8xf32> -> vector<144x8xf32>
    %345 = arith.addf %338, %344 : vector<144x8xf32>
    %c0_196 = arith.constant 0 : index
    %c0_197 = arith.constant 0 : index
    %346 = vector.load %arg4[%c0_196, %c0_197] : memref<1x8xf32, #tpu.memory_space<vmem>>, vector<1x8xf32>
    %347 = vector.broadcast %346 : vector<1x8xf32> to vector<144x8xf32>
    %348 = arith.addf %345, %347 : vector<144x8xf32>
    %c0_198 = arith.constant 0 : index
    %c0_199 = arith.constant 0 : index
    %c0_200 = arith.constant 0 : index
    %349 = vector.load %arg5[%c0_198, %c0_199, %c0_200] : memref<1x144x8xf32, #tpu.memory_space<vmem>>, vector<1x144x8xf32>
    %350 = vector.shape_cast %349 : vector<1x144x8xf32> to vector<144x8xf32>
    %351 = vector.shape_cast %348 : vector<144x8xf32> to vector<1x144x8xf32>
    tpu.vector_store %arg5[%c0_198, %c0_199, %c0_200], %351 {strides = array<i32>} : memref<1x144x8xf32, #tpu.memory_space<vmem>>, vector<1x144x8xf32>,
    return
  }
  func.func @transform_0(%arg0: i32, %arg1: i32) -> (i32, i32, i32) {
    %c0_i32 = arith.constant 0 : i32
    %c0_i32_0 = arith.constant 0 : i32
    %c0_i32_1 = arith.constant 0 : i32
    return %arg0, %c0_i32, %c0_i32_0 : i32, i32, i32
  }
  func.func @transform_1(%arg0: i32, %arg1: i32) -> (i32, i32) {
    %c0_i32 = arith.constant 0 : i32
    %c0_i32_0 = arith.constant 0 : i32
    %c0_i32_1 = arith.constant 0 : i32
    return %c0_i32, %c0_i32_0 : i32, i32
  }
  func.func @transform_2(%arg0: i32, %arg1: i32) -> (i32, i32) {
    %c0_i32 = arith.constant 0 : i32
    %c0_i32_0 = arith.constant 0 : i32
    %c0_i32_1 = arith.constant 0 : i32
    return %c0_i32, %c0_i32_0 : i32, i32
  }
  func.func @transform_3(%arg0: i32, %arg1: i32) -> (i32, i32, i32) {
    %c0_i32 = arith.constant 0 : i32
    %c0_i32_0 = arith.constant 0 : i32
    return %arg0, %arg1, %c0_i32 : i32, i32, i32
  }
}

</mosaic_0001>

<bundles_post_ra>
// kernel: tpu_custom_call.1
= control target key start
LH: loop header
LB: loop body
LE: loop exit
PB: predicated region body
PF: predicated region fallthrough
CT: control target
= control target key end

     0   :  { %s17824_s12 = smov 0   ;;  %s17826_s13 = smov 0   ;;  %s20934_s0 = inlined_call_operand.vmem [shape: f32[2,258,3], index: 0, kind: input, shape index: {}]   ;;  %s20935_s1 = inlined_call_operand.vmem [shape: f32[147,8], index: 1, kind: input, shape index: {}]   ;;  %s20936_s2 = inlined_call_operand.vmem [shape: f32[1,8], index: 2, kind: input, shape index: {}]   ;;  %s20937_s3 = inlined_call_operand.vmem [shape: f32[2,144,8], index: 3, kind: output, shape index: {}]  }
   0x1   :  { %s17828_s14 = smov 0  }
   0x2 LB: > { %s25_s15 = sadd.s32 1, %s17798_s13  ;;  %p12734_p0 = scmp.ge.s32.totalorder %s17802_s14, 1  ;;  %s17802_s14 = sphi %s17828_s14, %s13_s14   ;;  %s17798_s13 = sphi %s17826_s13, %s21105_s13   ;;  %s17794_s12 = sphi %s17824_s12, %s21104_s12  }
   0x3   : > { %p27_p1 = scmp.ge.s32.totalorder %s25_s15, 2  ;;  %p151_p2 = scmp.lt.s32.totalorder %s17802_s14, 3 }
   0x5   : > { %s21107_s15 = smov (%p27_p1, %s25_s15), 0  ;;  %p152_p3 = pnand %p12734_p0, %p151_p2 }
   0x7   : > { %155 = sbr.rel (%p152_p3) target bundleno = 1120 (0x460), region = 32 }
   0xe   : > { %vm291_vm0 = vcmask 1042432   ;;  %v6204_v0 = vld [vmem:[%s20935_s1 + $0x48] sm:$0x7]  ;;  %v235_v1 = vld [vmem:[%s20935_s1 + $0x3] sm:$0x7]  ;;  %p179_p4 = scmp.lt.s32.totalorder %s17794_s12, 1 }
   0xf   : > { %16162 = vmatprep.subr.msk.mxu0 %vm291_vm0, %v6204_v0  ;;  %15466 = vmatprep.subr.msk.mxu1 %vm291_vm0, %v235_v1  ;;  %v6455_v2 = vld [vmem:[%s20935_s1 + $0x4b] sm:$0x7]  ;;  %v214_v3 = vld [vmem:[%s20935_s1] sm:$0x7]  ;;  %vm236_vm1 = vcmask 23552   ;;  %vm12484_vm2 = vcmask 64512  }
  0x10   : > { %16163 = vmatpush3.msk.msra.mxu0 %vm291_vm0, %v6204_v0  ;;  %15467 = vmatpush3.msk.msra.mxu1 %vm291_vm0, %v235_v1  ;;  %s21109_s12 = smov (!%p179_p4, %s17794_s12), 1  ;;  %v6706_v10 = vld [vmem:[%s20935_s1 + $0x4e] sm:$0x7]  ;;  %v17886_v11 = vld [vmem:[%s20935_s1 + $0x6] sm:$0x7] }
  0x11   : > { %16191 = vmatprep.subr.msk.mxu0 %vm291_vm0, %v6455_v2  ;;  %15495 = vmatprep.subr.msk.mxu1 %vm291_vm0, %v214_v3  ;;  %s17753_s24 = smul.u32 264, %s21109_s12  ;;  %v17959_v26 = vld [vmem:[%s20935_s1 + $0x51] sm:$0x7]  ;;  %v18031_v39 = vld [vmem:[%s20935_s1 + $0x9] sm:$0x7] }
  0x12   : > { %v18117_v60 = vld [vmem:[%s20935_s1 + $0x54] sm:$0x7]  ;;  %s17754_s5 = smul.u32 144, %s21109_s12 }
  0x13   : > { %s17866_s27 = scalar_lea.vmem %s20934_s0, %s17753_s24 }
  0x14   : > { %v12737_v4 = vld [vmem:[%s17866_s27 + $0x1] sm:$0xff]  ;;  %v13607_v5 = vld [vmem:[%s17866_s27 + $0x39] sm:$0xff]  ;;  %v12738_v6 = vld [vmem:[%s17866_s27 + $0x9] sm:$0xff]  ;;  %s20869_s9 = scalar_lea.vmem %s20937_s3, %s17754_s5 }
  0x15   : > { %15468 = vmatprep.mubr.msk.f32.mxu1 %vm236_vm1, %v12737_v4  ;;  %16164 = vmatprep.mubr.msk.f32.mxu0 %vm236_vm1, %v13607_v5  ;;  %v13608_v7 = vld [vmem:[%s17866_s27 + $0x41] sm:$0xff]  ;;  %v12739_v8 = vld [vmem:[%s17866_s27 + $0x11] sm:$0xff]  ;;  %v17876_v9 = vld [vmem:[%s17866_s27 + $0x49] sm:$0xff] }
  0x16   : > { %15469 = vmatmul.mubr.msk.f32.vlgmr.msra.gmra.mrb[0].mxu1 %vm236_vm1, %v12738_v6  ;;  %16165 = vmatmul.mubr.msk.f32.vlgmr.msra.gmra.mrb[0].mxu0 %vm236_vm1, %v13608_v7  ;;  %v12740_v12 = vld [vmem:[%s17866_s27 + $0x19] sm:$0xff]  ;;  %v17892_v13 = vld [vmem:[%s17866_s27 + $0x51] sm:$0xff]  ;;  %v12741_v14 = vld [vmem:[%s17866_s27 + $0x21] sm:$0xff] }
  0x17   : > { %16192 = vmatpush3.msk.msra.mxu0 %vm291_vm0, %v6455_v2  ;;  %15471 = vmatprep.mubr.msk.f32.mxu1 %vm236_vm1, %v12739_v8  ;;  %v17899_v15 = vld [vmem:[%s17866_s27 + $0x59] sm:$0xff]  ;;  %v12742_v16 = vld [vmem:[%s17866_s27 + $0x29] sm:$0xff]  ;;  %v17912_v17 = vld [vmem:[%s17866_s27 + $0x61] sm:$0xff] }
  0x18   : > { %16167 = vmatprep.mubr.msk.f32.mxu0 %vm236_vm1, %v17876_v9  ;;  %15496 = vmatpush3.msk.msra.mxu1 %vm291_vm0, %v214_v3  ;;  %v12743_v18 = vld [vmem:[%s17866_s27 + $0x31] sm:$0xff]  ;;  %v17916_v19 = vld [vmem:[%s17866_s27 + $0x69] sm:$0xff]  ;;  %v17928_v21 = vld [vmem:[%s17866_s27 + $0x79] sm:$0xff] }
  0x19   : > { %16220 = vmatprep.subr.msk.mxu0 %vm291_vm0, %v6706_v10  ;;  %15524 = vmatprep.subr.msk.mxu1 %vm291_vm0, %v17886_v11  ;;  %v17925_v20 = vld [vmem:[%s17866_s27 + $0x71] sm:$0xff]  ;;  %v17937_v22 = vld [vmem:[%s17866_s27 + $0x81] sm:$0xff]  ;;  %v18001_v31 = vld [vmem:[%s17866_s27 + $0x89] sm:$0xff] }
  0x1a   : > { %15472 = vmatmul.mubr.msk.f32.gmra.mrb[2].mxu1 %vm236_vm1, %v12740_v12  ;;  %16168 = vmatmul.mubr.msk.f32.gmra.mrb[2].mxu0 %vm236_vm1, %v17892_v13  ;;  %v17940_v23 = vld [vmem:[%s17866_s27 + $0x3a] sm:$0xff]  ;;  %v17951_v24 = vld [vmem:[%s17866_s27 + $0x42] sm:$0xff]  ;;  %v17954_v25 = vld [vmem:[%s17866_s27 + $0x4a] sm:$0xff] }
  0x1b   : > { %15474 = vmatprep.mubr.msk.f32.mxu1 %vm236_vm1, %v12741_v14  ;;  %16170 = vmatprep.mubr.msk.f32.mxu0 %vm236_vm1, %v17899_v15  ;;  %v17969_v27 = vld [vmem:[%s17866_s27 + $0x52] sm:$0xff]  ;;  %v17974_v28 = vld [vmem:[%s17866_s27 + $0x5a] sm:$0xff]  ;;  %v17987_v29 = vld [vmem:[%s17866_s27 + $0x62] sm:$0xff] }
  0x1c   : > { %v17990_v30 = vld [vmem:[%s17866_s27 + $0x6a] sm:$0xff]  ;;  %v18004_v32 = vld [vmem:[%s17866_s27 + $0x72] sm:$0xff]  ;;  %v196_v33 = vld [vmem:[%s17866_s27] sm:$0xff] }
  0x1d   : > { %v18008_v34 = vld [vmem:[%s17866_s27 + $0x7a] sm:$0xff]  ;;  %v197_v35 = vld [vmem:[%s17866_s27 + $0x8] sm:$0xff]  ;;  %v198_v37 = vld [vmem:[%s17866_s27 + $0x10] sm:$0xff] }
  0x1e   : > { %15475 = vmatmul.mubr.msk.f32.gmra.mrb[4].mxu1 %vm236_vm1, %v12742_v16  ;;  %16171 = vmatmul.mubr.msk.f32.gmra.mrb[4].mxu0 %vm236_vm1, %v17912_v17  ;;  %v18019_v36 = vld [vmem:[%s17866_s27 + $0x82] sm:$0xff]  ;;  %v18023_v38 = vld [vmem:[%s17866_s27 + $0x8a] sm:$0xff]  ;;  %v199_v40 = vld [vmem:[%s17866_s27 + $0x18] sm:$0xff] }
  0x1f   : > { %15477 = vmatprep.mubr.msk.f32.mxu1 %vm236_vm1, %v12743_v18  ;;  %16173 = vmatprep.mubr.msk.f32.mxu0 %vm236_vm1, %v17916_v19  ;;  %v18038_v41 = vld [vmem:[%s17866_s27 + $0x92] sm:$0xff]  ;;  %v200_v42 = vld [vmem:[%s17866_s27 + $0x20] sm:$0xff]  ;;  %v201_v44 = vld [vmem:[%s17866_s27 + $0x28] sm:$0xff] }
  0x20   : > { %v18044_v43 = vld [vmem:[%s17866_s27 + $0x9a] sm:$0xff]  ;;  %v18056_v45 = vld [vmem:[%s17866_s27 + $0xa2] sm:$0xff]  ;;  %v202_v46 = vld [vmem:[%s17866_s27 + $0x30] sm:$0xff] }
  0x21   : > { %v18060_v47 = vld [vmem:[%s17866_s27 + $0xaa] sm:$0xff]  ;;  %v203_v48 = vld [vmem:[%s17866_s27 + $0x38] sm:$0xff]  ;;  %v204_v50 = vld [vmem:[%s17866_s27 + $0x40] sm:$0xff] }
  0x22   : > { %15478 = vmatmul.mubr.msk.f32.gmra.mrb[6].mxu1 %vm236_vm1, %v13607_v5  ;;  %16174 = vmatmul.mubr.msk.f32.gmra.mrb[6].mxu0 %vm236_vm1, %v17925_v20  ;;  %v18070_v49 = vld [vmem:[%s17866_s27 + $0xb2] sm:$0xff]  ;;  %v18074_v51 = vld [vmem:[%s17866_s27 + $0xba] sm:$0xff]  ;;  %v18083_v52 = vld [vmem:[%s17866_s27 + $0x48] sm:$0xff] }
  0x23   : > { %15480 = vmatprep.mubr.msk.f32.mxu1 %vm236_vm1, %v13608_v7  ;;  %16176 = vmatprep.mubr.msk.f32.mxu0 %vm236_vm1, %v17928_v21  ;;  %20996 = vst [vmem:[#allocation2_spill] sm:$0xff] %v18074_v51  ;;  %v18086_v53 = vld [vmem:[%s17866_s27 + $0xc2] sm:$0xff]  ;;  %v18089_v54 = vld [vmem:[%s17866_s27 + $0x50] sm:$0xff]  ;;  %v18103_v56 = vld [vmem:[%s17866_s27 + $0x58] sm:$0xff] }
  0x24   : > { %20997 = vst [vmem:[#allocation3_spill] sm:$0xff] %v18086_v53  ;;  %v18092_v55 = vld [vmem:[%s17866_s27 + $0x3b] sm:$0xff]  ;;  %v18106_v57 = vld [vmem:[%s17866_s27 + $0x43] sm:$0xff]  ;;  %v18112_v59 = vld [vmem:[%s17866_s27 + $0x4b] sm:$0xff] }
  0x25   : > { %v18109_v58 = vld [vmem:[%s17866_s27 + $0x60] sm:$0xff]  ;;  %v18128_v61 = vld [vmem:[%s17866_s27 + $0x68] sm:$0xff]  ;;  %v18131_v62 = vld [vmem:[%s17866_s27 + $0x53] sm:$0xff] }
  0x26   : > { %15481 = vmatmul.mubr.msk.f32.gmra.mrb[8].mxu1 %vm236_vm1, %v17876_v9  ;;  %16177 = vmatmul.mubr.msk.f32.gmra.mrb[8].mxu0 %vm236_vm1, %v17937_v22  ;;  %v18136_v63 = vld [vmem:[%s17866_s27 + $0x70] sm:$0xff]  ;;  %v18139_v0 = vld [vmem:[%s17866_s27 + $0x5b] sm:$0xff]  ;;  %v18155_v2 = vld [vmem:[%s17866_s27 + $0x63] sm:$0xff] }
  0x27   : > { %15483 = vmatprep.mubr.msk.f32.mxu1 %vm236_vm1, %v17892_v13  ;;  %16193 = vmatprep.mubr.msk.f32.mxu0 %vm236_vm1, %v17940_v23  ;;  %v18152_v1 = vld [vmem:[%s17866_s27 + $0x78] sm:$0xff]  ;;  %v18158_v3 = vld [vmem:[%s17866_s27 + $0x80] sm:$0xff]  ;;  %v18161_v4 = vld [vmem:[%s17866_s27 + $0x6b] sm:$0xff] }
  0x28   : > { %v18172_v5 = vld [vmem:[%s17866_s27 + $0x88] sm:$0xff]  ;;  %v18175_v6 = vld [vmem:[%s17866_s27 + $0x73] sm:$0xff]  ;;  %v18179_v8 = vld [vmem:[%s17866_s27 + $0x7b] sm:$0xff] }
  0x29   : > { %v12793_v7 = vld [vmem:[%s17866_s27 + $0x2] sm:$0xff]  ;;  %v18193_v12 = vld [vmem:[%s17866_s27 + $0x12] sm:$0xff]  ;;  %v18204_v16 = vld [vmem:[%s20935_s1 + $0xc] sm:$0x7] }
  0x2a   : > { %15484 = vmatmul.mubr.msk.f32.gmra.mrb[10].mxu1 %vm236_vm1, %v17899_v15  ;;  %16194 = vmatmul.mubr.msk.f32.vlgmr.msra.gmra.mrb[0].mxu0 %vm236_vm1, %v17951_v24  ;;  %20998 = vst [vmem:[#allocation4_spill] sm:$0xff] %v18193_v12  ;;  %v18196_v14 = vld [vmem:[%s17866_s27 + $0x8b] sm:$0xff]  ;;  %v18211_v18 = vld [vmem:[%s17866_s27 + $0x1a] sm:$0xff] }
  0x2b   : > { %16221 = vmatpush3.msk.msra.mxu0 %vm291_vm0, %v6706_v10  ;;  %15486 = vmatprep.mubr.msk.f32.mxu1 %vm236_vm1, %v17912_v17  ;;  %v12794_v10 = vld [vmem:[%s17866_s27 + $0xa] sm:$0xff]  ;;  %20999 = vst [vmem:[#allocation5_spill] sm:$0xff] %v18211_v18 }
  0x2c   : > { %16196 = vmatprep.mubr.msk.f32.mxu0 %vm236_vm1, %v17954_v25  ;;  %16249 = vmatprep.subr.msk.mxu0 %vm291_vm0, %v17959_v26 }
  0x2e   : > { %15487 = vmatmul.mubr.msk.f32.gmra.mrb[12].mxu1 %vm236_vm1, %v17916_v19  ;;  %16197 = vmatmul.mubr.msk.f32.gmra.mrb[2].mxu0 %vm236_vm1, %v17969_v27 }
  0x2f   : > { %15489 = vmatprep.mubr.msk.f32.mxu1 %vm236_vm1, %v17925_v20  ;;  %16199 = vmatprep.mubr.msk.f32.mxu0 %vm236_vm1, %v17974_v28 }
  0x32   : > { %15490 = vmatmul.mubr.msk.f32.gmra.mrb[14].mxu1 %vm236_vm1, %v17928_v21  ;;  %16200 = vmatmul.mubr.msk.f32.gmra.mrb[4].mxu0 %vm236_vm1, %v17987_v29 }
  0x33   : > { %15492 = vmatprep.mubr.msk.f32.mxu1 %vm236_vm1, %v17937_v22  ;;  %16202 = vmatprep.mubr.msk.f32.mxu0 %vm236_vm1, %v17990_v30 }
  0x36   : > { %15493 = vmatmul.mubr.msk.f32.gmra.mrb[16].mxu1 %vm236_vm1, %v18001_v31  ;;  %16203 = vmatmul.mubr.msk.f32.gmra.mrb[6].mxu0 %vm236_vm1, %v18004_v32 }
  0x37   : > { %15497 = vmatprep.mubr.msk.f32.mxu1 %vm236_vm1, %v196_v33  ;;  %16205 = vmatprep.mubr.msk.f32.mxu0 %vm236_vm1, %v18008_v34  ;;  %v18219_v33 = vld [vmem:[%s17866_s27 + $0x22] sm:$0xff] }
  0x38   : > { %21001 = vst [vmem:[#allocation7_spill] sm:$0xff] %v18219_v33 }
  0x3a   : > { %15498 = vmatmul.mubr.msk.f32.vlgmr.msra.gmra.mrb[0].mxu1 %vm236_vm1, %v197_v35  ;;  %16206 = vmatmul.mubr.msk.f32.gmra.mrb[8].mxu0 %vm236_vm1, %v18019_v36  ;;  %v18222_v35 = vld [vmem:[%s17866_s27 + $0x9b] sm:$0xff] }
  0x3b   : > { %15500 = vmatprep.mubr.msk.f32.mxu1 %vm236_vm1, %v198_v37  ;;  %16208 = vmatprep.mubr.msk.f32.mxu0 %vm236_vm1, %v18023_v38  ;;  %21002 = vst [vmem:[#allocation8_spill] sm:$0xff] %v18222_v35  ;;  %v18235_v37 = vld [vmem:[%s17866_s27 + $0x2a] sm:$0xff] }
  0x3c   : > { %15525 = vmatpush3.msk.msra.mxu1 %vm291_vm0, %v17886_v11  ;;  %v18190_v11 = vld [vmem:[%s17866_s27 + $0x83] sm:$0xff]  ;;  %21003 = vst [vmem:[#allocation9_spill] sm:$0xff] %v18235_v37 }
  0x3d   : > { %15553 = vmatprep.subr.msk.mxu1 %vm291_vm0, %v18031_v39 }
  0x3e   : > { %15501 = vmatmul.mubr.msk.f32.gmra.mrb[2].mxu1 %vm236_vm1, %v199_v40  ;;  %16209 = vmatmul.mubr.msk.f32.gmra.mrb[10].mxu0 %vm236_vm1, %v18038_v41  ;;  %v18241_v40 = vld [vmem:[%s17866_s27 + $0x32] sm:$0xff] }
  0x3f   : > { %15503 = vmatprep.mubr.msk.f32.mxu1 %vm236_vm1, %v200_v42  ;;  %16211 = vmatprep.mubr.msk.f32.mxu0 %vm236_vm1, %v18044_v43  ;;  %21005 = vst [vmem:[#allocation11_spill] sm:$0xff] %v18241_v40  ;;  %v18244_v42 = vld [vmem:[%s17866_s27 + $0xab] sm:$0xff] }
  0x40   : > { %21006 = vst [vmem:[#allocation12_spill] sm:$0xff] %v18244_v42 }
  0x42   : > { %15504 = vmatmul.mubr.msk.f32.gmra.mrb[4].mxu1 %vm236_vm1, %v201_v44  ;;  %16212 = vmatmul.mubr.msk.f32.gmra.mrb[12].mxu0 %vm236_vm1, %v18056_v45  ;;  %v18255_v44 = vld [vmem:[%s17866_s27 + $0xb3] sm:$0xff] }
  0x43   : > { %15506 = vmatprep.mubr.msk.f32.mxu1 %vm236_vm1, %v202_v46  ;;  %16214 = vmatprep.mubr.msk.f32.mxu0 %vm236_vm1, %v18060_v47  ;;  %21007 = vst [vmem:[#allocation13_spill] sm:$0xff] %v18255_v44  ;;  %v18258_v46 = vld [vmem:[%s17866_s27 + $0xbb] sm:$0xff] }
  0x44   : > { %21008 = vst [vmem:[#allocation14_spill] sm:$0xff] %v18258_v46 }
  0x46   : > { %15507 = vmatmul.mubr.msk.f32.gmra.mrb[6].mxu1 %vm236_vm1, %v203_v48  ;;  %16215 = vmatmul.mubr.msk.f32.gmra.mrb[14].mxu0 %vm236_vm1, %v18070_v49  ;;  %v18269_v48 = vld [vmem:[%s17866_s27 + $0xc3] sm:$0xff] }
  0x47   : > { %15509 = vmatprep.mubr.msk.f32.mxu1 %vm236_vm1, %v204_v50  ;;  %16217 = vmatprep.mubr.msk.f32.mxu0 %vm236_vm1, %v18074_v51  ;;  %21009 = vst [vmem:[#allocation15_spill] sm:$0xff] %v18269_v48  ;;  %v18272_v50 = vld [vmem:[%s17866_s27 + $0x3c] sm:$0xff]  ;;  %v18403_v51 = vld [vmem:[%s17866_s27 + $0xac] sm:$0xff] }
  0x4a   : > { %15510 = vmatmul.mubr.msk.f32.gmra.mrb[8].mxu1 %vm236_vm1, %v18083_v52  ;;  %16218 = vmatmul.mubr.msk.f32.gmra.mrb[16].mxu0 %vm236_vm1, %v18086_v53  ;;  %v18400_v53 = vld [vmem:[%s17866_s27 + $0x33] sm:$0xff] }
  0x4b   : > { %15512 = vmatprep.mubr.msk.f32.mxu1 %vm236_vm1, %v18089_v54  ;;  %16222 = vmatprep.mubr.msk.f32.mxu0 %vm236_vm1, %v18092_v55  ;;  %21013 = vst [vmem:[#allocation19_spill] sm:$0xff] %v18400_v53 }
  0x4e   : > { %15513 = vmatmul.mubr.msk.f32.gmra.mrb[10].mxu1 %vm236_vm1, %v18103_v56  ;;  %16223 = vmatmul.mubr.msk.f32.vlgmr.msra.gmra.mrb[0].mxu0 %vm236_vm1, %v18106_v57 }
  0x4f   : > { %16250 = vmatpush3.msk.msra.mxu0 %vm291_vm0, %v17959_v26  ;;  %15515 = vmatprep.mubr.msk.f32.mxu1 %vm236_vm1, %v18109_v58  ;;  %v18214_v26 = vld [vmem:[%s17866_s27 + $0x93] sm:$0xff] }
  0x50   : > { %16225 = vmatprep.mubr.msk.f32.mxu0 %vm236_vm1, %v18112_v59  ;;  %16278 = vmatprep.subr.msk.mxu0 %vm291_vm0, %v18117_v60  ;;  %21000 = vst [vmem:[#allocation6_spill] sm:$0xff] %v18214_v26 }
  0x52   : > { %15516 = vmatmul.mubr.msk.f32.gmra.mrb[12].mxu1 %vm236_vm1, %v18128_v61  ;;  %16226 = vmatmul.mubr.msk.f32.gmra.mrb[2].mxu0 %vm236_vm1, %v18131_v62 }
  0x53   : > { %15518 = vmatprep.mubr.msk.f32.mxu1 %vm236_vm1, %v18136_v63  ;;  %16228 = vmatprep.mubr.msk.f32.mxu0 %vm236_vm1, %v18139_v0 }
  0x56   : > { %15519 = vmatmul.mubr.msk.f32.gmra.mrb[14].mxu1 %vm236_vm1, %v18152_v1  ;;  %16229 = vmatmul.mubr.msk.f32.gmra.mrb[4].mxu0 %vm236_vm1, %v18155_v2 }
  0x57   : > { %15521 = vmatprep.mubr.msk.f32.mxu1 %vm236_vm1, %v18158_v3  ;;  %16231 = vmatprep.mubr.msk.f32.mxu0 %vm236_vm1, %v18161_v4 }
  0x5a   : > { %15522 = vmatmul.mubr.msk.f32.gmra.mrb[16].mxu1 %vm236_vm1, %v18172_v5  ;;  %16232 = vmatmul.mubr.msk.f32.gmra.mrb[6].mxu0 %vm236_vm1, %v18175_v6 }
  0x5b   : > { %15526 = vmatprep.mubr.msk.f32.mxu1 %vm236_vm1, %v12793_v7  ;;  %16234 = vmatprep.mubr.msk.f32.mxu0 %vm236_vm1, %v18179_v8  ;;  %v18291_v7 = vld [vmem:[%s20935_s1 + $0x57] sm:$0x7] }
  0x5e   : > { %15527 = vmatmul.mubr.msk.f32.vlgmr.msra.gmra.mrb[0].mxu1 %vm236_vm1, %v12794_v10  ;;  %16235 = vmatmul.mubr.msk.f32.gmra.mrb[8].mxu0 %vm236_vm1, %v18190_v11  ;;  %v18302_v10 = vld [vmem:[%s17866_s27 + $0x54] sm:$0xff] }
  0x5f   : > { %15529 = vmatprep.mubr.msk.f32.mxu1 %vm236_vm1, %v18193_v12  ;;  %16237 = vmatprep.mubr.msk.f32.mxu0 %vm236_vm1, %v18196_v14  ;;  %v18381_v12 = vld [vmem:[%s17866_s27 + $0x9c] sm:$0xff] }
  0x60   : > { %15554 = vmatpush3.msk.msra.mxu1 %vm291_vm0, %v18031_v39  ;;  %v18238_v39 = vld [vmem:[%s17866_s27 + $0xa3] sm:$0xff]  ;;  %21012 = vst [vmem:[#allocation18_spill] sm:$0xff] %v18381_v12 }
  0x61   : > { %15582 = vmatprep.subr.msk.mxu1 %vm291_vm0, %v18204_v16  ;;  %21004 = vst [vmem:[#allocation10_spill] sm:$0xff] %v18238_v39 }
  0x62   : > { %15530 = vmatmul.mubr.msk.f32.gmra.mrb[2].mxu1 %vm236_vm1, %v18211_v18  ;;  %16238 = vmatmul.mubr.msk.f32.gmra.mrb[10].mxu0 %vm236_vm1, %v18214_v26  ;;  %v18370_v26 = vld [vmem:[%s17866_s27 + $0x1b] sm:$0xff]  ;;  %v18378_v18 = vld [vmem:[%s17866_s27 + $0x23] sm:$0xff] }
  0x63   : > { %15532 = vmatprep.mubr.msk.f32.mxu1 %vm236_vm1, %v18219_v33  ;;  %16240 = vmatprep.mubr.msk.f32.mxu0 %vm236_vm1, %v18222_v35  ;;  %v18352_v35 = vld [vmem:[%s17866_s27 + $0x13] sm:$0xff]  ;;  %21011 = vst [vmem:[#allocation17_spill] sm:$0xff] %v18378_v18 }
  0x64   : > { %21010 = vst [vmem:[#allocation16_spill] sm:$0xff] %v18352_v35  ;;  %v18355_v33 = vld [vmem:[%s17866_s27 + $0x8c] sm:$0xff] }
  0x66   : > { %15533 = vmatmul.mubr.msk.f32.gmra.mrb[4].mxu1 %vm236_vm1, %v18235_v37  ;;  %16241 = vmatmul.mubr.msk.f32.gmra.mrb[12].mxu0 %vm236_vm1, %v18238_v39  ;;  %v12831_v39 = vld [vmem:[%s17866_s27 + $0xb] sm:$0xff] }
  0x67   : > { %15535 = vmatprep.mubr.msk.f32.mxu1 %vm236_vm1, %v18241_v40  ;;  %16243 = vmatprep.mubr.msk.f32.mxu0 %vm236_vm1, %v18244_v42  ;;  %v12830_v42 = vld [vmem:[%s17866_s27 + $0x3] sm:$0xff] }
  0x68   : > { %v18338_v40 = vld [vmem:[%s17866_s27 + $0x7c] sm:$0xff]  ;;  %v18349_v37 = vld [vmem:[%s17866_s27 + $0x84] sm:$0xff] }
  0x6a   : > { %15536 = vmatmul.mubr.msk.f32.gmra.mrb[6].mxu1 %vm236_vm1, %v17940_v23  ;;  %16244 = vmatmul.mubr.msk.f32.gmra.mrb[14].mxu0 %vm236_vm1, %v18255_v44  ;;  %v18283_v23 = vld [vmem:[%s17866_s27 + $0x44] sm:$0xff]  ;;  %v18334_v44 = vld [vmem:[%s17866_s27 + $0x74] sm:$0xff] }
  0x6b   : > { %15538 = vmatprep.mubr.msk.f32.mxu1 %vm236_vm1, %v17951_v24  ;;  %16246 = vmatprep.mubr.msk.f32.mxu0 %vm236_vm1, %v18258_v46  ;;  %v18286_v24 = vld [vmem:[%s17866_s27 + $0x4c] sm:$0xff] }
  0x6c   : > { %v18323_v46 = vld [vmem:[%s17866_s27 + $0x6c] sm:$0xff] }
  0x6e   : > { %15539 = vmatmul.mubr.msk.f32.gmra.mrb[8].mxu1 %vm236_vm1, %v17954_v25  ;;  %16247 = vmatmul.mubr.msk.f32.gmra.mrb[16].mxu0 %vm236_vm1, %v18269_v48  ;;  %v18307_v48 = vld [vmem:[%s17866_s27 + $0x5c] sm:$0xff] }
  0x6f   : > { %15541 = vmatprep.mubr.msk.f32.mxu1 %vm236_vm1, %v17969_v27  ;;  %16251 = vmatprep.mubr.msk.f32.mxu0 %vm236_vm1, %v18272_v50 }
  0x72   : > { %15542 = vmatmul.mubr.msk.f32.gmra.mrb[10].mxu1 %vm236_vm1, %v17974_v28  ;;  %16252 = vmatmul.mubr.msk.f32.vlgmr.msra.gmra.mrb[0].mxu0 %vm236_vm1, %v18283_v23 }
  0x73   : > { %16279 = vmatpush3.msk.msra.mxu0 %vm291_vm0, %v18117_v60  ;;  %15544 = vmatprep.mubr.msk.f32.mxu1 %vm236_vm1, %v17987_v29  ;;  %v18320_v60 = vld [vmem:[%s17866_s27 + $0x64] sm:$0xff] }
  0x74   : > { %16254 = vmatprep.mubr.msk.f32.mxu0 %vm236_vm1, %v18286_v24  ;;  %16307 = vmatprep.subr.msk.mxu0 %vm291_vm0, %v18291_v7 }
  0x76   : > { %15545 = vmatmul.mubr.msk.f32.gmra.mrb[12].mxu1 %vm236_vm1, %v17990_v30  ;;  %16255 = vmatmul.mubr.msk.f32.gmra.mrb[2].mxu0 %vm236_vm1, %v18302_v10 }
  0x77   : > { %15547 = vmatprep.mubr.msk.f32.mxu1 %vm236_vm1, %v18004_v32  ;;  %16257 = vmatprep.mubr.msk.f32.mxu0 %vm236_vm1, %v18307_v48 }
  0x7a   : > { %15548 = vmatmul.mubr.msk.f32.gmra.mrb[14].mxu1 %vm236_vm1, %v18008_v34  ;;  %16258 = vmatmul.mubr.msk.f32.gmra.mrb[4].mxu0 %vm236_vm1, %v18320_v60 }
  0x7b   : > { %15550 = vmatprep.mubr.msk.f32.mxu1 %vm236_vm1, %v18019_v36  ;;  %16260 = vmatprep.mubr.msk.f32.mxu0 %vm236_vm1, %v18323_v46 }
  0x7e   : > { %15551 = vmatmul.mubr.msk.f32.gmra.mrb[16].mxu1 %vm236_vm1, %v18023_v38  ;;  %16261 = vmatmul.mubr.msk.f32.gmra.mrb[6].mxu0 %vm236_vm1, %v18334_v44 }
  0x7f   : > { %15555 = vmatprep.mubr.msk.f32.mxu1 %vm236_vm1, %v12830_v42  ;;  %16263 = vmatprep.mubr.msk.f32.mxu0 %vm236_vm1, %v18338_v40  ;;  %v18363_v42 = vld [vmem:[%s20935_s1 + $0xf] sm:$0x7] }
  0x82   : > { %15556 = vmatmul.mubr.msk.f32.vlgmr.msra.gmra.mrb[0].mxu1 %vm236_vm1, %v12831_v39  ;;  %16264 = vmatmul.mubr.msk.f32.gmra.mrb[8].mxu0 %vm236_vm1, %v18349_v37  ;;  %v18373_v39 = vld [vmem:[%s17866_s27 + $0x94] sm:$0xff] }
  0x83   : > { %15558 = vmatprep.mubr.msk.f32.mxu1 %vm236_vm1, %v18352_v35  ;;  %16266 = vmatprep.mubr.msk.f32.mxu0 %vm236_vm1, %v18355_v33  ;;  %v18397_v35 = vld [vmem:[%s17866_s27 + $0xa4] sm:$0xff] }
  0x84   : > { %15583 = vmatpush3.msk.msra.mxu1 %vm291_vm0, %v18204_v16  ;;  %v18394_v16 = vld [vmem:[%s17866_s27 + $0x2b] sm:$0xff] }
  0x85   : > { %15611 = vmatprep.subr.msk.mxu1 %vm291_vm0, %v18363_v42 }
  0x86   : > { %15559 = vmatmul.mubr.msk.f32.gmra.mrb[2].mxu1 %vm236_vm1, %v18370_v26  ;;  %16267 = vmatmul.mubr.msk.f32.gmra.mrb[10].mxu0 %vm236_vm1, %v18373_v39 }
  0x87   : > { %15561 = vmatprep.mubr.msk.f32.mxu1 %vm236_vm1, %v18378_v18  ;;  %16269 = vmatprep.mubr.msk.f32.mxu0 %vm236_vm1, %v18381_v12  ;;  %v18414_v12 = vld [vmem:[%s17866_s27 + $0xb4] sm:$0xff]  ;;  %v18417_v18 = vld [vmem:[%s17866_s27 + $0xbc] sm:$0xff] }
  0x8a   : > { %15562 = vmatmul.mubr.msk.f32.gmra.mrb[4].mxu1 %vm236_vm1, %v18394_v16  ;;  %16270 = vmatmul.mubr.msk.f32.gmra.mrb[12].mxu0 %vm236_vm1, %v18397_v35 }
  0x8b   : > { %15564 = vmatprep.mubr.msk.f32.mxu1 %vm236_vm1, %v18400_v53  ;;  %16272 = vmatprep.mubr.msk.f32.mxu0 %vm236_vm1, %v18403_v51  ;;  %v18428_v53 = vld [vmem:[%s17866_s27 + $0xc4] sm:$0xff] }
  0x8e   : > { %15565 = vmatmul.mubr.msk.f32.gmra.mrb[6].mxu1 %vm236_vm1, %v18092_v55  ;;  %16273 = vmatmul.mubr.msk.f32.gmra.mrb[14].mxu0 %vm236_vm1, %v18414_v12  ;;  %v7710_v55 = vld [vmem:[%s20935_s1 + $0x5a] sm:$0x7] }
  0x8f   : > { %15567 = vmatprep.mubr.msk.f32.mxu1 %vm236_vm1, %v18106_v57  ;;  %16275 = vmatprep.mubr.msk.f32.mxu0 %vm236_vm1, %v18417_v18  ;;  %v18479_v57 = vld [vmem:[%s17866_s27 + $0x14] sm:$0xff] }
  0x92   : > { %15568 = vmatmul.mubr.msk.f32.gmra.mrb[8].mxu1 %vm236_vm1, %v18112_v59  ;;  %16276 = vmatmul.mubr.msk.f32.gmra.mrb[16].mxu0 %vm236_vm1, %v18428_v53 }
  0x93   : > { %15570 = vmatprep.mubr.msk.f32.mxu1 %vm236_vm1, %v18131_v62  ;;  %16280 = vmatprep.mubr.msk.f32.mxu0 %vm236_vm1, %v18083_v52  ;;  %v12867_v52 = vld [vmem:[%s17866_s27 + $0x4] sm:$0xff] }
  0x96   : > { %15571 = vmatmul.mubr.msk.f32.gmra.mrb[10].mxu1 %vm236_vm1, %v18139_v0  ;;  %16281 = vmatmul.mubr.msk.f32.vlgmr.msra.gmra.mrb[0].mxu0 %vm236_vm1, %v18089_v54  ;;  %v12868_v54 = vld [vmem:[%s17866_s27 + $0xc] sm:$0xff] }
  0x97   : > { %16308 = vmatpush3.msk.msra.mxu0 %vm291_vm0, %v18291_v7  ;;  %15573 = vmatprep.mubr.msk.f32.mxu1 %vm236_vm1, %v18155_v2  ;;  %v18511_v7 = vld [vmem:[%s17866_s27 + $0x2c] sm:$0xff] }
  0x98   : > { %16283 = vmatprep.mubr.msk.f32.mxu0 %vm236_vm1, %v18103_v56  ;;  %16336 = vmatprep.subr.msk.mxu0 %vm291_vm0, %v7710_v55  ;;  %v13764_v56 = vld [vmem:[%s17866_s27 + $0x90] sm:$0xff] }
  0x9a   : > { %15574 = vmatmul.mubr.msk.f32.gmra.mrb[12].mxu1 %vm236_vm1, %v18161_v4  ;;  %16284 = vmatmul.mubr.msk.f32.gmra.mrb[2].mxu0 %vm236_vm1, %v18109_v58  ;;  %v13765_v58 = vld [vmem:[%s17866_s27 + $0x98] sm:$0xff] }
  0x9b   : > { %15576 = vmatprep.mubr.msk.f32.mxu1 %vm236_vm1, %v18175_v6  ;;  %16286 = vmatprep.mubr.msk.f32.mxu0 %vm236_vm1, %v18128_v61  ;;  %v18487_v61 = vld [vmem:[%s20935_s1 + $0x12] sm:$0x7] }
  0x9e   : > { %15577 = vmatmul.mubr.msk.f32.gmra.mrb[14].mxu1 %vm236_vm1, %v18179_v8  ;;  %16287 = vmatmul.mubr.msk.f32.gmra.mrb[4].mxu0 %vm236_vm1, %v18136_v63  ;;  %v18493_v63 = vld [vmem:[%s17866_s27 + $0x1c] sm:$0xff] }
  0x9f   : > { %15579 = vmatprep.mubr.msk.f32.mxu1 %vm236_vm1, %v18190_v11  ;;  %16289 = vmatprep.mubr.msk.f32.mxu0 %vm236_vm1, %v18152_v1  ;;  %v13766_v1 = vld [vmem:[%s17866_s27 + $0xa0] sm:$0xff] }
  0xa2   : > { %15580 = vmatmul.mubr.msk.f32.gmra.mrb[16].mxu1 %vm236_vm1, %v18196_v14  ;;  %16290 = vmatmul.mubr.msk.f32.gmra.mrb[6].mxu0 %vm236_vm1, %v18158_v3  ;;  %v18499_v3 = vld [vmem:[%s17866_s27 + $0x24] sm:$0xff] }
  0xa3   : > { %15584 = vmatprep.mubr.msk.f32.mxu1 %vm236_vm1, %v12867_v52  ;;  %16292 = vmatprep.mubr.msk.f32.mxu0 %vm236_vm1, %v18172_v5  ;;  %v13767_v5 = vld [vmem:[%s17866_s27 + $0xa8] sm:$0xff]  ;;  %v18515_v52 = vld [vmem:[%s17866_s27 + $0x34] sm:$0xff] }
  0xa6   : > { %15585 = vmatmul.mubr.msk.f32.vlgmr.msra.gmra.mrb[0].mxu1 %vm236_vm1, %v12868_v54  ;;  %16293 = vmatmul.mubr.msk.f32.gmra.mrb[8].mxu0 %vm236_vm1, %v13764_v56  ;;  %v13769_v54 = vld [vmem:[%s17866_s27 + $0xb8] sm:$0xff]  ;;  %v13770_v56 = vld [vmem:[%s17866_s27 + $0xc0] sm:$0xff] }
  0xa7   : > { %15587 = vmatprep.mubr.msk.f32.mxu1 %vm236_vm1, %v18479_v57  ;;  %16295 = vmatprep.mubr.msk.f32.mxu0 %vm236_vm1, %v13765_v58  ;;  %v13771_v58 = vld [vmem:[%s17866_s27 + $0xc8] sm:$0xff] }
  0xa8   : > { %15612 = vmatpush3.msk.msra.mxu1 %vm291_vm0, %v18363_v42  ;;  %v13768_v42 = vld [vmem:[%s17866_s27 + $0xb0] sm:$0xff] }
  0xa9   : > { %15640 = vmatprep.subr.msk.mxu1 %vm291_vm0, %v18487_v61 }
  0xaa   : > { %15588 = vmatmul.mubr.msk.f32.gmra.mrb[2].mxu1 %vm236_vm1, %v18493_v63  ;;  %16296 = vmatmul.mubr.msk.f32.gmra.mrb[10].mxu0 %vm236_vm1, %v13766_v1  ;;  %v13772_v1 = vld [vmem:[%s17866_s27 + $0xd0] sm:$0xff] }
  0xab   : > { %15590 = vmatprep.mubr.msk.f32.mxu1 %vm236_vm1, %v18499_v3  ;;  %16298 = vmatprep.mubr.msk.f32.mxu0 %vm236_vm1, %v13767_v5  ;;  %v18619_v5 = vld [vmem:[%s17866_s27 + $0x35] sm:$0xff] }
  0xae   : > { %15591 = vmatmul.mubr.msk.f32.gmra.mrb[4].mxu1 %vm236_vm1, %v18511_v7  ;;  %16299 = vmatmul.mubr.msk.f32.gmra.mrb[12].mxu0 %vm236_vm1, %v13768_v42  ;;  %v13806_v42 = vld [vmem:[%s17866_s27 + $0xb9] sm:$0xff] }
  0xaf   : > { %15593 = vmatprep.mubr.msk.f32.mxu1 %vm236_vm1, %v18515_v52  ;;  %16301 = vmatprep.mubr.msk.f32.mxu0 %vm236_vm1, %v13769_v54  ;;  %v18629_v54 = vld [vmem:[%s17866_s27 + $0x3d] sm:$0xff] }
  0xb2   : > { %15594 = vmatmul.mubr.msk.f32.gmra.mrb[6].mxu1 %vm236_vm1, %v18272_v50  ;;  %16302 = vmatmul.mubr.msk.f32.gmra.mrb[14].mxu0 %vm236_vm1, %v13770_v56  ;;  %v18543_v50 = vld [vmem:[%s20935_s1 + $0x5d] sm:$0x7]  ;;  %v13807_v56 = vld [vmem:[%s17866_s27 + $0xc1] sm:$0xff] }
  0xb3   : > { %15596 = vmatprep.mubr.msk.f32.mxu1 %vm236_vm1, %v18283_v23  ;;  %16304 = vmatprep.mubr.msk.f32.mxu0 %vm236_vm1, %v13771_v58  ;;  %v13804_v23 = vld [vmem:[%s17866_s27 + $0xa9] sm:$0xff] }
  0xb4   : > { %v18633_v58 = vld [vmem:[%s17866_s27 + $0x45] sm:$0xff] }
  0xb6   : > { %15597 = vmatmul.mubr.msk.f32.gmra.mrb[8].mxu1 %vm236_vm1, %v18286_v24  ;;  %16305 = vmatmul.mubr.msk.f32.gmra.mrb[16].mxu0 %vm236_vm1, %v13772_v1  ;;  %v13808_v1 = vld [vmem:[%s17866_s27 + $0xc9] sm:$0xff] }
  0xb7   : > { %15599 = vmatprep.mubr.msk.f32.mxu1 %vm236_vm1, %v18302_v10  ;;  %16309 = vmatprep.mubr.msk.f32.mxu0 %vm236_vm1, %v17876_v9  ;;  %v12904_v9 = vld [vmem:[%s17866_s27 + $0x5] sm:$0xff] }
  0xba   : > { %15600 = vmatmul.mubr.msk.f32.gmra.mrb[10].mxu1 %vm236_vm1, %v18307_v48  ;;  %16310 = vmatmul.mubr.msk.f32.vlgmr.msra.gmra.mrb[0].mxu0 %vm236_vm1, %v17892_v13  ;;  %v12905_v13 = vld [vmem:[%s17866_s27 + $0xd] sm:$0xff] }
  0xbb   : > { %16337 = vmatpush3.msk.msra.mxu0 %vm291_vm0, %v7710_v55  ;;  %15602 = vmatprep.mubr.msk.f32.mxu1 %vm236_vm1, %v18320_v60  ;;  %v18615_v55 = vld [vmem:[%s17866_s27 + $0x2d] sm:$0xff] }
  0xbc   : > { %16312 = vmatprep.mubr.msk.f32.mxu0 %vm236_vm1, %v17899_v15  ;;  %16365 = vmatprep.subr.msk.mxu0 %vm291_vm0, %v18543_v50  ;;  %v13801_v15 = vld [vmem:[%s17866_s27 + $0x91] sm:$0xff] }
  0xbe   : > { %15603 = vmatmul.mubr.msk.f32.gmra.mrb[12].mxu1 %vm236_vm1, %v18323_v46  ;;  %16313 = vmatmul.mubr.msk.f32.gmra.mrb[2].mxu0 %vm236_vm1, %v17912_v17  ;;  %v18583_v17 = vld [vmem:[%s17866_s27 + $0x15] sm:$0xff] }
  0xbf   : > { %15605 = vmatprep.mubr.msk.f32.mxu1 %vm236_vm1, %v18334_v44  ;;  %16315 = vmatprep.mubr.msk.f32.mxu0 %vm236_vm1, %v17916_v19  ;;  %v13802_v19 = vld [vmem:[%s17866_s27 + $0x99] sm:$0xff] }
  0xc2   : > { %15606 = vmatmul.mubr.msk.f32.gmra.mrb[14].mxu1 %vm236_vm1, %v18338_v40  ;;  %16316 = vmatmul.mubr.msk.f32.gmra.mrb[4].mxu0 %vm236_vm1, %v17925_v20  ;;  %v18591_v20 = vld [vmem:[%s20935_s1 + $0x15] sm:$0x7] }
  0xc3   : > { %15608 = vmatprep.mubr.msk.f32.mxu1 %vm236_vm1, %v18349_v37  ;;  %16318 = vmatprep.mubr.msk.f32.mxu0 %vm236_vm1, %v17928_v21  ;;  %v18597_v21 = vld [vmem:[%s17866_s27 + $0x1d] sm:$0xff] }
  0xc6   : > { %15609 = vmatmul.mubr.msk.f32.gmra.mrb[16].mxu1 %vm236_vm1, %v18355_v33  ;;  %16319 = vmatmul.mubr.msk.f32.gmra.mrb[6].mxu0 %vm236_vm1, %v17937_v22  ;;  %v13803_v22 = vld [vmem:[%s17866_s27 + $0xa1] sm:$0xff] }
  0xc7   : > { %15613 = vmatprep.mubr.msk.f32.mxu1 %vm236_vm1, %v12904_v9  ;;  %16321 = vmatprep.mubr.msk.f32.mxu0 %vm236_vm1, %v18001_v31  ;;  %v18603_v31 = vld [vmem:[%s17866_s27 + $0x25] sm:$0xff]  ;;  %v18643_v9 = vld [vmem:[%s17866_s27 + $0x4d] sm:$0xff] }
  0xca   : > { %15614 = vmatmul.mubr.msk.f32.vlgmr.msra.gmra.mrb[0].mxu1 %vm236_vm1, %v12905_v13  ;;  %16322 = vmatmul.mubr.msk.f32.gmra.mrb[8].mxu0 %vm236_vm1, %v13801_v15  ;;  %v13809_v13 = vld [vmem:[%s17866_s27 + $0xd1] sm:$0xff] }
  0xcb   : > { %15616 = vmatprep.mubr.msk.f32.mxu1 %vm236_vm1, %v18583_v17  ;;  %16324 = vmatprep.mubr.msk.f32.mxu0 %vm236_vm1, %v13802_v19  ;;  %v18647_v15 = vld [vmem:[%s17866_s27 + $0x55] sm:$0xff]  ;;  %v18657_v19 = vld [vmem:[%s17866_s27 + $0x5d] sm:$0xff] }
  0xcc   : > { %15641 = vmatpush3.msk.msra.mxu1 %vm291_vm0, %v18487_v61  ;;  %v13805_v61 = vld [vmem:[%s17866_s27 + $0xb1] sm:$0xff] }
  0xcd   : > { %15669 = vmatprep.subr.msk.mxu1 %vm291_vm0, %v18591_v20 }
  0xce   : > { %15617 = vmatmul.mubr.msk.f32.gmra.mrb[2].mxu1 %vm236_vm1, %v18597_v21  ;;  %16325 = vmatmul.mubr.msk.f32.gmra.mrb[10].mxu0 %vm236_vm1, %v13803_v22  ;;  %v18660_v22 = vld [vmem:[%s17866_s27 + $0x65] sm:$0xff] }
  0xcf   : > { %15619 = vmatprep.mubr.msk.f32.mxu1 %vm236_vm1, %v18603_v31  ;;  %16327 = vmatprep.mubr.msk.f32.mxu0 %vm236_vm1, %v13804_v23  ;;  %v18665_v23 = vld [vmem:[%s20935_s1 + $0x60] sm:$0x7] }
  0xd2   : > { %15620 = vmatmul.mubr.msk.f32.gmra.mrb[4].mxu1 %vm236_vm1, %v18615_v55  ;;  %16328 = vmatmul.mubr.msk.f32.gmra.mrb[12].mxu0 %vm236_vm1, %v13805_v61  ;;  %v18681_v61 = vld [vmem:[%s17866_s27 + $0x75] sm:$0xff] }
  0xd3   : > { %15622 = vmatprep.mubr.msk.f32.mxu1 %vm236_vm1, %v18619_v5  ;;  %16330 = vmatprep.mubr.msk.f32.mxu0 %vm236_vm1, %v13806_v42  ;;  %v18770_v42 = vld [vmem:[%s17866_s27 + $0xca] sm:$0xff] }
  0xd6   : > { %15623 = vmatmul.mubr.msk.f32.gmra.mrb[6].mxu1 %vm236_vm1, %v18629_v54  ;;  %16331 = vmatmul.mubr.msk.f32.gmra.mrb[14].mxu0 %vm236_vm1, %v13807_v56  ;;  %v21016_v56 = vld [vmem:[#allocation3_spill] sm:$0xff] }
  0xd7   : > { %15625 = vmatprep.mubr.msk.f32.mxu1 %vm236_vm1, %v18633_v58  ;;  %16333 = vmatprep.mubr.msk.f32.mxu0 %vm236_vm1, %v13808_v1  ;;  %v18784_v1 = vld [vmem:[%s17866_s27 + $0xd2] sm:$0xff] }
  0xd8   : > { %21017 = vst [vmem:[#allocation3_spill] sm:$0xff] %v18784_v1 }
  0xda   : > { %15626 = vmatmul.mubr.msk.f32.gmra.mrb[8].mxu1 %vm236_vm1, %v18643_v9  ;;  %16334 = vmatmul.mubr.msk.f32.gmra.mrb[16].mxu0 %vm236_vm1, %v13809_v13  ;;  %v18787_v13 = vld [vmem:[%s17866_s27 + $0x56] sm:$0xff] }
  0xdb   : > { %15628 = vmatprep.mubr.msk.f32.mxu1 %vm236_vm1, %v18647_v15  ;;  %16338 = vmatprep.mubr.msk.f32.mxu0 %vm236_vm1, %v17954_v25  ;;  %v18676_v25 = vld [vmem:[%s17866_s27 + $0x6d] sm:$0xff] }
  0xde   : > { %15629 = vmatmul.mubr.msk.f32.gmra.mrb[10].mxu1 %vm236_vm1, %v18657_v19  ;;  %16339 = vmatmul.mubr.msk.f32.vlgmr.msra.gmra.mrb[0].mxu0 %vm236_vm1, %v17969_v27  ;;  %v18694_v27 = vld [vmem:[%s17866_s27 + $0x7d] sm:$0xff] }
  0xdf   : > { %16366 = vmatpush3.msk.msra.mxu0 %vm291_vm0, %v18543_v50  ;;  %15631 = vmatprep.mubr.msk.f32.mxu1 %vm236_vm1, %v18660_v22  ;;  %v18720_v50 = vld [vmem:[%s17866_s27 + $0x16] sm:$0xff] }
  0xe0   : > { %16341 = vmatprep.mubr.msk.f32.mxu0 %vm236_vm1, %v17974_v28  ;;  %16394 = vmatprep.subr.msk.mxu0 %vm291_vm0, %v18665_v23  ;;  %v18697_v28 = vld [vmem:[%s17866_s27 + $0x85] sm:$0xff] }
  0xe2   : > { %15632 = vmatmul.mubr.msk.f32.gmra.mrb[12].mxu1 %vm236_vm1, %v18676_v25  ;;  %16342 = vmatmul.mubr.msk.f32.gmra.mrb[2].mxu0 %vm236_vm1, %v17987_v29  ;;  %v18708_v29 = vld [vmem:[%s17866_s27 + $0x8d] sm:$0xff] }
  0xe3   : > { %15634 = vmatprep.mubr.msk.f32.mxu1 %vm236_vm1, %v18681_v61  ;;  %16344 = vmatprep.mubr.msk.f32.mxu0 %vm236_vm1, %v17990_v30  ;;  %v12941_v30 = vld [vmem:[%s17866_s27 + $0x6] sm:$0xff] }
  0xe6   : > { %15635 = vmatmul.mubr.msk.f32.gmra.mrb[14].mxu1 %vm236_vm1, %v18694_v27  ;;  %16345 = vmatmul.mubr.msk.f32.gmra.mrb[4].mxu0 %vm236_vm1, %v18004_v32  ;;  %v12942_v32 = vld [vmem:[%s17866_s27 + $0xe] sm:$0xff] }
  0xe7   : > { %15637 = vmatprep.mubr.msk.f32.mxu1 %vm236_vm1, %v18697_v28  ;;  %16347 = vmatprep.mubr.msk.f32.mxu0 %vm236_vm1, %v18008_v34  ;;  %v2188_v34 = vld [vmem:[%s20935_s1 + $0x18] sm:$0x7] }
  0xea   : > { %15638 = vmatmul.mubr.msk.f32.gmra.mrb[16].mxu1 %vm236_vm1, %v18708_v29  ;;  %16348 = vmatmul.mubr.msk.f32.gmra.mrb[6].mxu0 %vm236_vm1, %v18019_v36  ;;  %v18733_v36 = vld [vmem:[%s17866_s27 + $0x1e] sm:$0xff] }
  0xeb   : > { %15642 = vmatprep.mubr.msk.f32.mxu1 %vm236_vm1, %v12941_v30  ;;  %16350 = vmatprep.mubr.msk.f32.mxu0 %vm236_vm1, %v18023_v38  ;;  %v18738_v38 = vld [vmem:[%s17866_s27 + $0x26] sm:$0xff]  ;;  %v18798_v30 = vld [vmem:[%s17866_s27 + $0x5e] sm:$0xff] }
  0xee   : > { %15643 = vmatmul.mubr.msk.f32.vlgmr.msra.gmra.mrb[0].mxu1 %vm236_vm1, %v12942_v32  ;;  %16351 = vmatmul.mubr.msk.f32.gmra.mrb[8].mxu0 %vm236_vm1, %v18038_v41  ;;  %v18750_v41 = vld [vmem:[%s17866_s27 + $0x2e] sm:$0xff]  ;;  %v18801_v32 = vld [vmem:[%s17866_s27 + $0x66] sm:$0xff] }
  0xef   : > { %15645 = vmatprep.mubr.msk.f32.mxu1 %vm236_vm1, %v18720_v50  ;;  %16353 = vmatprep.mubr.msk.f32.mxu0 %vm236_vm1, %v18044_v43  ;;  %v18753_v43 = vld [vmem:[%s17866_s27 + $0x36] sm:$0xff] }
  0xf0   : > { %15670 = vmatpush3.msk.msra.mxu1 %vm291_vm0, %v18591_v20  ;;  %v18767_v20 = vld [vmem:[%s17866_s27 + $0x46] sm:$0xff] }
  0xf1   : > { %15698 = vmatprep.subr.msk.mxu1 %vm291_vm0, %v2188_v34 }
  0xf2   : > { %15646 = vmatmul.mubr.msk.f32.gmra.mrb[2].mxu1 %vm236_vm1, %v18733_v36  ;;  %16354 = vmatmul.mubr.msk.f32.gmra.mrb[10].mxu0 %vm236_vm1, %v18056_v45  ;;  %v21014_v45 = vld [vmem:[#allocation2_spill] sm:$0xff] }
  0xf3   : > { %15648 = vmatprep.mubr.msk.f32.mxu1 %vm236_vm1, %v18738_v38  ;;  %16356 = vmatprep.mubr.msk.f32.mxu0 %vm236_vm1, %v18060_v47  ;;  %v18764_v47 = vld [vmem:[%s17866_s27 + $0x3e] sm:$0xff]  ;;  %21015 = vst [vmem:[#allocation2_spill] sm:$0xff] %v18770_v42 }
  0xf6   : > { %15649 = vmatmul.mubr.msk.f32.gmra.mrb[4].mxu1 %vm236_vm1, %v18750_v41  ;;  %16357 = vmatmul.mubr.msk.f32.gmra.mrb[12].mxu0 %vm236_vm1, %v18070_v49  ;;  %v18781_v49 = vld [vmem:[%s17866_s27 + $0x4e] sm:$0xff] }
  0xf7   : > { %15651 = vmatprep.mubr.msk.f32.mxu1 %vm236_vm1, %v18753_v43  ;;  %16359 = vmatprep.mubr.msk.f32.mxu0 %vm236_vm1, %v21014_v45  ;;  %v8463_v45 = vld [vmem:[%s20935_s1 + $0x63] sm:$0x7] }
  0xfa   : > { %15652 = vmatmul.mubr.msk.f32.gmra.mrb[6].mxu1 %vm236_vm1, %v18764_v47  ;;  %16360 = vmatmul.mubr.msk.f32.gmra.mrb[14].mxu0 %vm236_vm1, %v21016_v56  ;;  %v18820_v56 = vld [vmem:[%s17866_s27 + $0x76] sm:$0xff] }
  0xfb   : > { %15654 = vmatprep.mubr.msk.f32.mxu1 %vm236_vm1, %v18767_v20  ;;  %16362 = vmatprep.mubr.msk.f32.mxu0 %vm236_vm1, %v18770_v42  ;;  %v18888_v42 = vld [vmem:[%s17866_s27 + $0xcb] sm:$0xff] }
  0xfe   : > { %15655 = vmatmul.mubr.msk.f32.gmra.mrb[8].mxu1 %vm236_vm1, %v18781_v49  ;;  %16363 = vmatmul.mubr.msk.f32.gmra.mrb[16].mxu0 %vm236_vm1, %v18784_v1  ;;  %v21021_v1 = vld [vmem:[#allocation7_spill] sm:$0xff] }
  0xff   : > { %15657 = vmatprep.mubr.msk.f32.mxu1 %vm236_vm1, %v18787_v13  ;;  %16367 = vmatprep.mubr.msk.f32.mxu0 %vm236_vm1, %v18112_v59  ;;  %v18815_v59 = vld [vmem:[%s17866_s27 + $0x6e] sm:$0xff] }
 0x102   : > { %15658 = vmatmul.mubr.msk.f32.gmra.mrb[10].mxu1 %vm236_vm1, %v18798_v30  ;;  %16368 = vmatmul.mubr.msk.f32.vlgmr.msra.gmra.mrb[0].mxu0 %vm236_vm1, %v18131_v62  ;;  %v18832_v62 = vld [vmem:[%s17866_s27 + $0x7e] sm:$0xff] }
 0x103   : > { %16395 = vmatpush3.msk.msra.mxu0 %vm291_vm0, %v18665_v23  ;;  %15660 = vmatprep.mubr.msk.f32.mxu1 %vm236_vm1, %v18801_v32  ;;  %v18835_v23 = vld [vmem:[%s17866_s27 + $0x86] sm:$0xff] }
 0x104   : > { %16370 = vmatprep.mubr.msk.f32.mxu0 %vm236_vm1, %v18139_v0  ;;  %16423 = vmatprep.subr.msk.mxu0 %vm291_vm0, %v8463_v45  ;;  %v18846_v0 = vld [vmem:[%s17866_s27 + $0x8e] sm:$0xff] }
 0x106   : > { %15661 = vmatmul.mubr.msk.f32.gmra.mrb[12].mxu1 %vm236_vm1, %v18815_v59  ;;  %16371 = vmatmul.mubr.msk.f32.gmra.mrb[2].mxu0 %vm236_vm1, %v18155_v2  ;;  %v21018_v2 = vld [vmem:[#allocation4_spill] sm:$0xff] }
 0x107   : > { %15663 = vmatprep.mubr.msk.f32.mxu1 %vm236_vm1, %v18820_v56  ;;  %16373 = vmatprep.mubr.msk.f32.mxu0 %vm236_vm1, %v18161_v4  ;;  %v21019_v4 = vld [vmem:[#allocation5_spill] sm:$0xff] }
 0x10a   : > { %15664 = vmatmul.mubr.msk.f32.gmra.mrb[14].mxu1 %vm236_vm1, %v18832_v62  ;;  %16374 = vmatmul.mubr.msk.f32.gmra.mrb[4].mxu0 %vm236_vm1, %v18175_v6  ;;  %v21020_v6 = vld [vmem:[#allocation6_spill] sm:$0xff] }
 0x10b   : > { %15666 = vmatprep.mubr.msk.f32.mxu1 %vm236_vm1, %v18835_v23  ;;  %16376 = vmatprep.mubr.msk.f32.mxu0 %vm236_vm1, %v18179_v8  ;;  %v2439_v8 = vld [vmem:[%s20935_s1 + $0x1b] sm:$0x7] }
 0x10e   : > { %15667 = vmatmul.mubr.msk.f32.gmra.mrb[16].mxu1 %vm236_vm1, %v18846_v0  ;;  %16377 = vmatmul.mubr.msk.f32.gmra.mrb[6].mxu0 %vm236_vm1, %v18190_v11  ;;  %v21022_v11 = vld [vmem:[#allocation8_spill] sm:$0xff] }
 0x10f   : > { %15671 = vmatprep.mubr.msk.f32.mxu1 %vm236_vm1, %v21018_v2  ;;  %16379 = vmatprep.mubr.msk.f32.mxu0 %vm236_vm1, %v18196_v14  ;;  %v21023_v14 = vld [vmem:[#allocation9_spill] sm:$0xff]  ;;  %v21024_v2 = vld [vmem:[#allocation10_spill] sm:$0xff] }
 0x112   : > { %15672 = vmatmul.mubr.msk.f32.vlgmr.msra.gmra.mrb[0].mxu1 %vm236_vm1, %v21019_v4  ;;  %16380 = vmatmul.mubr.msk.f32.gmra.mrb[8].mxu0 %vm236_vm1, %v21020_v6  ;;  %v21025_v4 = vld [vmem:[#allocation11_spill] sm:$0xff]  ;;  %v21026_v6 = vld [vmem:[#allocation12_spill] sm:$0xff] }
 0x113   : > { %15674 = vmatprep.mubr.msk.f32.mxu1 %vm236_vm1, %v21021_v1  ;;  %16382 = vmatprep.mubr.msk.f32.mxu0 %vm236_vm1, %v21022_v11  ;;  %v12983_v1 = vld [vmem:[%s17866_s27 + $0x3a] sm:$0xff]  ;;  %v12984_v11 = vld [vmem:[%s17866_s27 + $0x42] sm:$0xff] }
 0x114   : > { %15699 = vmatpush3.msk.msra.mxu1 %vm291_vm0, %v2188_v34  ;;  %v21027_v34 = vld [vmem:[#allocation13_spill] sm:$0xff] }
 0x115   : > { %15727 = vmatprep.subr.msk.mxu1 %vm291_vm0, %v2439_v8 }
 0x116   : > { %15675 = vmatmul.mubr.msk.f32.gmra.mrb[2].mxu1 %vm236_vm1, %v21023_v14  ;;  %16383 = vmatmul.mubr.msk.f32.gmra.mrb[10].mxu0 %vm236_vm1, %v21024_v2  ;;  %v21028_v14 = vld [vmem:[#allocation14_spill] sm:$0xff]  ;;  %v12985_v2 = vld [vmem:[%s17866_s27 + $0x4a] sm:$0xff] }
 0x117   : > { %15677 = vmatprep.mubr.msk.f32.mxu1 %vm236_vm1, %v21025_v4  ;;  %16385 = vmatprep.mubr.msk.f32.mxu0 %vm236_vm1, %v21026_v6  ;;  %v12986_v4 = vld [vmem:[%s17866_s27 + $0x52] sm:$0xff]  ;;  %v21029_v6 = vld [vmem:[#allocation15_spill] sm:$0xff] }
 0x11a   : > { %15678 = vmatmul.mubr.msk.f32.gmra.mrb[4].mxu1 %vm236_vm1, %v12983_v1  ;;  %16386 = vmatmul.mubr.msk.f32.gmra.mrb[12].mxu0 %vm236_vm1, %v21027_v34  ;;  %v18897_v1 = vld [vmem:[%s17866_s27 + $0x5a] sm:$0xff]  ;;  %v18903_v34 = vld [vmem:[%s17866_s27 + $0x62] sm:$0xff] }
 0x11b   : > { %15680 = vmatprep.mubr.msk.f32.mxu1 %vm236_vm1, %v12984_v11  ;;  %16388 = vmatprep.mubr.msk.f32.mxu0 %vm236_vm1, %v21028_v14  ;;  %v18900_v11 = vld [vmem:[%s17866_s27 + $0xd3] sm:$0xff]  ;;  %v18914_v14 = vld [vmem:[%s17866_s27 + $0x6a] sm:$0xff] }
 0x11e   : > { %15681 = vmatmul.mubr.msk.f32.gmra.mrb[6].mxu1 %vm236_vm1, %v12985_v2  ;;  %16389 = vmatmul.mubr.msk.f32.gmra.mrb[14].mxu0 %vm236_vm1, %v21029_v6  ;;  %v18917_v2 = vld [vmem:[%s17866_s27 + $0x72] sm:$0xff]  ;;  %v18935_v6 = vld [vmem:[%s17866_s27 + $0x82] sm:$0xff] }
 0x11f   : > { %15683 = vmatprep.mubr.msk.f32.mxu1 %vm236_vm1, %v12986_v4  ;;  %16391 = vmatprep.mubr.msk.f32.mxu0 %vm236_vm1, %v18888_v42  ;;  %v8714_v4 = vld [vmem:[%s20935_s1 + $0x66] sm:$0x7] }
 0x122   : > { %15684 = vmatmul.mubr.msk.f32.gmra.mrb[8].mxu1 %vm236_vm1, %v18897_v1  ;;  %16392 = vmatmul.mubr.msk.f32.gmra.mrb[16].mxu0 %vm236_vm1, %v18900_v11 }
 0x123   : > { %15686 = vmatprep.mubr.msk.f32.mxu1 %vm236_vm1, %v18903_v34  ;;  %16396 = vmatprep.mubr.msk.f32.mxu0 %vm236_vm1, %v18286_v24  ;;  %v18930_v24 = vld [vmem:[%s17866_s27 + $0x7a] sm:$0xff] }
 0x126   : > { %15687 = vmatmul.mubr.msk.f32.gmra.mrb[10].mxu1 %vm236_vm1, %v18914_v14  ;;  %16397 = vmatmul.mubr.msk.f32.vlgmr.msra.gmra.mrb[0].mxu0 %vm236_vm1, %v18302_v10  ;;  %v18947_v10 = vld [vmem:[%s17866_s27 + $0x8a] sm:$0xff] }
 0x127   : > { %16424 = vmatpush3.msk.msra.mxu0 %vm291_vm0, %v8463_v45  ;;  %15689 = vmatprep.mubr.msk.f32.mxu1 %vm236_vm1, %v18917_v2  ;;  %v18950_v45 = vld [vmem:[%s17866_s27 + $0x92] sm:$0xff] }
 0x128   : > { %16399 = vmatprep.mubr.msk.f32.mxu0 %vm236_vm1, %v18307_v48  ;;  %16452 = vmatprep.subr.msk.mxu0 %vm291_vm0, %v8714_v4  ;;  %v18961_v48 = vld [vmem:[%s17866_s27 + $0x9a] sm:$0xff] }
 0x12a   : > { %15690 = vmatmul.mubr.msk.f32.gmra.mrb[12].mxu1 %vm236_vm1, %v18930_v24  ;;  %16400 = vmatmul.mubr.msk.f32.gmra.mrb[2].mxu0 %vm236_vm1, %v18320_v60  ;;  %v13021_v60 = vld [vmem:[%s17866_s27 + $0x43] sm:$0xff] }
 0x12b   : > { %15692 = vmatprep.mubr.msk.f32.mxu1 %vm236_vm1, %v18935_v6  ;;  %16402 = vmatprep.mubr.msk.f32.mxu0 %vm236_vm1, %v18323_v46  ;;  %v21030_v46 = vld [vmem:[#allocation16_spill] sm:$0xff] }
 0x12e   : > { %15693 = vmatmul.mubr.msk.f32.gmra.mrb[14].mxu1 %vm236_vm1, %v18947_v10  ;;  %16403 = vmatmul.mubr.msk.f32.gmra.mrb[4].mxu0 %vm236_vm1, %v18334_v44  ;;  %v21031_v44 = vld [vmem:[#allocation17_spill] sm:$0xff] }
 0x12f   : > { %15695 = vmatprep.mubr.msk.f32.mxu1 %vm236_vm1, %v18950_v45  ;;  %16405 = vmatprep.mubr.msk.f32.mxu0 %vm236_vm1, %v18338_v40  ;;  %v18978_v40 = vld [vmem:[%s20935_s1 + $0x1e] sm:$0x7] }
 0x132   : > { %15696 = vmatmul.mubr.msk.f32.gmra.mrb[16].mxu1 %vm236_vm1, %v18961_v48  ;;  %16406 = vmatmul.mubr.msk.f32.gmra.mrb[6].mxu0 %vm236_vm1, %v18349_v37  ;;  %v21032_v37 = vld [vmem:[#allocation18_spill] sm:$0xff] }
 0x133   : > { %15700 = vmatprep.mubr.msk.f32.mxu1 %vm236_vm1, %v21030_v46  ;;  %16408 = vmatprep.mubr.msk.f32.mxu0 %vm236_vm1, %v18355_v33  ;;  %v13020_v33 = vld [vmem:[%s17866_s27 + $0x3b] sm:$0xff]  ;;  %v19040_v46 = vld [vmem:[%s20935_s1 + $0x69] sm:$0x7] }
 0x136   : > { %15701 = vmatmul.mubr.msk.f32.vlgmr.msra.gmra.mrb[0].mxu1 %vm236_vm1, %v18370_v26  ;;  %16409 = vmatmul.mubr.msk.f32.gmra.mrb[8].mxu0 %vm236_vm1, %v18373_v39  ;;  %v21033_v26 = vld [vmem:[#allocation19_spill] sm:$0xff]  ;;  %v13023_v39 = vld [vmem:[%s17866_s27 + $0x53] sm:$0xff] }
 0x137   : > { %15703 = vmatprep.mubr.msk.f32.mxu1 %vm236_vm1, %v21031_v44  ;;  %16411 = vmatprep.mubr.msk.f32.mxu0 %vm236_vm1, %v21032_v37  ;;  %v19050_v44 = vld [vmem:[%s17866_s27 + $0x7b] sm:$0xff]  ;;  %v19055_v37 = vld [vmem:[%s17866_s27 + $0x83] sm:$0xff] }
 0x138   : > { %15728 = vmatpush3.msk.msra.mxu1 %vm291_vm0, %v2439_v8  ;;  %v19035_v8 = vld [vmem:[%s17866_s27 + $0x73] sm:$0xff] }
 0x139   : > { %15756 = vmatprep.subr.msk.mxu1 %vm291_vm0, %v18978_v40 }
 0x13a   : > { %15704 = vmatmul.mubr.msk.f32.gmra.mrb[2].mxu1 %vm236_vm1, %v18394_v16  ;;  %16412 = vmatmul.mubr.msk.f32.gmra.mrb[10].mxu0 %vm236_vm1, %v18397_v35  ;;  %v13022_v35 = vld [vmem:[%s17866_s27 + $0x4b] sm:$0xff] }
 0x13b   : > { %15706 = vmatprep.mubr.msk.f32.mxu1 %vm236_vm1, %v21033_v26  ;;  %16414 = vmatprep.mubr.msk.f32.mxu0 %vm236_vm1, %v18403_v51  ;;  %v19006_v16 = vld [vmem:[%s17866_s27 + $0xcc] sm:$0xff]  ;;  %v19015_v51 = vld [vmem:[%s17866_s27 + $0x5b] sm:$0xff] }
 0x13c   : > { %21034 = vst [vmem:[#allocation4_spill] sm:$0xff] %v19006_v16  ;;  %v19071_v26 = vld [vmem:[%s17866_s27 + $0x93] sm:$0xff] }
 0x13e   : > { %15707 = vmatmul.mubr.msk.f32.gmra.mrb[4].mxu1 %vm236_vm1, %v13020_v33  ;;  %16415 = vmatmul.mubr.msk.f32.gmra.mrb[12].mxu0 %vm236_vm1, %v18414_v12  ;;  %v19018_v12 = vld [vmem:[%s17866_s27 + $0xd4] sm:$0xff] }
 0x13f   : > { %15709 = vmatprep.mubr.msk.f32.mxu1 %vm236_vm1, %v13021_v60  ;;  %16417 = vmatprep.mubr.msk.f32.mxu0 %vm236_vm1, %v18417_v18  ;;  %21035 = vst [vmem:[#allocation5_spill] sm:$0xff] %v19018_v12  ;;  %v19021_v18 = vld [vmem:[%s17866_s27 + $0x63] sm:$0xff]  ;;  %v19082_v33 = vld [vmem:[%s17866_s27 + $0x9b] sm:$0xff] }
 0x140   : > { %v19093_v60 = vld [vmem:[%s17866_s27 + $0x95] sm:$0xff] }
 0x142   : > { %15710 = vmatmul.mubr.msk.f32.gmra.mrb[6].mxu1 %vm236_vm1, %v13022_v35  ;;  %16418 = vmatmul.mubr.msk.f32.gmra.mrb[14].mxu0 %vm236_vm1, %v18428_v53  ;;  %v19032_v53 = vld [vmem:[%s17866_s27 + $0x6b] sm:$0xff]  ;;  %v19096_v35 = vld [vmem:[%s17866_s27 + $0x9d] sm:$0xff] }
 0x143   : > { %15712 = vmatprep.mubr.msk.f32.mxu1 %vm236_vm1, %v13023_v39  ;;  %16420 = vmatprep.mubr.msk.f32.mxu0 %vm236_vm1, %v19006_v16  ;;  %v19112_v39 = vld [vmem:[%s17866_s27 + $0xa5] sm:$0xff]  ;;  %v19139_v16 = vld [vmem:[%s17866_s27 + $0xbd] sm:$0xff] }
 0x144   : > { %21036 = vst [vmem:[#allocation6_spill] sm:$0xff] %v19112_v39  ;;  %21041 = vst [vmem:[#allocation11_spill] sm:$0xff] %v19139_v16 }
 0x146   : > { %15713 = vmatmul.mubr.msk.f32.gmra.mrb[8].mxu1 %vm236_vm1, %v19015_v51  ;;  %16421 = vmatmul.mubr.msk.f32.gmra.mrb[16].mxu0 %vm236_vm1, %v19018_v12  ;;  %v19136_v12 = vld [vmem:[%s17866_s27 + $0x44] sm:$0xff] }
 0x147   : > { %15715 = vmatprep.mubr.msk.f32.mxu1 %vm236_vm1, %v19021_v18  ;;  %16425 = vmatprep.mubr.msk.f32.mxu0 %vm236_vm1, %v18643_v9  ;;  %21040 = vst [vmem:[#allocation10_spill] sm:$0xff] %v19136_v12 }
 0x14a   : > { %15716 = vmatmul.mubr.msk.f32.gmra.mrb[10].mxu1 %vm236_vm1, %v19032_v53  ;;  %16426 = vmatmul.mubr.msk.f32.vlgmr.msra.gmra.mrb[0].mxu0 %vm236_vm1, %v18647_v15 }
 0x14b   : > { %16453 = vmatpush3.msk.msra.mxu0 %vm291_vm0, %v8714_v4  ;;  %15718 = vmatprep.mubr.msk.f32.mxu1 %vm236_vm1, %v19035_v8  ;;  %v19068_v4 = vld [vmem:[%s17866_s27 + $0x8b] sm:$0xff] }
 0x14c   : > { %16428 = vmatprep.mubr.msk.f32.mxu0 %vm236_vm1, %v18657_v19  ;;  %16481 = vmatprep.subr.msk.mxu0 %vm291_vm0, %v19040_v46 }
 0x14e   : > { %15719 = vmatmul.mubr.msk.f32.gmra.mrb[12].mxu1 %vm236_vm1, %v19050_v44  ;;  %16429 = vmatmul.mubr.msk.f32.gmra.mrb[2].mxu0 %vm236_vm1, %v18660_v22 }
 0x14f   : > { %15721 = vmatprep.mubr.msk.f32.mxu1 %vm236_vm1, %v19055_v37  ;;  %16431 = vmatprep.mubr.msk.f32.mxu0 %vm236_vm1, %v18676_v25 }
 0x152   : > { %15722 = vmatmul.mubr.msk.f32.gmra.mrb[14].mxu1 %vm236_vm1, %v19068_v4  ;;  %16432 = vmatmul.mubr.msk.f32.gmra.mrb[4].mxu0 %vm236_vm1, %v18681_v61 }
 0x153   : > { %15724 = vmatprep.mubr.msk.f32.mxu1 %vm236_vm1, %v19071_v26  ;;  %16434 = vmatprep.mubr.msk.f32.mxu0 %vm236_vm1, %v18694_v27 }
 0x156   : > { %15725 = vmatmul.mubr.msk.f32.gmra.mrb[16].mxu1 %vm236_vm1, %v19082_v33  ;;  %16435 = vmatmul.mubr.msk.f32.gmra.mrb[6].mxu0 %vm236_vm1, %v18697_v28 }
 0x157   : > { %15729 = vmatprep.mubr.msk.f32.mxu1 %vm236_vm1, %v18479_v57  ;;  %16437 = vmatprep.mubr.msk.f32.mxu0 %vm236_vm1, %v18708_v29  ;;  %v19105_v57 = vld [vmem:[%s20935_s1 + $0x21] sm:$0x7] }
 0x15a   : > { %15730 = vmatmul.mubr.msk.f32.vlgmr.msra.gmra.mrb[0].mxu1 %vm236_vm1, %v18493_v63  ;;  %16438 = vmatmul.mubr.msk.f32.gmra.mrb[8].mxu0 %vm236_vm1, %v19093_v60  ;;  %v19117_v63 = vld [vmem:[%s17866_s27 + $0xad] sm:$0xff] }
 0x15b   : > { %15732 = vmatprep.mubr.msk.f32.mxu1 %vm236_vm1, %v18499_v3  ;;  %16440 = vmatprep.mubr.msk.f32.mxu0 %vm236_vm1, %v19096_v35  ;;  %21037 = vst [vmem:[#allocation7_spill] sm:$0xff] %v19117_v63  ;;  %v19130_v3 = vld [vmem:[%s17866_s27 + $0x3c] sm:$0xff] }
 0x15c   : > { %15757 = vmatpush3.msk.msra.mxu1 %vm291_vm0, %v18978_v40  ;;  %21038 = vst [vmem:[#allocation8_spill] sm:$0xff] %v19130_v3  ;;  %v19133_v40 = vld [vmem:[%s17866_s27 + $0xb5] sm:$0xff] }
 0x15d   : > { %15785 = vmatprep.subr.msk.mxu1 %vm291_vm0, %v19105_v57  ;;  %21039 = vst [vmem:[#allocation9_spill] sm:$0xff] %v19133_v40 }
 0x15e   : > { %15733 = vmatmul.mubr.msk.f32.gmra.mrb[2].mxu1 %vm236_vm1, %v18511_v7  ;;  %16441 = vmatmul.mubr.msk.f32.gmra.mrb[10].mxu0 %vm236_vm1, %v19112_v39  ;;  %v19150_v7 = vld [vmem:[%s17866_s27 + $0x4c] sm:$0xff] }
 0x15f   : > { %15735 = vmatprep.mubr.msk.f32.mxu1 %vm236_vm1, %v18515_v52  ;;  %16443 = vmatprep.mubr.msk.f32.mxu0 %vm236_vm1, %v19117_v63  ;;  %21042 = vst [vmem:[#allocation12_spill] sm:$0xff] %v19150_v7  ;;  %v19153_v52 = vld [vmem:[%s17866_s27 + $0xc5] sm:$0xff]  ;;  %v19156_v63 = vld [vmem:[%s17866_s27 + $0x54] sm:$0xff] }
 0x160   : > { %21043 = vst [vmem:[#allocation13_spill] sm:$0xff] %v19153_v52  ;;  %21044 = vst [vmem:[#allocation14_spill] sm:$0xff] %v19156_v63  ;;  %v19159_v39 = vld [vmem:[%s17866_s27 + $0xcd] sm:$0xff] }
 0x161   : > { %21045 = vst [vmem:[#allocation15_spill] sm:$0xff] %v19159_v39 }
 0x162   : > { %15736 = vmatmul.mubr.msk.f32.gmra.mrb[4].mxu1 %vm236_vm1, %v19130_v3  ;;  %16444 = vmatmul.mubr.msk.f32.gmra.mrb[12].mxu0 %vm236_vm1, %v19133_v40  ;;  %v19176_v40 = vld [vmem:[%s17866_s27 + $0x64] sm:$0xff]  ;;  %v19224_v3 = vld [vmem:[%s17866_s27 + $0x94] sm:$0xff] }
 0x163   : > { %15738 = vmatprep.mubr.msk.f32.mxu1 %vm236_vm1, %v19136_v12  ;;  %16446 = vmatprep.mubr.msk.f32.mxu0 %vm236_vm1, %v19139_v16  ;;  %v19170_v16 = vld [vmem:[%s17866_s27 + $0x5c] sm:$0xff]  ;;  %21049 = vst [vmem:[#allocation19_spill] sm:$0xff] %v19224_v3 }
 0x164   : > { %v19173_v12 = vld [vmem:[%s17866_s27 + $0xd5] sm:$0xff] }
 0x165   : > { %21046 = vst [vmem:[#allocation16_spill] sm:$0xff] %v19173_v12 }
 0x166   : > { %15739 = vmatmul.mubr.msk.f32.gmra.mrb[6].mxu1 %vm236_vm1, %v19150_v7  ;;  %16447 = vmatmul.mubr.msk.f32.gmra.mrb[14].mxu0 %vm236_vm1, %v19153_v52  ;;  %v9216_v52 = vld [vmem:[%s20935_s1 + $0x6c] sm:$0x7]  ;;  %v19209_v7 = vld [vmem:[%s17866_s27 + $0x84] sm:$0xff] }
 0x167   : > { %15741 = vmatprep.mubr.msk.f32.mxu1 %vm236_vm1, %v19156_v63  ;;  %16449 = vmatprep.mubr.msk.f32.mxu0 %vm236_vm1, %v19159_v39  ;;  %v19187_v39 = vld [vmem:[%s17866_s27 + $0x6c] sm:$0xff]  ;;  %v19190_v63 = vld [vmem:[%s17866_s27 + $0x74] sm:$0xff]  ;;  %21047 = vst [vmem:[#allocation17_spill] sm:$0xff] %v19209_v7 }
 0x16a   : > { %15742 = vmatmul.mubr.msk.f32.gmra.mrb[8].mxu1 %vm236_vm1, %v19170_v16  ;;  %16450 = vmatmul.mubr.msk.f32.gmra.mrb[16].mxu0 %vm236_vm1, %v19173_v12  ;;  %v19204_v12 = vld [vmem:[%s17866_s27 + $0x7c] sm:$0xff] }
 0x16b   : > { %15744 = vmatprep.mubr.msk.f32.mxu1 %vm236_vm1, %v19176_v40  ;;  %16454 = vmatprep.mubr.msk.f32.mxu0 %vm236_vm1, %v18781_v49 }
 0x16e   : > { %15745 = vmatmul.mubr.msk.f32.gmra.mrb[10].mxu1 %vm236_vm1, %v19187_v39  ;;  %16455 = vmatmul.mubr.msk.f32.vlgmr.msra.gmra.mrb[0].mxu0 %vm236_vm1, %v18787_v13 }
 0x16f   : > { %16482 = vmatpush3.msk.msra.mxu0 %vm291_vm0, %v19040_v46  ;;  %15747 = vmatprep.mubr.msk.f32.mxu1 %vm236_vm1, %v19190_v63  ;;  %v19221_v46 = vld [vmem:[%s17866_s27 + $0x8c] sm:$0xff] }
 0x170   : > { %16457 = vmatprep.mubr.msk.f32.mxu0 %vm236_vm1, %v18798_v30  ;;  %16510 = vmatprep.subr.msk.mxu0 %vm291_vm0, %v9216_v52  ;;  %21048 = vst [vmem:[#allocation18_spill] sm:$0xff] %v19221_v46 }
 0x172   : > { %15748 = vmatmul.mubr.msk.f32.gmra.mrb[12].mxu1 %vm236_vm1, %v19204_v12  ;;  %16458 = vmatmul.mubr.msk.f32.gmra.mrb[2].mxu0 %vm236_vm1, %v18801_v32 }
 0x173   : > { %15750 = vmatprep.mubr.msk.f32.mxu1 %vm236_vm1, %v19209_v7  ;;  %16460 = vmatprep.mubr.msk.f32.mxu0 %vm236_vm1, %v18815_v59  ;;  %v19235_v7 = vld [vmem:[%s17866_s27 + $0x9c] sm:$0xff] }
 0x174   : > { %21050 = vst [vmem:[#allocation20_spill] sm:$0xff] %v19235_v7 }
 0x176   : > { %15751 = vmatmul.mubr.msk.f32.gmra.mrb[14].mxu1 %vm236_vm1, %v19221_v46  ;;  %16461 = vmatmul.mubr.msk.f32.gmra.mrb[4].mxu0 %vm236_vm1, %v18820_v56  ;;  %v19249_v46 = vld [vmem:[%s17866_s27 + $0x9e] sm:$0xff] }
 0x177   : > { %15753 = vmatprep.mubr.msk.f32.mxu1 %vm236_vm1, %v19224_v3  ;;  %16463 = vmatprep.mubr.msk.f32.mxu0 %vm236_vm1, %v18832_v62  ;;  %v19246_v3 = vld [vmem:[%s17866_s27 + $0x96] sm:$0xff] }
 0x17a   : > { %15754 = vmatmul.mubr.msk.f32.gmra.mrb[16].mxu1 %vm236_vm1, %v19235_v7  ;;  %16464 = vmatmul.mubr.msk.f32.gmra.mrb[6].mxu0 %vm236_vm1, %v18835_v23  ;;  %v3192_v7 = vld [vmem:[%s20935_s1 + $0x24] sm:$0x7] }
 0x17b   : > { %15758 = vmatprep.mubr.msk.f32.mxu1 %vm236_vm1, %v18583_v17  ;;  %16466 = vmatprep.mubr.msk.f32.mxu0 %vm236_vm1, %v18846_v0  ;;  %v19263_v17 = vld [vmem:[%s17866_s27 + $0xa6] sm:$0xff] }
 0x17e   : > { %15759 = vmatmul.mubr.msk.f32.vlgmr.msra.gmra.mrb[0].mxu1 %vm236_vm1, %v18597_v21  ;;  %16467 = vmatmul.mubr.msk.f32.gmra.mrb[8].mxu0 %vm236_vm1, %v19246_v3  ;;  %v19268_v21 = vld [vmem:[%s17866_s27 + $0xae] sm:$0xff] }
 0x17f   : > { %15761 = vmatprep.mubr.msk.f32.mxu1 %vm236_vm1, %v18603_v31  ;;  %16469 = vmatprep.mubr.msk.f32.mxu0 %vm236_vm1, %v19249_v46  ;;  %v19280_v31 = vld [vmem:[%s17866_s27 + $0xb6] sm:$0xff] }
 0x180   : > { %15786 = vmatpush3.msk.msra.mxu1 %vm291_vm0, %v19105_v57  ;;  %v19283_v57 = vld [vmem:[%s17866_s27 + $0xbe] sm:$0xff] }
 0x181   : > { %15814 = vmatprep.subr.msk.mxu1 %vm291_vm0, %v3192_v7 }
 0x182   : > { %15762 = vmatmul.mubr.msk.f32.gmra.mrb[2].mxu1 %vm236_vm1, %v18615_v55  ;;  %16470 = vmatmul.mubr.msk.f32.gmra.mrb[10].mxu0 %vm236_vm1, %v19263_v17  ;;  %v19294_v55 = vld [vmem:[%s17866_s27 + $0xc6] sm:$0xff] }
 0x183   : > { %15764 = vmatprep.mubr.msk.f32.mxu1 %vm236_vm1, %v18619_v5  ;;  %16472 = vmatprep.mubr.msk.f32.mxu0 %vm236_vm1, %v19268_v21  ;;  %v19297_v5 = vld [vmem:[%s17866_s27 + $0xce] sm:$0xff] }
 0x186   : > { %15765 = vmatmul.mubr.msk.f32.gmra.mrb[4].mxu1 %vm236_vm1, %v18629_v54  ;;  %16473 = vmatmul.mubr.msk.f32.gmra.mrb[12].mxu0 %vm236_vm1, %v19280_v31  ;;  %v19308_v54 = vld [vmem:[%s17866_s27 + $0xd6] sm:$0xff] }
 0x187   : > { %15767 = vmatprep.mubr.msk.f32.mxu1 %vm236_vm1, %v18633_v58  ;;  %16475 = vmatprep.mubr.msk.f32.mxu0 %vm236_vm1, %v19283_v57  ;;  %v9467_v58 = vld [vmem:[%s20935_s1 + $0x6f] sm:$0x7] }
 0x18a   : > { %15768 = vmatmul.mubr.msk.f32.gmra.mrb[6].mxu1 %vm236_vm1, %v18643_v9  ;;  %16476 = vmatmul.mubr.msk.f32.gmra.mrb[14].mxu0 %vm236_vm1, %v19294_v55  ;;  %v14023_v9 = vld [vmem:[%s17866_s27 + $0xa2] sm:$0xff] }
 0x18b   : > { %15770 = vmatprep.mubr.msk.f32.mxu1 %vm236_vm1, %v18647_v15  ;;  %16478 = vmatprep.mubr.msk.f32.mxu0 %vm236_vm1, %v19297_v5  ;;  %v14024_v15 = vld [vmem:[%s17866_s27 + $0xaa] sm:$0xff] }
 0x18e   : > { %15771 = vmatmul.mubr.msk.f32.gmra.mrb[8].mxu1 %vm236_vm1, %v18657_v19  ;;  %16479 = vmatmul.mubr.msk.f32.gmra.mrb[16].mxu0 %vm236_vm1, %v19308_v54  ;;  %v3443_v19 = vld [vmem:[%s20935_s1 + $0x27] sm:$0x7] }
 0x18f   : > { %15773 = vmatprep.mubr.msk.f32.mxu1 %vm236_vm1, %v18660_v22  ;;  %16483 = vmatprep.mubr.msk.f32.mxu0 %vm236_vm1, %v18897_v1  ;;  %v14025_v22 = vld [vmem:[%s17866_s27 + $0xb2] sm:$0xff] }
 0x190   : > { %v19491_v1 = vld [vmem:[%s17866_s27 + $0x57] sm:$0xff] }
 0x192   : > { %15774 = vmatmul.mubr.msk.f32.gmra.mrb[10].mxu1 %vm236_vm1, %v18676_v25  ;;  %16484 = vmatmul.mubr.msk.f32.vlgmr.msra.gmra.mrb[0].mxu0 %vm236_vm1, %v18903_v34  ;;  %v14026_v25 = vld [vmem:[%s17866_s27 + $0xba] sm:$0xff] }
 0x193   : > { %16511 = vmatpush3.msk.msra.mxu0 %vm291_vm0, %v9216_v52  ;;  %15776 = vmatprep.mubr.msk.f32.mxu1 %vm236_vm1, %v18681_v61  ;;  %v14027_v61 = vld [vmem:[%s17866_s27 + $0xc2] sm:$0xff]  ;;  %v19585_v52 = vld [vmem:[%s17866_s27 + $0xac] sm:$0xff] }
 0x194   : > { %16486 = vmatprep.mubr.msk.f32.mxu0 %vm236_vm1, %v18914_v14  ;;  %16539 = vmatprep.subr.msk.mxu0 %vm291_vm0, %v9467_v58  ;;  %v14067_v34 = vld [vmem:[%s17866_s27 + $0xdb] sm:$0xff] }
 0x195   : > { %v19502_v14 = vld [vmem:[%s17866_s27 + $0x5f] sm:$0xff] }
 0x196   : > { %15777 = vmatmul.mubr.msk.f32.gmra.mrb[12].mxu1 %vm236_vm1, %v18694_v27  ;;  %16487 = vmatmul.mubr.msk.f32.gmra.mrb[2].mxu0 %vm236_vm1, %v18917_v2  ;;  %v21051_v27 = vld [vmem:[#allocation2_spill] sm:$0xff] }
 0x197   : > { %15779 = vmatprep.mubr.msk.f32.mxu1 %vm236_vm1, %v18697_v28  ;;  %16489 = vmatprep.mubr.msk.f32.mxu0 %vm236_vm1, %v18930_v24  ;;  %v14030_v28 = vld [vmem:[%s17866_s27 + $0xda] sm:$0xff]  ;;  %v19506_v2 = vld [vmem:[%s17866_s27 + $0x67] sm:$0xff] }
 0x198   : > { %v19519_v24 = vld [vmem:[%s17866_s27 + $0x77] sm:$0xff] }
 0x19a   : > { %15780 = vmatmul.mubr.msk.f32.gmra.mrb[14].mxu1 %vm236_vm1, %v18708_v29  ;;  %16490 = vmatmul.mubr.msk.f32.gmra.mrb[4].mxu0 %vm236_vm1, %v18935_v6  ;;  %v21052_v29 = vld [vmem:[#allocation3_spill] sm:$0xff]  ;;  %v19524_v6 = vld [vmem:[%s20935_s1 + $0x75] sm:$0x7] }
 0x19b   : > { %15782 = vmatprep.mubr.msk.f32.mxu1 %vm236_vm1, %v19093_v60  ;;  %16492 = vmatprep.mubr.msk.f32.mxu0 %vm236_vm1, %v18947_v10  ;;  %v19535_v10 = vld [vmem:[%s17866_s27 + $0x7f] sm:$0xff] }
 0x19e   : > { %15783 = vmatmul.mubr.msk.f32.gmra.mrb[16].mxu1 %vm236_vm1, %v19096_v35  ;;  %16493 = vmatmul.mubr.msk.f32.gmra.mrb[6].mxu0 %vm236_vm1, %v18950_v45  ;;  %v19540_v45 = vld [vmem:[%s17866_s27 + $0x87] sm:$0xff] }
 0x19f   : > { %15787 = vmatprep.mubr.msk.f32.mxu1 %vm236_vm1, %v18720_v50  ;;  %16495 = vmatprep.mubr.msk.f32.mxu0 %vm236_vm1, %v18961_v48  ;;  %v14031_v50 = vld [vmem:[%s17866_s27 + $0xe2] sm:$0xff]  ;;  %v19553_v48 = vld [vmem:[%s17866_s27 + $0x8f] sm:$0xff] }
 0x1a2   : > { %15788 = vmatmul.mubr.msk.f32.vlgmr.msra.gmra.mrb[0].mxu1 %vm236_vm1, %v18733_v36  ;;  %16496 = vmatmul.mubr.msk.f32.gmra.mrb[8].mxu0 %vm236_vm1, %v14023_v9  ;;  %v19403_v36 = vld [vmem:[%s20935_s1 + $0x72] sm:$0x7] }
 0x1a3   : > { %15790 = vmatprep.mubr.msk.f32.mxu1 %vm236_vm1, %v18738_v38  ;;  %16498 = vmatprep.mubr.msk.f32.mxu0 %vm236_vm1, %v14024_v15  ;;  %v13163_v38 = vld [vmem:[%s17866_s27 + $0x17] sm:$0xff] }
 0x1a4   : > { %15815 = vmatpush3.msk.msra.mxu1 %vm291_vm0, %v3192_v7  ;;  %v19582_v7 = vld [vmem:[%s17866_s27 + $0x28] sm:$0xff]  ;;  %v19600_v9 = vld [vmem:[%s17866_s27 + $0x30] sm:$0xff] }
 0x1a5   : > { %15843 = vmatprep.subr.msk.mxu1 %vm291_vm0, %v3443_v19  ;;  %v19603_v15 = vld [vmem:[%s17866_s27 + $0xb4] sm:$0xff] }
 0x1a6   : > { %15791 = vmatmul.mubr.msk.f32.gmra.mrb[2].mxu1 %vm236_vm1, %v18750_v41  ;;  %16499 = vmatmul.mubr.msk.f32.gmra.mrb[10].mxu0 %vm236_vm1, %v14025_v22  ;;  %v13164_v41 = vld [vmem:[%s17866_s27 + $0x1f] sm:$0xff] }
 0x1a7   : > { %15793 = vmatprep.mubr.msk.f32.mxu1 %vm236_vm1, %v18753_v43  ;;  %16501 = vmatprep.mubr.msk.f32.mxu0 %vm236_vm1, %v14026_v25  ;;  %v14060_v43 = vld [vmem:[%s17866_s27 + $0xa3] sm:$0xff] }
 0x1a8   : > { %v19611_v22 = vld [vmem:[%s17866_s27 + $0xbc] sm:$0xff] }
 0x1a9   : > { %21058 = vst [vmem:[#allocation3_spill] sm:$0xff] %v19611_v22  ;;  %v19624_v25 = vld [vmem:[%s17866_s27 + $0x40] sm:$0xff] }
 0x1aa   : > { %15794 = vmatmul.mubr.msk.f32.gmra.mrb[4].mxu1 %vm236_vm1, %v18764_v47  ;;  %16502 = vmatmul.mubr.msk.f32.gmra.mrb[12].mxu0 %vm236_vm1, %v14027_v61  ;;  %v19443_v47 = vld [vmem:[%s17866_s27 + $0x27] sm:$0xff] }
 0x1ab   : > { %15796 = vmatprep.mubr.msk.f32.mxu1 %vm236_vm1, %v18767_v20  ;;  %16504 = vmatprep.mubr.msk.f32.mxu0 %vm236_vm1, %v21051_v27  ;;  %v14061_v20 = vld [vmem:[%s17866_s27 + $0xab] sm:$0xff] }
 0x1ac   : > { %v19627_v61 = vld [vmem:[%s17866_s27 + $0xc4] sm:$0xff] }
 0x1ad   : > { %v19630_v27 = vld [vmem:[%s17866_s27 + $0x48] sm:$0xff] }
 0x1ae   : > { %15797 = vmatmul.mubr.msk.f32.gmra.mrb[6].mxu1 %vm236_vm1, %v18781_v49  ;;  %16505 = vmatmul.mubr.msk.f32.gmra.mrb[14].mxu0 %vm236_vm1, %v21052_v29  ;;  %v19451_v49 = vld [vmem:[%s20935_s1 + $0x2a] sm:$0x7]  ;;  %v19641_v29 = vld [vmem:[%s17866_s27 + $0x50] sm:$0xff] }
 0x1af   : > { %15799 = vmatprep.mubr.msk.f32.mxu1 %vm236_vm1, %v18787_v13  ;;  %16507 = vmatprep.mubr.msk.f32.mxu0 %vm236_vm1, %v14030_v28  ;;  %v19457_v13 = vld [vmem:[%s17866_s27 + $0x2f] sm:$0xff] }
 0x1b0   : > { %v21062_v28 = vld [vmem:[#allocation4_spill] sm:$0xff] }
 0x1b2   : > { %15800 = vmatmul.mubr.msk.f32.gmra.mrb[8].mxu1 %vm236_vm1, %v18798_v30  ;;  %16508 = vmatmul.mubr.msk.f32.gmra.mrb[16].mxu0 %vm236_vm1, %v14031_v50  ;;  %v14062_v30 = vld [vmem:[%s17866_s27 + $0xb3] sm:$0xff] }
 0x1b3   : > { %15802 = vmatprep.mubr.msk.f32.mxu1 %vm236_vm1, %v18801_v32  ;;  %16512 = vmatprep.mubr.msk.f32.mxu0 %vm236_vm1, %v19015_v51  ;;  %v19462_v32 = vld [vmem:[%s17866_s27 + $0x37] sm:$0xff] }
 0x1b4   : > { %v19556_v51 = vld [vmem:[%s17866_s27 + $0x97] sm:$0xff] }
 0x1b5   : > { %v19644_v50 = vld [vmem:[%s17866_s27 + $0x58] sm:$0xff] }
 0x1b6   : > { %15803 = vmatmul.mubr.msk.f32.gmra.mrb[10].mxu1 %vm236_vm1, %v18815_v59  ;;  %16513 = vmatmul.mubr.msk.f32.vlgmr.msra.gmra.mrb[0].mxu0 %vm236_vm1, %v19021_v18  ;;  %v14063_v59 = vld [vmem:[%s17866_s27 + $0xbb] sm:$0xff]  ;;  %21064 = vst [vmem:[#allocation4_spill] sm:$0xff] %v19644_v50 }
 0x1b7   : > { %16540 = vmatpush3.msk.msra.mxu0 %vm291_vm0, %v9467_v58  ;;  %15805 = vmatprep.mubr.msk.f32.mxu1 %vm236_vm1, %v18820_v56  ;;  %v19474_v56 = vld [vmem:[%s17866_s27 + $0x3f] sm:$0xff]  ;;  %v19593_v58 = vld [vmem:[%s20935_s1 + $0x2d] sm:$0x7] }
 0x1b8   : > { %16515 = vmatprep.mubr.msk.f32.mxu0 %vm236_vm1, %v19032_v53  ;;  %16568 = vmatprep.subr.msk.mxu0 %vm291_vm0, %v19403_v36  ;;  %v21053_v18 = vld [vmem:[#allocation17_spill] sm:$0xff]  ;;  %v21054_v53 = vld [vmem:[#allocation18_spill] sm:$0xff] }
 0x1b9   : > { %21059 = vst [vmem:[#allocation17_spill] sm:$0xff] %v19624_v25  ;;  %21060 = vst [vmem:[#allocation18_spill] sm:$0xff] %v19627_v61 }
 0x1ba   : > { %15806 = vmatmul.mubr.msk.f32.gmra.mrb[12].mxu1 %vm236_vm1, %v18832_v62  ;;  %16516 = vmatmul.mubr.msk.f32.gmra.mrb[2].mxu0 %vm236_vm1, %v19035_v8  ;;  %v14064_v62 = vld [vmem:[%s17866_s27 + $0xc3] sm:$0xff] }
 0x1bb   : > { %15808 = vmatprep.mubr.msk.f32.mxu1 %vm236_vm1, %v18835_v23  ;;  %16518 = vmatprep.mubr.msk.f32.mxu0 %vm236_vm1, %v19050_v44  ;;  %v19478_v23 = vld [vmem:[%s17866_s27 + $0x47] sm:$0xff]  ;;  %v19567_v8 = vld [vmem:[%s17866_s27 + $0x9f] sm:$0xff] }
 0x1bc   : > { %v13200_v44 = vld [vmem:[%s17866_s27 + $0x18] sm:$0xff] }
 0x1be   : > { %15809 = vmatmul.mubr.msk.f32.gmra.mrb[14].mxu1 %vm236_vm1, %v18846_v0  ;;  %16519 = vmatmul.mubr.msk.f32.gmra.mrb[4].mxu0 %vm236_vm1, %v19055_v37  ;;  %v19488_v0 = vld [vmem:[%s17866_s27 + $0x4f] sm:$0xff] }
 0x1bf   : > { %15811 = vmatprep.mubr.msk.f32.mxu1 %vm236_vm1, %v19246_v3  ;;  %16521 = vmatprep.mubr.msk.f32.mxu0 %vm236_vm1, %v19068_v4  ;;  %v21055_v37 = vld [vmem:[#allocation19_spill] sm:$0xff]  ;;  %v21056_v4 = vld [vmem:[#allocation20_spill] sm:$0xff] }
 0x1c0   : > { %21061 = vst [vmem:[#allocation19_spill] sm:$0xff] %v19630_v27  ;;  %21063 = vst [vmem:[#allocation20_spill] sm:$0xff] %v19641_v29 }
 0x1c2   : > { %15812 = vmatmul.mubr.msk.f32.gmra.mrb[16].mxu1 %vm236_vm1, %v19249_v46  ;;  %16522 = vmatmul.mubr.msk.f32.gmra.mrb[6].mxu0 %vm236_vm1, %v19071_v26  ;;  %v13201_v26 = vld [vmem:[%s17866_s27 + $0x20] sm:$0xff] }
 0x1c3   : > { %15816 = vmatprep.mubr.msk.f32.mxu1 %vm236_vm1, %v13163_v38  ;;  %16524 = vmatprep.mubr.msk.f32.mxu0 %vm236_vm1, %v19082_v33  ;;  %v19579_v33 = vld [vmem:[%s17866_s27 + $0xa4] sm:$0xff]  ;;  %v21066_v38 = vld [vmem:[#allocation5_spill] sm:$0xff] }
 0x1c6   : > { %15817 = vmatmul.mubr.msk.f32.vlgmr.msra.gmra.mrb[0].mxu1 %vm236_vm1, %v13164_v41  ;;  %16525 = vmatmul.mubr.msk.f32.gmra.mrb[8].mxu0 %vm236_vm1, %v14060_v43  ;;  %v19658_v41 = vld [vmem:[%s17866_s27 + $0x60] sm:$0xff] }
 0x1c7   : > { %15819 = vmatprep.mubr.msk.f32.mxu1 %vm236_vm1, %v19443_v47  ;;  %16527 = vmatprep.mubr.msk.f32.mxu0 %vm236_vm1, %v14061_v20  ;;  %v19661_v43 = vld [vmem:[%s17866_s27 + $0xe4] sm:$0xff] }
 0x1c8   : > { %15844 = vmatpush3.msk.msra.mxu1 %vm291_vm0, %v3443_v19  ;;  %v19608_v19 = vld [vmem:[%s17866_s27 + $0x38] sm:$0xff]  ;;  %21067 = vst [vmem:[#allocation5_spill] sm:$0xff] %v19661_v43  ;;  %v19664_v20 = vld [vmem:[%s17866_s27 + $0x68] sm:$0xff] }
 0x1c9   : > { %15872 = vmatprep.subr.msk.mxu1 %vm291_vm0, %v19451_v49  ;;  %21057 = vst [vmem:[#allocation2_spill] sm:$0xff] %v19608_v19 }
 0x1ca   : > { %15820 = vmatmul.mubr.msk.f32.gmra.mrb[2].mxu1 %vm236_vm1, %v19457_v13  ;;  %16528 = vmatmul.mubr.msk.f32.gmra.mrb[10].mxu0 %vm236_vm1, %v14062_v30  ;;  %v19678_v30 = vld [vmem:[%s17866_s27 + $0x70] sm:$0xff] }
 0x1cb   : > { %15822 = vmatprep.mubr.msk.f32.mxu1 %vm236_vm1, %v19462_v32  ;;  %16530 = vmatprep.mubr.msk.f32.mxu0 %vm236_vm1, %v14063_v59  ;;  %v19681_v59 = vld [vmem:[%s17866_s27 + $0x65] sm:$0xff] }
 0x1ce   : > { %15823 = vmatmul.mubr.msk.f32.gmra.mrb[4].mxu1 %vm236_vm1, %v19474_v56  ;;  %16531 = vmatmul.mubr.msk.f32.gmra.mrb[12].mxu0 %vm236_vm1, %v14064_v62  ;;  %v19684_v62 = vld [vmem:[%s17866_s27 + $0x78] sm:$0xff] }
 0x1cf   : > { %15825 = vmatprep.mubr.msk.f32.mxu1 %vm236_vm1, %v19478_v23  ;;  %16533 = vmatprep.mubr.msk.f32.mxu0 %vm236_vm1, %v18888_v42  ;;  %v14068_v42 = vld [vmem:[%s17866_s27 + $0xe3] sm:$0xff] }
 0x1d2   : > { %15826 = vmatmul.mubr.msk.f32.gmra.mrb[6].mxu1 %vm236_vm1, %v19488_v0  ;;  %16534 = vmatmul.mubr.msk.f32.gmra.mrb[14].mxu0 %vm236_vm1, %v18900_v11  ;;  %v19516_v11 = vld [vmem:[%s17866_s27 + $0x6f] sm:$0xff] }
 0x1d3   : > { %15828 = vmatprep.mubr.msk.f32.mxu1 %vm236_vm1, %v19491_v1  ;;  %16536 = vmatprep.mubr.msk.f32.mxu0 %vm236_vm1, %v14067_v34  ;;  %v19687_v34 = vld [vmem:[%s17866_s27 + $0x6d] sm:$0xff] }
 0x1d6   : > { %15829 = vmatmul.mubr.msk.f32.gmra.mrb[8].mxu1 %vm236_vm1, %v19502_v14  ;;  %16537 = vmatmul.mubr.msk.f32.gmra.mrb[16].mxu0 %vm236_vm1, %v14068_v42  ;;  %v10220_v42 = vld [vmem:[%s20935_s1 + $0x78] sm:$0x7] }
 0x1d7   : > { %15831 = vmatprep.mubr.msk.f32.mxu1 %vm236_vm1, %v19506_v2  ;;  %16541 = vmatprep.mubr.msk.f32.mxu0 %vm236_vm1, %v19170_v16 }
 0x1da   : > { %15832 = vmatmul.mubr.msk.f32.gmra.mrb[10].mxu1 %vm236_vm1, %v19516_v11  ;;  %16542 = vmatmul.mubr.msk.f32.vlgmr.msra.gmra.mrb[0].mxu0 %vm236_vm1, %v19176_v40 }
 0x1db   : > { %16569 = vmatpush3.msk.msra.mxu0 %vm291_vm0, %v19403_v36  ;;  %15834 = vmatprep.mubr.msk.f32.mxu1 %vm236_vm1, %v19519_v24  ;;  %v19647_v36 = vld [vmem:[%s17866_s27 + $0xdc] sm:$0xff] }
 0x1dc   : > { %16544 = vmatprep.mubr.msk.f32.mxu0 %vm236_vm1, %v19187_v39  ;;  %16597 = vmatprep.subr.msk.mxu0 %vm291_vm0, %v19524_v6  ;;  %21065 = vst [vmem:[#allocation21_spill] sm:$0xff] %v19647_v36 }
 0x1de   : > { %15835 = vmatmul.mubr.msk.f32.gmra.mrb[12].mxu1 %vm236_vm1, %v19535_v10  ;;  %16545 = vmatmul.mubr.msk.f32.gmra.mrb[2].mxu0 %vm236_vm1, %v19190_v63 }
 0x1df   : > { %15837 = vmatprep.mubr.msk.f32.mxu1 %vm236_vm1, %v19540_v45  ;;  %16547 = vmatprep.mubr.msk.f32.mxu0 %vm236_vm1, %v19204_v12 }
 0x1e2   : > { %15838 = vmatmul.mubr.msk.f32.gmra.mrb[14].mxu1 %vm236_vm1, %v19553_v48  ;;  %16548 = vmatmul.mubr.msk.f32.gmra.mrb[4].mxu0 %vm236_vm1, %v21053_v18 }
 0x1e3   : > { %15840 = vmatprep.mubr.msk.f32.mxu1 %vm236_vm1, %v19556_v51  ;;  %16550 = vmatprep.mubr.msk.f32.mxu0 %vm236_vm1, %v21054_v53 }
 0x1e6   : > { %15841 = vmatmul.mubr.msk.f32.gmra.mrb[16].mxu1 %vm236_vm1, %v19567_v8  ;;  %16551 = vmatmul.mubr.msk.f32.gmra.mrb[6].mxu0 %vm236_vm1, %v21055_v37 }
 0x1e7   : > { %15845 = vmatprep.mubr.msk.f32.mxu1 %vm236_vm1, %v13200_v44  ;;  %16553 = vmatprep.mubr.msk.f32.mxu0 %vm236_vm1, %v21056_v4  ;;  %v19701_v44 = vld [vmem:[%s17866_s27 + $0x80] sm:$0xff] }
 0x1ea   : > { %15846 = vmatmul.mubr.msk.f32.vlgmr.msra.gmra.mrb[0].mxu1 %vm236_vm1, %v13201_v26  ;;  %16554 = vmatmul.mubr.msk.f32.gmra.mrb[8].mxu0 %vm236_vm1, %v19579_v33  ;;  %v19704_v26 = vld [vmem:[%s17866_s27 + $0x75] sm:$0xff] }
 0x1eb   : > { %15848 = vmatprep.mubr.msk.f32.mxu1 %vm236_vm1, %v19582_v7  ;;  %16556 = vmatprep.mubr.msk.f32.mxu0 %vm236_vm1, %v19585_v52 }
 0x1ec   : > { %15873 = vmatpush3.msk.msra.mxu1 %vm291_vm0, %v19451_v49  ;;  %v19667_v49 = vld [vmem:[%s17866_s27 + $0x5d] sm:$0xff] }
 0x1ed   : > { %15901 = vmatprep.subr.msk.mxu1 %vm291_vm0, %v19593_v58 }
 0x1ee   : > { %15849 = vmatmul.mubr.msk.f32.gmra.mrb[2].mxu1 %vm236_vm1, %v19600_v9  ;;  %16557 = vmatmul.mubr.msk.f32.gmra.mrb[10].mxu0 %vm236_vm1, %v19603_v15 }
 0x1ef   : > { %15851 = vmatprep.mubr.msk.f32.mxu1 %vm236_vm1, %v19608_v19  ;;  %16559 = vmatprep.mubr.msk.f32.mxu0 %vm236_vm1, %v19611_v22  ;;  %v21068_v22 = vld [vmem:[#allocation6_spill] sm:$0xff]  ;;  %v4196_v19 = vld [vmem:[%s20935_s1 + $0x30] sm:$0x7] }
 0x1f2   : > { %15852 = vmatmul.mubr.msk.f32.gmra.mrb[4].mxu1 %vm236_vm1, %v19624_v25  ;;  %16560 = vmatmul.mubr.msk.f32.gmra.mrb[12].mxu0 %vm236_vm1, %v19627_v61  ;;  %v13238_v61 = vld [vmem:[%s17866_s27 + $0x2c] sm:$0xff]  ;;  %v13239_v25 = vld [vmem:[%s17866_s27 + $0x34] sm:$0xff] }
 0x1f3   : > { %15854 = vmatprep.mubr.msk.f32.mxu1 %vm236_vm1, %v19630_v27  ;;  %16562 = vmatprep.mubr.msk.f32.mxu0 %vm236_vm1, %v21062_v28  ;;  %v19709_v28 = vld [vmem:[%s17866_s27 + $0x88] sm:$0xff] }
 0x1f4   : > { %v13237_v27 = vld [vmem:[%s17866_s27 + $0x24] sm:$0xff] }
 0x1f6   : > { %15855 = vmatmul.mubr.msk.f32.gmra.mrb[6].mxu1 %vm236_vm1, %v19641_v29  ;;  %16563 = vmatmul.mubr.msk.f32.gmra.mrb[14].mxu0 %vm236_vm1, %v21066_v38  ;;  %v19712_v38 = vld [vmem:[%s17866_s27 + $0x7d] sm:$0xff] }
 0x1f7   : > { %15857 = vmatprep.mubr.msk.f32.mxu1 %vm236_vm1, %v19644_v50  ;;  %16565 = vmatprep.mubr.msk.f32.mxu0 %vm236_vm1, %v19647_v36  ;;  %v19730_v36 = vld [vmem:[%s17866_s27 + $0x98] sm:$0xff]  ;;  %v19733_v50 = vld [vmem:[%s17866_s27 + $0x8d] sm:$0xff]  ;;  %v19744_v29 = vld [vmem:[%s17866_s27 + $0xa0] sm:$0xff] }
 0x1fa   : > { %15858 = vmatmul.mubr.msk.f32.gmra.mrb[8].mxu1 %vm236_vm1, %v19658_v41  ;;  %16566 = vmatmul.mubr.msk.f32.gmra.mrb[16].mxu0 %vm236_vm1, %v19661_v43  ;;  %v19727_v43 = vld [vmem:[%s17866_s27 + $0x85] sm:$0xff] }
 0x1fb   : > { %15860 = vmatprep.mubr.msk.f32.mxu1 %vm236_vm1, %v19664_v20  ;;  %16570 = vmatprep.mubr.msk.f32.mxu0 %vm236_vm1, %v19667_v49 }
 0x1fe   : > { %15861 = vmatmul.mubr.msk.f32.gmra.mrb[10].mxu1 %vm236_vm1, %v19678_v30  ;;  %16571 = vmatmul.mubr.msk.f32.vlgmr.msra.gmra.mrb[0].mxu0 %vm236_vm1, %v19681_v59 }
 0x1ff   : > { %16598 = vmatpush3.msk.msra.mxu0 %vm291_vm0, %v19524_v6  ;;  %15863 = vmatprep.mubr.msk.f32.mxu1 %vm236_vm1, %v19684_v62  ;;  %v19724_v6 = vld [vmem:[%s17866_s27 + $0x90] sm:$0xff] }
 0x200   : > { %16573 = vmatprep.mubr.msk.f32.mxu0 %vm236_vm1, %v19687_v34  ;;  %16626 = vmatprep.subr.msk.mxu0 %vm291_vm0, %v10220_v42 }
 0x202   : > { %15864 = vmatmul.mubr.msk.f32.gmra.mrb[12].mxu1 %vm236_vm1, %v19701_v44  ;;  %16574 = vmatmul.mubr.msk.f32.gmra.mrb[2].mxu0 %vm236_vm1, %v19704_v26 }
 0x203   : > { %15866 = vmatprep.mubr.msk.f32.mxu1 %vm236_vm1, %v19709_v28  ;;  %16576 = vmatprep.mubr.msk.f32.mxu0 %vm236_vm1, %v19712_v38 }
 0x206   : > { %15867 = vmatmul.mubr.msk.f32.gmra.mrb[14].mxu1 %vm236_vm1, %v19724_v6  ;;  %16577 = vmatmul.mubr.msk.f32.gmra.mrb[4].mxu0 %vm236_vm1, %v19727_v43 }
 0x207   : > { %15869 = vmatprep.mubr.msk.f32.mxu1 %vm236_vm1, %v19730_v36  ;;  %16579 = vmatprep.mubr.msk.f32.mxu0 %vm236_vm1, %v19733_v50 }
 0x20a   : > { %15870 = vmatmul.mubr.msk.f32.gmra.mrb[16].mxu1 %vm236_vm1, %v19744_v29  ;;  %16580 = vmatmul.mubr.msk.f32.gmra.mrb[6].mxu0 %vm236_vm1, %v19093_v60  ;;  %v21069_v60 = vld [vmem:[#allocation7_spill] sm:$0xff] }
 0x20b   : > { %15874 = vmatprep.mubr.msk.f32.mxu1 %vm236_vm1, %v13237_v27  ;;  %16582 = vmatprep.mubr.msk.f32.mxu0 %vm236_vm1, %v19096_v35  ;;  %v21070_v35 = vld [vmem:[#allocation8_spill] sm:$0xff] }
 0x20c   : > { %v21074_v27 = vld [vmem:[#allocation12_spill] sm:$0xff] }
 0x20e   : > { %15875 = vmatmul.mubr.msk.f32.vlgmr.msra.gmra.mrb[0].mxu1 %vm236_vm1, %v13238_v61  ;;  %16583 = vmatmul.mubr.msk.f32.gmra.mrb[8].mxu0 %vm236_vm1, %v21068_v22  ;;  %v21071_v22 = vld [vmem:[#allocation9_spill] sm:$0xff]  ;;  %v21072_v61 = vld [vmem:[#allocation10_spill] sm:$0xff] }
 0x20f   : > { %15877 = vmatprep.mubr.msk.f32.mxu1 %vm236_vm1, %v13239_v25  ;;  %16585 = vmatprep.mubr.msk.f32.mxu0 %vm236_vm1, %v21069_v60  ;;  %v21073_v25 = vld [vmem:[#allocation11_spill] sm:$0xff]  ;;  %v21076_v60 = vld [vmem:[#allocation14_spill] sm:$0xff] }
 0x210   : > { %15902 = vmatpush3.msk.msra.mxu1 %vm291_vm0, %v19593_v58  ;;  %v21075_v58 = vld [vmem:[#allocation13_spill] sm:$0xff] }
 0x211   : > { %15930 = vmatprep.subr.msk.mxu1 %vm291_vm0, %v4196_v19 }
 0x212   : > { %15878 = vmatmul.mubr.msk.f32.gmra.mrb[2].mxu1 %vm236_vm1, %v21070_v35  ;;  %16586 = vmatmul.mubr.msk.f32.gmra.mrb[10].mxu0 %vm236_vm1, %v21071_v22  ;;  %v21077_v35 = vld [vmem:[#allocation15_spill] sm:$0xff]  ;;  %v19785_v22 = vld [vmem:[%s17866_s27 + $0xdd] sm:$0xff] }
 0x213   : > { %15880 = vmatprep.mubr.msk.f32.mxu1 %vm236_vm1, %v21072_v61  ;;  %16588 = vmatprep.mubr.msk.f32.mxu0 %vm236_vm1, %v21073_v25  ;;  %v21078_v61 = vld [vmem:[#allocation16_spill] sm:$0xff]  ;;  %v19796_v25 = vld [vmem:[%s17866_s27 + $0xe5] sm:$0xff] }
 0x216   : > { %15881 = vmatmul.mubr.msk.f32.gmra.mrb[4].mxu1 %vm236_vm1, %v21074_v27  ;;  %16589 = vmatmul.mubr.msk.f32.gmra.mrb[12].mxu0 %vm236_vm1, %v21075_v58  ;;  %v19799_v27 = vld [vmem:[%s17866_s27 + $0x5e] sm:$0xff]  ;;  %v10471_v58 = vld [vmem:[%s20935_s1 + $0x7b] sm:$0x7] }
 0x217   : > { %15883 = vmatprep.mubr.msk.f32.mxu1 %vm236_vm1, %v21076_v60  ;;  %16591 = vmatprep.mubr.msk.f32.mxu0 %vm236_vm1, %v21077_v35  ;;  %v13280_v60 = vld [vmem:[%s17866_s27 + $0x55] sm:$0xff]  ;;  %v19969_v35 = vld [vmem:[%s17866_s27 + $0xa7] sm:$0xff] }
 0x21a   : > { %15884 = vmatmul.mubr.msk.f32.gmra.mrb[6].mxu1 %vm236_vm1, %v19170_v16  ;;  %16592 = vmatmul.mubr.msk.f32.gmra.mrb[14].mxu0 %vm236_vm1, %v21078_v61  ;;  %v19810_v16 = vld [vmem:[%s17866_s27 + $0x66] sm:$0xff]  ;;  %v19972_v61 = vld [vmem:[%s17866_s27 + $0x36] sm:$0xff] }
 0x21b   : > { %15886 = vmatprep.mubr.msk.f32.mxu1 %vm236_vm1, %v19176_v40  ;;  %16594 = vmatprep.mubr.msk.f32.mxu0 %vm236_vm1, %v19785_v22  ;;  %v19813_v40 = vld [vmem:[%s17866_s27 + $0x6e] sm:$0xff] }
 0x21e   : > { %15887 = vmatmul.mubr.msk.f32.gmra.mrb[8].mxu1 %vm236_vm1, %v19187_v39  ;;  %16595 = vmatmul.mubr.msk.f32.gmra.mrb[16].mxu0 %vm236_vm1, %v19796_v25  ;;  %v19826_v39 = vld [vmem:[%s17866_s27 + $0x76] sm:$0xff] }
 0x21f   : > { %15889 = vmatprep.mubr.msk.f32.mxu1 %vm236_vm1, %v19190_v63  ;;  %16599 = vmatprep.mubr.msk.f32.mxu0 %vm236_vm1, %v19799_v27  ;;  %v19831_v63 = vld [vmem:[%s17866_s27 + $0x7e] sm:$0xff] }
 0x222   : > { %15890 = vmatmul.mubr.msk.f32.gmra.mrb[10].mxu1 %vm236_vm1, %v19204_v12  ;;  %16600 = vmatmul.mubr.msk.f32.vlgmr.msra.gmra.mrb[0].mxu0 %vm236_vm1, %v19810_v16  ;;  %v19843_v12 = vld [vmem:[%s17866_s27 + $0x86] sm:$0xff] }
 0x223   : > { %16627 = vmatpush3.msk.msra.mxu0 %vm291_vm0, %v10220_v42  ;;  %15892 = vmatprep.mubr.msk.f32.mxu1 %vm236_vm1, %v21053_v18  ;;  %v19846_v18 = vld [vmem:[%s17866_s27 + $0x8e] sm:$0xff] }
 0x224   : > { %16602 = vmatprep.mubr.msk.f32.mxu0 %vm236_vm1, %v19813_v40  ;;  %16655 = vmatprep.subr.msk.mxu0 %vm291_vm0, %v10471_v58  ;;  %v4447_v42 = vld [vmem:[%s20935_s1 + $0x33] sm:$0x7] }
 0x226   : > { %15893 = vmatmul.mubr.msk.f32.gmra.mrb[12].mxu1 %vm236_vm1, %v21054_v53  ;;  %16603 = vmatmul.mubr.msk.f32.gmra.mrb[2].mxu0 %vm236_vm1, %v19826_v39  ;;  %v13274_v53 = vld [vmem:[%s17866_s27 + $0x25] sm:$0xff] }
 0x227   : > { %15895 = vmatprep.mubr.msk.f32.mxu1 %vm236_vm1, %v21055_v37  ;;  %16605 = vmatprep.mubr.msk.f32.mxu0 %vm236_vm1, %v19831_v63  ;;  %v13275_v37 = vld [vmem:[%s17866_s27 + $0x2d] sm:$0xff] }
 0x22a   : > { %15896 = vmatmul.mubr.msk.f32.gmra.mrb[14].mxu1 %vm236_vm1, %v21056_v4  ;;  %16606 = vmatmul.mubr.msk.f32.gmra.mrb[4].mxu0 %vm236_vm1, %v19843_v12  ;;  %v13276_v4 = vld [vmem:[%s17866_s27 + $0x35] sm:$0xff] }
 0x22b   : > { %15898 = vmatprep.mubr.msk.f32.mxu1 %vm236_vm1, %v19579_v33  ;;  %16608 = vmatprep.mubr.msk.f32.mxu0 %vm236_vm1, %v19846_v18 }
 0x22e   : > { %15899 = vmatmul.mubr.msk.f32.gmra.mrb[16].mxu1 %vm236_vm1, %v19585_v52  ;;  %16609 = vmatmul.mubr.msk.f32.gmra.mrb[6].mxu0 %vm236_vm1, %v19246_v3  ;;  %v13277_v3 = vld [vmem:[%s17866_s27 + $0x3d] sm:$0xff] }
 0x22f   : > { %15903 = vmatprep.mubr.msk.f32.mxu1 %vm236_vm1, %v13274_v53  ;;  %16611 = vmatprep.mubr.msk.f32.mxu0 %vm236_vm1, %v19249_v46  ;;  %v13278_v46 = vld [vmem:[%s17866_s27 + $0x45] sm:$0xff]  ;;  %v19983_v53 = vld [vmem:[%s20935_s1 + $0x36] sm:$0x7] }
 0x232   : > { %15904 = vmatmul.mubr.msk.f32.vlgmr.msra.gmra.mrb[0].mxu1 %vm236_vm1, %v13275_v37  ;;  %16612 = vmatmul.mubr.msk.f32.gmra.mrb[8].mxu0 %vm236_vm1, %v19263_v17  ;;  %v13279_v17 = vld [vmem:[%s17866_s27 + $0x4d] sm:$0xff]  ;;  %v19990_v37 = vld [vmem:[%s17866_s27 + $0x3e] sm:$0xff] }
 0x233   : > { %15906 = vmatprep.mubr.msk.f32.mxu1 %vm236_vm1, %v13276_v4  ;;  %16614 = vmatprep.mubr.msk.f32.mxu0 %vm236_vm1, %v19268_v21  ;;  %v19894_v21 = vld [vmem:[%s17866_s27 + $0xde] sm:$0xff] }
 0x234   : > { %15931 = vmatpush3.msk.msra.mxu1 %vm291_vm0, %v4196_v19  ;;  %v19957_v19 = vld [vmem:[%s17866_s27 + $0xad] sm:$0xff]  ;;  %v19993_v4 = vld [vmem:[%s17866_s27 + $0xb7] sm:$0xff] }
 0x235   : > { %15959 = vmatprep.subr.msk.mxu1 %vm291_vm0, %v4447_v42 }
 0x236   : > { %15907 = vmatmul.mubr.msk.f32.gmra.mrb[2].mxu1 %vm236_vm1, %v13277_v3  ;;  %16615 = vmatmul.mubr.msk.f32.gmra.mrb[10].mxu0 %vm236_vm1, %v19280_v31  ;;  %v19905_v31 = vld [vmem:[%s17866_s27 + $0xe6] sm:$0xff] }
 0x237   : > { %15909 = vmatprep.mubr.msk.f32.mxu1 %vm236_vm1, %v13278_v46  ;;  %16617 = vmatprep.mubr.msk.f32.mxu0 %vm236_vm1, %v19283_v57  ;;  %v19918_v57 = vld [vmem:[%s20935_s1 + $0x7e] sm:$0x7]  ;;  %v19997_v3 = vld [vmem:[%s17866_s27 + $0x46] sm:$0xff] }
 0x238   : > { %v20000_v46 = vld [vmem:[%s17866_s27 + $0xbf] sm:$0xff] }
 0x239   : > { %21079 = vst [vmem:[#allocation6_spill] sm:$0xff] %v20000_v46 }
 0x23a   : > { %15910 = vmatmul.mubr.msk.f32.gmra.mrb[4].mxu1 %vm236_vm1, %v13279_v17  ;;  %16618 = vmatmul.mubr.msk.f32.gmra.mrb[12].mxu0 %vm236_vm1, %v19294_v55  ;;  %v19930_v55 = vld [vmem:[%s17866_s27 + $0x95] sm:$0xff]  ;;  %v20016_v17 = vld [vmem:[%s17866_s27 + $0xc7] sm:$0xff] }
 0x23b   : > { %15912 = vmatprep.mubr.msk.f32.mxu1 %vm236_vm1, %v13280_v60  ;;  %16620 = vmatprep.mubr.msk.f32.mxu0 %vm236_vm1, %v19297_v5  ;;  %v19943_v5 = vld [vmem:[%s17866_s27 + $0x9d] sm:$0xff]  ;;  %21080 = vst [vmem:[#allocation7_spill] sm:$0xff] %v20016_v17 }
 0x23c   : > { %v20019_v60 = vld [vmem:[%s17866_s27 + $0x56] sm:$0xff] }
 0x23d   : > { %21081 = vst [vmem:[#allocation8_spill] sm:$0xff] %v20019_v60 }
 0x23e   : > { %15913 = vmatmul.mubr.msk.f32.gmra.mrb[6].mxu1 %vm236_vm1, %v19667_v49  ;;  %16621 = vmatmul.mubr.msk.f32.gmra.mrb[14].mxu0 %vm236_vm1, %v19308_v54  ;;  %v19946_v54 = vld [vmem:[%s17866_s27 + $0xa5] sm:$0xff] }
 0x23f   : > { %15915 = vmatprep.mubr.msk.f32.mxu1 %vm236_vm1, %v19681_v59  ;;  %16623 = vmatprep.mubr.msk.f32.mxu0 %vm236_vm1, %v19894_v21  ;;  %v13311_v49 = vld [vmem:[%s17866_s27 + $0x26] sm:$0xff]  ;;  %v13312_v59 = vld [vmem:[%s17866_s27 + $0x2e] sm:$0xff] }
 0x242   : > { %15916 = vmatmul.mubr.msk.f32.gmra.mrb[8].mxu1 %vm236_vm1, %v19687_v34  ;;  %16624 = vmatmul.mubr.msk.f32.gmra.mrb[16].mxu0 %vm236_vm1, %v19905_v31 }
 0x243   : > { %15918 = vmatprep.mubr.msk.f32.mxu1 %vm236_vm1, %v19704_v26  ;;  %16628 = vmatprep.mubr.msk.f32.mxu0 %vm236_vm1, %v19502_v14 }
 0x246   : > { %15919 = vmatmul.mubr.msk.f32.gmra.mrb[10].mxu1 %vm236_vm1, %v19712_v38  ;;  %16629 = vmatmul.mubr.msk.f32.vlgmr.msra.gmra.mrb[0].mxu0 %vm236_vm1, %v19506_v2 }
 0x247   : > { %16656 = vmatpush3.msk.msra.mxu0 %vm291_vm0, %v10471_v58  ;;  %15921 = vmatprep.mubr.msk.f32.mxu1 %vm236_vm1, %v19727_v43  ;;  %v19975_v58 = vld [vmem:[%s17866_s27 + $0xaf] sm:$0xff] }
 0x248   : > { %16631 = vmatprep.mubr.msk.f32.mxu0 %vm236_vm1, %v19516_v11  ;;  %16684 = vmatprep.subr.msk.mxu0 %vm291_vm0, %v19918_v57 }
 0x24a   : > { %15922 = vmatmul.mubr.msk.f32.gmra.mrb[12].mxu1 %vm236_vm1, %v19733_v50  ;;  %16632 = vmatmul.mubr.msk.f32.gmra.mrb[2].mxu0 %vm236_vm1, %v19519_v24 }
 0x24b   : > { %15924 = vmatprep.mubr.msk.f32.mxu1 %vm236_vm1, %v19930_v55  ;;  %16634 = vmatprep.mubr.msk.f32.mxu0 %vm236_vm1, %v19535_v10 }
 0x24e   : > { %15925 = vmatmul.mubr.msk.f32.gmra.mrb[14].mxu1 %vm236_vm1, %v19943_v5  ;;  %16635 = vmatmul.mubr.msk.f32.gmra.mrb[4].mxu0 %vm236_vm1, %v19540_v45 }
 0x24f   : > { %15927 = vmatprep.mubr.msk.f32.mxu1 %vm236_vm1, %v19946_v54  ;;  %16637 = vmatprep.mubr.msk.f32.mxu0 %vm236_vm1, %v19553_v48 }
 0x252   : > { %15928 = vmatmul.mubr.msk.f32.gmra.mrb[16].mxu1 %vm236_vm1, %v19957_v19  ;;  %16638 = vmatmul.mubr.msk.f32.gmra.mrb[6].mxu0 %vm236_vm1, %v19556_v51 }
 0x253   : > { %15932 = vmatprep.mubr.msk.f32.mxu1 %vm236_vm1, %v13311_v49  ;;  %16640 = vmatprep.mubr.msk.f32.mxu0 %vm236_vm1, %v19567_v8  ;;  %v20022_v49 = vld [vmem:[%s17866_s27 + $0xcf] sm:$0xff] }
 0x254   : > { %21082 = vst [vmem:[#allocation9_spill] sm:$0xff] %v20022_v49 }
 0x256   : > { %15933 = vmatmul.mubr.msk.f32.vlgmr.msra.gmra.mrb[0].mxu1 %vm236_vm1, %v13312_v59  ;;  %16641 = vmatmul.mubr.msk.f32.gmra.mrb[8].mxu0 %vm236_vm1, %v19969_v35  ;;  %v20033_v59 = vld [vmem:[%s17866_s27 + $0xd7] sm:$0xff] }
 0x257   : > { %15935 = vmatprep.mubr.msk.f32.mxu1 %vm236_vm1, %v19972_v61  ;;  %16643 = vmatprep.mubr.msk.f32.mxu0 %vm236_vm1, %v19975_v58  ;;  %21083 = vst [vmem:[#allocation10_spill] sm:$0xff] %v20033_v59 }
 0x258   : > { %15960 = vmatpush3.msk.msra.mxu1 %vm291_vm0, %v4447_v42  ;;  %v20013_v42 = vld [vmem:[%s17866_s27 + $0x4e] sm:$0xff] }
 0x259   : > { %15988 = vmatprep.subr.msk.mxu1 %vm291_vm0, %v19983_v53 }
 0x25a   : > { %15936 = vmatmul.mubr.msk.f32.gmra.mrb[2].mxu1 %vm236_vm1, %v19990_v37  ;;  %16644 = vmatmul.mubr.msk.f32.gmra.mrb[10].mxu0 %vm236_vm1, %v19993_v4 }
 0x25b   : > { %15938 = vmatprep.mubr.msk.f32.mxu1 %vm236_vm1, %v19997_v3  ;;  %16646 = vmatprep.mubr.msk.f32.mxu0 %vm236_vm1, %v20000_v46  ;;  %v20036_v46 = vld [vmem:[%s17866_s27 + $0xdf] sm:$0xff] }
 0x25c   : > { %21084 = vst [vmem:[#allocation11_spill] sm:$0xff] %v20036_v46 }
 0x25e   : > { %15939 = vmatmul.mubr.msk.f32.gmra.mrb[4].mxu1 %vm236_vm1, %v20013_v42  ;;  %16647 = vmatmul.mubr.msk.f32.gmra.mrb[12].mxu0 %vm236_vm1, %v20016_v17  ;;  %v4949_v17 = vld [vmem:[%s20935_s1 + $0x39] sm:$0x7] }
 0x25f   : > { %15941 = vmatprep.mubr.msk.f32.mxu1 %vm236_vm1, %v20019_v60  ;;  %16649 = vmatprep.mubr.msk.f32.mxu0 %vm236_vm1, %v20022_v49  ;;  %v20047_v60 = vld [vmem:[%s17866_s27 + $0xe7] sm:$0xff]  ;;  %v20111_v49 = vld [vmem:[%s17866_s27 + $0xb0] sm:$0xff] }
 0x260   : > { %21085 = vst [vmem:[#allocation12_spill] sm:$0xff] %v20047_v60 }
 0x262   : > { %15942 = vmatmul.mubr.msk.f32.gmra.mrb[6].mxu1 %vm236_vm1, %v19799_v27  ;;  %16650 = vmatmul.mubr.msk.f32.gmra.mrb[14].mxu0 %vm236_vm1, %v20033_v59  ;;  %v10973_v27 = vld [vmem:[%s20935_s1 + $0x81] sm:$0x7]  ;;  %v20108_v59 = vld [vmem:[%s17866_s27 + $0xa8] sm:$0xff] }
 0x263   : > { %15944 = vmatprep.mubr.msk.f32.mxu1 %vm236_vm1, %v19810_v16  ;;  %16652 = vmatprep.mubr.msk.f32.mxu0 %vm236_vm1, %v20036_v46  ;;  %v20071_v16 = vld [vmem:[%s17866_s27 + $0x96] sm:$0xff]  ;;  %v20097_v46 = vld [vmem:[%s17866_s27 + $0xae] sm:$0xff] }
 0x266   : > { %15945 = vmatmul.mubr.msk.f32.gmra.mrb[8].mxu1 %vm236_vm1, %v19813_v40  ;;  %16653 = vmatmul.mubr.msk.f32.gmra.mrb[16].mxu0 %vm236_vm1, %v20047_v60  ;;  %v20086_v60 = vld [vmem:[%s17866_s27 + $0xa6] sm:$0xff] }
 0x267   : > { %15947 = vmatprep.mubr.msk.f32.mxu1 %vm236_vm1, %v19826_v39  ;;  %16657 = vmatprep.mubr.msk.f32.mxu0 %vm236_vm1, %v19658_v41 }
 0x26a   : > { %15948 = vmatmul.mubr.msk.f32.gmra.mrb[10].mxu1 %vm236_vm1, %v19831_v63  ;;  %16658 = vmatmul.mubr.msk.f32.vlgmr.msra.gmra.mrb[0].mxu0 %vm236_vm1, %v19664_v20 }
 0x26b   : > { %16685 = vmatpush3.msk.msra.mxu0 %vm291_vm0, %v19918_v57  ;;  %15950 = vmatprep.mubr.msk.f32.mxu1 %vm236_vm1, %v19843_v12  ;;  %v20083_v57 = vld [vmem:[%s17866_s27 + $0x9e] sm:$0xff] }
 0x26c   : > { %16660 = vmatprep.mubr.msk.f32.mxu0 %vm236_vm1, %v19678_v30  ;;  %16713 = vmatprep.subr.msk.mxu0 %vm291_vm0, %v10973_v27 }
 0x26e   : > { %15951 = vmatmul.mubr.msk.f32.gmra.mrb[12].mxu1 %vm236_vm1, %v19846_v18  ;;  %16661 = vmatmul.mubr.msk.f32.gmra.mrb[2].mxu0 %vm236_vm1, %v19684_v62 }
 0x26f   : > { %15953 = vmatprep.mubr.msk.f32.mxu1 %vm236_vm1, %v20071_v16  ;;  %16663 = vmatprep.mubr.msk.f32.mxu0 %vm236_vm1, %v19701_v44 }
 0x272   : > { %15954 = vmatmul.mubr.msk.f32.gmra.mrb[14].mxu1 %vm236_vm1, %v20083_v57  ;;  %16664 = vmatmul.mubr.msk.f32.gmra.mrb[4].mxu0 %vm236_vm1, %v19709_v28 }
 0x273   : > { %15956 = vmatprep.mubr.msk.f32.mxu1 %vm236_vm1, %v20086_v60  ;;  %16666 = vmatprep.mubr.msk.f32.mxu0 %vm236_vm1, %v19724_v6 }
 0x276   : > { %15957 = vmatmul.mubr.msk.f32.gmra.mrb[16].mxu1 %vm236_vm1, %v20097_v46  ;;  %16667 = vmatmul.mubr.msk.f32.gmra.mrb[6].mxu0 %vm236_vm1, %v19730_v36 }
 0x277   : > { %15961 = vmatprep.mubr.msk.f32.mxu1 %vm236_vm1, %v19443_v47  ;;  %16669 = vmatprep.mubr.msk.f32.mxu0 %vm236_vm1, %v19744_v29  ;;  %v20125_v47 = vld [vmem:[%s17866_s27 + $0xb8] sm:$0xff] }
 0x27a   : > { %15962 = vmatmul.mubr.msk.f32.vlgmr.msra.gmra.mrb[0].mxu1 %vm236_vm1, %v19457_v13  ;;  %16670 = vmatmul.mubr.msk.f32.gmra.mrb[8].mxu0 %vm236_vm1, %v20108_v59  ;;  %v20130_v13 = vld [vmem:[%s17866_s27 + $0xc0] sm:$0xff] }
 0x27b   : > { %15964 = vmatprep.mubr.msk.f32.mxu1 %vm236_vm1, %v19462_v32  ;;  %16672 = vmatprep.mubr.msk.f32.mxu0 %vm236_vm1, %v20111_v49  ;;  %v20142_v32 = vld [vmem:[%s17866_s27 + $0xc8] sm:$0xff] }
 0x27c   : > { %15989 = vmatpush3.msk.msra.mxu1 %vm291_vm0, %v19983_v53  ;;  %v20145_v53 = vld [vmem:[%s17866_s27 + $0xd0] sm:$0xff] }
 0x27d   : > { %16017 = vmatprep.subr.msk.mxu1 %vm291_vm0, %v4949_v17 }
 0x27e   : > { %15965 = vmatmul.mubr.msk.f32.gmra.mrb[2].mxu1 %vm236_vm1, %v19474_v56  ;;  %16673 = vmatmul.mubr.msk.f32.gmra.mrb[10].mxu0 %vm236_vm1, %v20125_v47  ;;  %v20156_v56 = vld [vmem:[%s17866_s27 + $0xd8] sm:$0xff] }
 0x27f   : > { %15967 = vmatprep.mubr.msk.f32.mxu1 %vm236_vm1, %v19478_v23  ;;  %16675 = vmatprep.mubr.msk.f32.mxu0 %vm236_vm1, %v20130_v13  ;;  %v20159_v23 = vld [vmem:[%s17866_s27 + $0xe0] sm:$0xff] }
 0x280   : > { %21086 = vst [vmem:[#allocation13_spill] sm:$0xff] %v20159_v23 }
 0x282   : > { %15968 = vmatmul.mubr.msk.f32.gmra.mrb[4].mxu1 %vm236_vm1, %v19488_v0  ;;  %16676 = vmatmul.mubr.msk.f32.gmra.mrb[12].mxu0 %vm236_vm1, %v20142_v32  ;;  %v20170_v0 = vld [vmem:[%s17866_s27 + $0xe8] sm:$0xff] }
 0x283   : > { %15970 = vmatprep.mubr.msk.f32.mxu1 %vm236_vm1, %v19491_v1  ;;  %16678 = vmatprep.mubr.msk.f32.mxu0 %vm236_vm1, %v20145_v53  ;;  %v14273_v1 = vld [vmem:[%s17866_s27 + $0x6c] sm:$0xff] }
 0x286   : > { %15971 = vmatmul.mubr.msk.f32.gmra.mrb[6].mxu1 %vm236_vm1, %v19502_v14  ;;  %16679 = vmatmul.mubr.msk.f32.gmra.mrb[14].mxu0 %vm236_vm1, %v20156_v56  ;;  %v14274_v14 = vld [vmem:[%s17866_s27 + $0x74] sm:$0xff] }
 0x287   : > { %15973 = vmatprep.mubr.msk.f32.mxu1 %vm236_vm1, %v19506_v2  ;;  %16681 = vmatprep.mubr.msk.f32.mxu0 %vm236_vm1, %v20159_v23  ;;  %v14275_v2 = vld [vmem:[%s17866_s27 + $0x7c] sm:$0xff]  ;;  %v11224_v23 = vld [vmem:[%s20935_s1 + $0x84] sm:$0x7] }
 0x28a   : > { %15974 = vmatmul.mubr.msk.f32.gmra.mrb[8].mxu1 %vm236_vm1, %v19516_v11  ;;  %16682 = vmatmul.mubr.msk.f32.gmra.mrb[16].mxu0 %vm236_vm1, %v20170_v0  ;;  %v14276_v11 = vld [vmem:[%s17866_s27 + $0x84] sm:$0xff] }
 0x28b   : > { %15976 = vmatprep.mubr.msk.f32.mxu1 %vm236_vm1, %v19519_v24  ;;  %16686 = vmatprep.mubr.msk.f32.mxu0 %vm236_vm1, %v14273_v1  ;;  %v14277_v24 = vld [vmem:[%s17866_s27 + $0x8c] sm:$0xff]  ;;  %v21094_v1 = vld [vmem:[#allocation21_spill] sm:$0xff] }
 0x28e   : > { %15977 = vmatmul.mubr.msk.f32.gmra.mrb[10].mxu1 %vm236_vm1, %v19535_v10  ;;  %16687 = vmatmul.mubr.msk.f32.vlgmr.msra.gmra.mrb[0].mxu0 %vm236_vm1, %v14274_v14  ;;  %v14278_v10 = vld [vmem:[%s17866_s27 + $0x94] sm:$0xff]  ;;  %v14289_v14 = vld [vmem:[%s17866_s27 + $0xec] sm:$0xff] }
 0x28f   : > { %16714 = vmatpush3.msk.msra.mxu0 %vm291_vm0, %v10973_v27  ;;  %15979 = vmatprep.mubr.msk.f32.mxu1 %vm236_vm1, %v19540_v45  ;;  %v14279_v27 = vld [vmem:[%s17866_s27 + $0x9c] sm:$0xff] }
 0x290   : > { %16689 = vmatprep.mubr.msk.f32.mxu0 %vm236_vm1, %v14275_v2  ;;  %16742 = vmatprep.subr.msk.mxu0 %vm291_vm0, %v11224_v23  ;;  %v5200_v45 = vld [vmem:[%s20935_s1 + $0x3c] sm:$0x7] }
 0x291   : > { %v21095_v2 = vld [vmem:[#allocation5_spill] sm:$0xff] }
 0x292   : > { %15980 = vmatmul.mubr.msk.f32.gmra.mrb[12].mxu1 %vm236_vm1, %v19553_v48  ;;  %16690 = vmatmul.mubr.msk.f32.gmra.mrb[2].mxu0 %vm236_vm1, %v14276_v11  ;;  %v21087_v48 = vld [vmem:[#allocation2_spill] sm:$0xff]  ;;  %v14290_v11 = vld [vmem:[%s17866_s27 + $0xf4] sm:$0xff] }
 0x293   : > { %15982 = vmatprep.mubr.msk.f32.mxu1 %vm236_vm1, %v19556_v51  ;;  %16692 = vmatprep.mubr.msk.f32.mxu0 %vm236_vm1, %v14277_v24  ;;  %v21088_v51 = vld [vmem:[#allocation3_spill] sm:$0xff]  ;;  %v20347_v24 = vld [vmem:[%s17866_s27 + $0x79] sm:$0xff] }
 0x296   : > { %15983 = vmatmul.mubr.msk.f32.gmra.mrb[14].mxu1 %vm236_vm1, %v19567_v8  ;;  %16693 = vmatmul.mubr.msk.f32.gmra.mrb[4].mxu0 %vm236_vm1, %v14278_v10  ;;  %v14285_v8 = vld [vmem:[%s17866_s27 + $0xcc] sm:$0xff] }
 0x297   : > { %15985 = vmatprep.mubr.msk.f32.mxu1 %vm236_vm1, %v19969_v35  ;;  %16695 = vmatprep.mubr.msk.f32.mxu0 %vm236_vm1, %v14279_v27  ;;  %v20365_v10 = vld [vmem:[%s20935_s1 + $0x8a] sm:$0x7]  ;;  %v20381_v27 = vld [vmem:[%s17866_s27 + $0x99] sm:$0xff] }
 0x29a   : > { %15986 = vmatmul.mubr.msk.f32.gmra.mrb[16].mxu1 %vm236_vm1, %v19975_v58  ;;  %16696 = vmatmul.mubr.msk.f32.gmra.mrb[6].mxu0 %vm236_vm1, %v19579_v33  ;;  %v21089_v33 = vld [vmem:[#allocation17_spill] sm:$0xff] }
 0x29b   : > { %15990 = vmatprep.mubr.msk.f32.mxu1 %vm236_vm1, %v19582_v7  ;;  %16698 = vmatprep.mubr.msk.f32.mxu0 %vm236_vm1, %v19585_v52  ;;  %v21090_v7 = vld [vmem:[#allocation18_spill] sm:$0xff]  ;;  %v21091_v52 = vld [vmem:[#allocation19_spill] sm:$0xff] }
 0x29e   : > { %15991 = vmatmul.mubr.msk.f32.vlgmr.msra.gmra.mrb[0].mxu1 %vm236_vm1, %v19600_v9  ;;  %16699 = vmatmul.mubr.msk.f32.gmra.mrb[8].mxu0 %vm236_vm1, %v19603_v15  ;;  %v14286_v9 = vld [vmem:[%s17866_s27 + $0xd4] sm:$0xff] }
 0x29f   : > { %15993 = vmatprep.mubr.msk.f32.mxu1 %vm236_vm1, %v21087_v48  ;;  %16701 = vmatprep.mubr.msk.f32.mxu0 %vm236_vm1, %v21088_v51  ;;  %v21092_v15 = vld [vmem:[#allocation20_spill] sm:$0xff]  ;;  %v13461_v51 = vld [vmem:[%s17866_s27 + $0x3a] sm:$0xff] }
 0x2a0   : > { %16018 = vmatpush3.msk.msra.mxu1 %vm291_vm0, %v4949_v17  ;;  %v21093_v17 = vld [vmem:[#allocation4_spill] sm:$0xff] }
 0x2a1   : > { %16046 = vmatprep.subr.msk.mxu1 %vm291_vm0, %v5200_v45  ;;  %v20420_v48 = vld [vmem:[%s17866_s27 + $0xb6] sm:$0xff] }
 0x2a2   : > { %15994 = vmatmul.mubr.msk.f32.gmra.mrb[2].mxu1 %vm236_vm1, %v21089_v33  ;;  %16702 = vmatmul.mubr.msk.f32.gmra.mrb[10].mxu0 %vm236_vm1, %v21090_v7  ;;  %v20432_v33 = vld [vmem:[%s20935_s1 + $0x42] sm:$0x7] }
 0x2a3   : > { %15996 = vmatprep.mubr.msk.f32.mxu1 %vm236_vm1, %v21091_v52  ;;  %16704 = vmatprep.mubr.msk.f32.mxu0 %vm236_vm1, %v14285_v8  ;;  %v20424_v8 = vld [vmem:[%s17866_s27 + $0xbe] sm:$0xff]  ;;  %v14358_v52 = vld [vmem:[%s17866_s27 + $0xc6] sm:$0xff] }
 0x2a4   : > { %v13462_v7 = vld [vmem:[%s17866_s27 + $0x42] sm:$0xff] }
 0x2a6   : > { %15997 = vmatmul.mubr.msk.f32.gmra.mrb[4].mxu1 %vm236_vm1, %v21092_v15  ;;  %16705 = vmatmul.mubr.msk.f32.gmra.mrb[12].mxu0 %vm236_vm1, %v14286_v9  ;;  %v13463_v9 = vld [vmem:[%s17866_s27 + $0x4a] sm:$0xff] }
 0x2a7   : > { %15999 = vmatprep.mubr.msk.f32.mxu1 %vm236_vm1, %v21093_v17  ;;  %16707 = vmatprep.mubr.msk.f32.mxu0 %vm236_vm1, %v21094_v1  ;;  %v14359_v15 = vld [vmem:[%s17866_s27 + $0xce] sm:$0xff]  ;;  %v14360_v1 = vld [vmem:[%s17866_s27 + $0xd6] sm:$0xff] }
 0x2a8   : > { %v13464_v17 = vld [vmem:[%s17866_s27 + $0x52] sm:$0xff] }
 0x2aa   : > { %16000 = vmatmul.mubr.msk.f32.gmra.mrb[6].mxu1 %vm236_vm1, %v19658_v41  ;;  %16708 = vmatmul.mubr.msk.f32.gmra.mrb[14].mxu0 %vm236_vm1, %v21095_v2  ;;  %v20265_v41 = vld [vmem:[%s20935_s1 + $0x87] sm:$0x7] }
 0x2ab   : > { %16002 = vmatprep.mubr.msk.f32.mxu1 %vm236_vm1, %v19664_v20  ;;  %16710 = vmatprep.mubr.msk.f32.mxu0 %vm236_vm1, %v14289_v14  ;;  %v14320_v20 = vld [vmem:[%s17866_s27 + $0xbd] sm:$0xff] }
 0x2ac   : > { %v13465_v14 = vld [vmem:[%s17866_s27 + $0x5a] sm:$0xff]  ;;  %v13466_v2 = vld [vmem:[%s17866_s27 + $0x62] sm:$0xff] }
 0x2ae   : > { %16003 = vmatmul.mubr.msk.f32.gmra.mrb[8].mxu1 %vm236_vm1, %v19678_v30  ;;  %16711 = vmatmul.mubr.msk.f32.gmra.mrb[16].mxu0 %vm236_vm1, %v14290_v11  ;;  %v20311_v30 = vld [vmem:[%s20935_s1 + $0x3f] sm:$0x7]  ;;  %v13467_v11 = vld [vmem:[%s17866_s27 + $0x6a] sm:$0xff] }
 0x2af   : > { %16005 = vmatprep.mubr.msk.f32.mxu1 %vm236_vm1, %v19684_v62  ;;  %16715 = vmatprep.mubr.msk.f32.mxu0 %vm236_vm1, %v19687_v34  ;;  %v13425_v62 = vld [vmem:[%s17866_s27 + $0x41] sm:$0xff] }
 0x2b0   : > { %v14321_v34 = vld [vmem:[%s17866_s27 + $0xc5] sm:$0xff] }
 0x2b2   : > { %16006 = vmatmul.mubr.msk.f32.gmra.mrb[10].mxu1 %vm236_vm1, %v19701_v44  ;;  %16716 = vmatmul.mubr.msk.f32.vlgmr.msra.gmra.mrb[0].mxu0 %vm236_vm1, %v19704_v26  ;;  %v13426_v44 = vld [vmem:[%s17866_s27 + $0x49] sm:$0xff] }
 0x2b3   : > { %16743 = vmatpush3.msk.msra.mxu0 %vm291_vm0, %v11224_v23  ;;  %16008 = vmatprep.mubr.msk.f32.mxu1 %vm236_vm1, %v19709_v28  ;;  %v14322_v26 = vld [vmem:[%s17866_s27 + $0xcd] sm:$0xff]  ;;  %v14327_v23 = vld [vmem:[%s17866_s27 + $0xf5] sm:$0xff] }
 0x2b4   : > { %16718 = vmatprep.mubr.msk.f32.mxu0 %vm236_vm1, %v19712_v38  ;;  %16771 = vmatprep.subr.msk.mxu0 %vm291_vm0, %v20265_v41  ;;  %v13427_v28 = vld [vmem:[%s17866_s27 + $0x51] sm:$0xff] }
 0x2b5   : > { %v14323_v38 = vld [vmem:[%s17866_s27 + $0xd5] sm:$0xff] }
 0x2b6   : > { %16009 = vmatmul.mubr.msk.f32.gmra.mrb[12].mxu1 %vm236_vm1, %v19724_v6  ;;  %16719 = vmatmul.mubr.msk.f32.gmra.mrb[2].mxu0 %vm236_vm1, %v19727_v43  ;;  %v13422_v43 = vld [vmem:[%s17866_s27 + $0x29] sm:$0xff]  ;;  %v13428_v6 = vld [vmem:[%s17866_s27 + $0x59] sm:$0xff] }
 0x2b7   : > { %16011 = vmatprep.mubr.msk.f32.mxu1 %vm236_vm1, %v19730_v36  ;;  %16721 = vmatprep.mubr.msk.f32.mxu0 %vm236_vm1, %v19733_v50  ;;  %v14319_v50 = vld [vmem:[%s17866_s27 + $0xb5] sm:$0xff] }
 0x2b8   : > { %v13424_v36 = vld [vmem:[%s17866_s27 + $0x39] sm:$0xff] }
 0x2ba   : > { %16012 = vmatmul.mubr.msk.f32.gmra.mrb[14].mxu1 %vm236_vm1, %v19744_v29  ;;  %16722 = vmatmul.mubr.msk.f32.gmra.mrb[4].mxu0 %vm236_vm1, %v19930_v55  ;;  %v13423_v29 = vld [vmem:[%s17866_s27 + $0x31] sm:$0xff]  ;;  %v13429_v55 = vld [vmem:[%s17866_s27 + $0x61] sm:$0xff] }
 0x2bb   : > { %16014 = vmatprep.mubr.msk.f32.mxu1 %vm236_vm1, %v20108_v59  ;;  %16724 = vmatprep.mubr.msk.f32.mxu0 %vm236_vm1, %v19943_v5  ;;  %v13430_v5 = vld [vmem:[%s17866_s27 + $0x69] sm:$0xff] }
 0x2be   : > { %16015 = vmatmul.mubr.msk.f32.gmra.mrb[16].mxu1 %vm236_vm1, %v20111_v49  ;;  %16725 = vmatmul.mubr.msk.f32.gmra.mrb[6].mxu0 %vm236_vm1, %v19946_v54  ;;  %v14326_v54 = vld [vmem:[%s17866_s27 + $0xed] sm:$0xff] }
 0x2bf   : > { %16019 = vmatprep.mubr.msk.f32.mxu1 %vm236_vm1, %v13422_v43  ;;  %16727 = vmatprep.mubr.msk.f32.mxu0 %vm236_vm1, %v19957_v19  ;;  %v20343_v19 = vld [vmem:[%s17866_s27 + $0x71] sm:$0xff] }
 0x2c0   : > { %v20466_v43 = vld [vmem:[%s17866_s27 + $0x72] sm:$0xff] }
 0x2c2   : > { %16020 = vmatmul.mubr.msk.f32.vlgmr.msra.gmra.mrb[0].mxu1 %vm236_vm1, %v13423_v29  ;;  %16728 = vmatmul.mubr.msk.f32.gmra.mrb[8].mxu0 %vm236_vm1, %v14319_v50  ;;  %v14364_v29 = vld [vmem:[%s17866_s27 + $0xf6] sm:$0xff] }
 0x2c3   : > { %16022 = vmatprep.mubr.msk.f32.mxu1 %vm236_vm1, %v13424_v36  ;;  %16730 = vmatprep.mubr.msk.f32.mxu0 %vm236_vm1, %v14320_v20  ;;  %v20473_v50 = vld [vmem:[%s17866_s27 + $0x6f] sm:$0xff]  ;;  %v20486_v36 = vld [vmem:[%s17866_s27 + $0x77] sm:$0xff] }
 0x2c4   : > { %16047 = vmatpush3.msk.msra.mxu1 %vm291_vm0, %v5200_v45  ;;  %v13460_v45 = vld [vmem:[%s17866_s27 + $0x32] sm:$0xff]  ;;  %v20489_v20 = vld [vmem:[%s17866_s27 + $0x8a] sm:$0xff] }
 0x2c5   : > { %16075 = vmatprep.subr.msk.mxu1 %vm291_vm0, %v20311_v30 }
 0x2c6   : > { %16023 = vmatmul.mubr.msk.f32.gmra.mrb[2].mxu1 %vm236_vm1, %v13425_v62  ;;  %16731 = vmatmul.mubr.msk.f32.gmra.mrb[10].mxu0 %vm236_vm1, %v14321_v34  ;;  %v20497_v62 = vld [vmem:[%s20935_s1 + $0x8d] sm:$0x7]  ;;  %v20508_v34 = vld [vmem:[%s17866_s27 + $0x92] sm:$0xff] }
 0x2c7   : > { %16025 = vmatprep.mubr.msk.f32.mxu1 %vm236_vm1, %v13426_v44  ;;  %16733 = vmatprep.mubr.msk.f32.mxu0 %vm236_vm1, %v14322_v26  ;;  %v20511_v44 = vld [vmem:[%s17866_s27 + $0x87] sm:$0xff]  ;;  %v20516_v26 = vld [vmem:[%s17866_s27 + $0x9a] sm:$0xff] }
 0x2ca   : > { %16026 = vmatmul.mubr.msk.f32.gmra.mrb[4].mxu1 %vm236_vm1, %v13427_v28  ;;  %16734 = vmatmul.mubr.msk.f32.gmra.mrb[12].mxu0 %vm236_vm1, %v14323_v38  ;;  %v20519_v28 = vld [vmem:[%s17866_s27 + $0x8f] sm:$0xff]  ;;  %v20532_v38 = vld [vmem:[%s17866_s27 + $0xa2] sm:$0xff] }
 0x2cb   : > { %16028 = vmatprep.mubr.msk.f32.mxu1 %vm236_vm1, %v13428_v6  ;;  %16736 = vmatprep.mubr.msk.f32.mxu0 %vm236_vm1, %v19785_v22  ;;  %v20357_v22 = vld [vmem:[%s17866_s27 + $0x81] sm:$0xff]  ;;  %v20535_v6 = vld [vmem:[%s17866_s27 + $0x97] sm:$0xff] }
 0x2ce   : > { %16029 = vmatmul.mubr.msk.f32.gmra.mrb[6].mxu1 %vm236_vm1, %v13429_v55  ;;  %16737 = vmatmul.mubr.msk.f32.gmra.mrb[14].mxu0 %vm236_vm1, %v19796_v25  ;;  %v20360_v25 = vld [vmem:[%s17866_s27 + $0x89] sm:$0xff] }
 0x2cf   : > { %16031 = vmatprep.mubr.msk.f32.mxu1 %vm236_vm1, %v13430_v5  ;;  %16739 = vmatprep.mubr.msk.f32.mxu0 %vm236_vm1, %v14326_v54  ;;  %v20538_v55 = vld [vmem:[%s17866_s27 + $0xaa] sm:$0xff]  ;;  %v20541_v5 = vld [vmem:[%s17866_s27 + $0x9f] sm:$0xff]  ;;  %v20552_v54 = vld [vmem:[%s17866_s27 + $0xb2] sm:$0xff] }
 0x2d2   : > { %16032 = vmatmul.mubr.msk.f32.gmra.mrb[8].mxu1 %vm236_vm1, %v20343_v19  ;;  %16740 = vmatmul.mubr.msk.f32.gmra.mrb[16].mxu0 %vm236_vm1, %v14327_v23  ;;  %v20569_v23 = vld [vmem:[%s20935_s1 + $0x45] sm:$0x7] }
 0x2d3   : > { %16034 = vmatprep.mubr.msk.f32.mxu1 %vm236_vm1, %v20347_v24  ;;  %16744 = vmatprep.mubr.msk.f32.mxu0 %vm236_vm1, %v19813_v40  ;;  %v20376_v40 = vld [vmem:[%s17866_s27 + $0x91] sm:$0xff] }
 0x2d6   : > { %16035 = vmatmul.mubr.msk.f32.gmra.mrb[10].mxu1 %vm236_vm1, %v20357_v22  ;;  %16745 = vmatmul.mubr.msk.f32.vlgmr.msra.gmra.mrb[0].mxu0 %vm236_vm1, %v19826_v39  ;;  %v20394_v39 = vld [vmem:[%s17866_s27 + $0xa1] sm:$0xff] }
 0x2d7   : > { %16772 = vmatpush3.msk.msra.mxu0 %vm291_vm0, %v20265_v41  ;;  %16037 = vmatprep.mubr.msk.f32.mxu1 %vm236_vm1, %v20360_v25  ;;  %v14363_v41 = vld [vmem:[%s17866_s27 + $0xee] sm:$0xff] }
 0x2d8   : > { %16747 = vmatprep.mubr.msk.f32.mxu0 %vm236_vm1, %v19831_v63  ;;  %16800 = vmatprep.subr.msk.mxu0 %vm291_vm0, %v20365_v10  ;;  %v20397_v63 = vld [vmem:[%s17866_s27 + $0xa9] sm:$0xff] }
 0x2da   : > { %16038 = vmatmul.mubr.msk.f32.gmra.mrb[12].mxu1 %vm236_vm1, %v20376_v40  ;;  %16748 = vmatmul.mubr.msk.f32.gmra.mrb[2].mxu0 %vm236_vm1, %v19843_v12  ;;  %v20408_v12 = vld [vmem:[%s17866_s27 + $0xb1] sm:$0xff] }
 0x2db   : > { %16040 = vmatprep.mubr.msk.f32.mxu1 %vm236_vm1, %v20381_v27  ;;  %16750 = vmatprep.mubr.msk.f32.mxu0 %vm236_vm1, %v19846_v18  ;;  %v13459_v18 = vld [vmem:[%s17866_s27 + $0x2a] sm:$0xff] }
 0x2de   : > { %16041 = vmatmul.mubr.msk.f32.gmra.mrb[14].mxu1 %vm236_vm1, %v20394_v39  ;;  %16751 = vmatmul.mubr.msk.f32.gmra.mrb[4].mxu0 %vm236_vm1, %v20071_v16 }
 0x2df   : > { %16043 = vmatprep.mubr.msk.f32.mxu1 %vm236_vm1, %v20397_v63  ;;  %16753 = vmatprep.mubr.msk.f32.mxu0 %vm236_vm1, %v20083_v57 }
 0x2e2   : > { %16044 = vmatmul.mubr.msk.f32.gmra.mrb[16].mxu1 %vm236_vm1, %v20408_v12  ;;  %16754 = vmatmul.mubr.msk.f32.gmra.mrb[6].mxu0 %vm236_vm1, %v20086_v60 }
 0x2e3   : > { %16048 = vmatprep.mubr.msk.f32.mxu1 %vm236_vm1, %v13459_v18  ;;  %16756 = vmatprep.mubr.msk.f32.mxu0 %vm236_vm1, %v20097_v46  ;;  %v13503_v18 = vld [vmem:[%s17866_s27 + $0x6e] sm:$0xff] }
 0x2e6   : > { %16049 = vmatmul.mubr.msk.f32.vlgmr.msra.gmra.mrb[0].mxu1 %vm236_vm1, %v13460_v45  ;;  %16757 = vmatmul.mubr.msk.f32.gmra.mrb[8].mxu0 %vm236_vm1, %v20420_v48  ;;  %v13504_v45 = vld [vmem:[%s17866_s27 + $0x76] sm:$0xff] }
 0x2e7   : > { %16051 = vmatprep.mubr.msk.f32.mxu1 %vm236_vm1, %v13461_v51  ;;  %16759 = vmatprep.mubr.msk.f32.mxu0 %vm236_vm1, %v20424_v8  ;;  %v14400_v51 = vld [vmem:[%s17866_s27 + $0xef] sm:$0xff] }
 0x2e8   : > { %16076 = vmatpush3.msk.msra.mxu1 %vm291_vm0, %v20311_v30  ;;  %v20492_v30 = vld [vmem:[%s17866_s27 + $0x7f] sm:$0xff] }
 0x2e9   : > { %16104 = vmatprep.subr.msk.mxu1 %vm291_vm0, %v20432_v33 }
 0x2ea   : > { %16052 = vmatmul.mubr.msk.f32.gmra.mrb[2].mxu1 %vm236_vm1, %v13462_v7  ;;  %16760 = vmatmul.mubr.msk.f32.gmra.mrb[10].mxu0 %vm236_vm1, %v14358_v52  ;;  %v13505_v7 = vld [vmem:[%s17866_s27 + $0x7e] sm:$0xff] }
 0x2eb   : > { %16054 = vmatprep.mubr.msk.f32.mxu1 %vm236_vm1, %v13463_v9  ;;  %16762 = vmatprep.mubr.msk.f32.mxu0 %vm236_vm1, %v14359_v15  ;;  %v14401_v52 = vld [vmem:[%s17866_s27 + $0xf7] sm:$0xff]  ;;  %v13506_v9 = vld [vmem:[%s17866_s27 + $0x86] sm:$0xff] }
 0x2ec   : > { %v20607_v15 = vld [vmem:[%s17866_s27 + $0x70] sm:$0xff] }
 0x2ee   : > { %16055 = vmatmul.mubr.msk.f32.gmra.mrb[4].mxu1 %vm236_vm1, %v13464_v17  ;;  %16763 = vmatmul.mubr.msk.f32.gmra.mrb[12].mxu0 %vm236_vm1, %v14360_v1  ;;  %v13507_v17 = vld [vmem:[%s17866_s27 + $0x8e] sm:$0xff]  ;;  %v20616_v1 = vld [vmem:[%s17866_s27 + $0x78] sm:$0xff] }
 0x2ef   : > { %16057 = vmatprep.mubr.msk.f32.mxu1 %vm236_vm1, %v13465_v14  ;;  %16765 = vmatprep.mubr.msk.f32.mxu0 %vm236_vm1, %v19894_v21  ;;  %v20470_v21 = vld [vmem:[%s17866_s27 + $0x7a] sm:$0xff] }
 0x2f0   : > { %v20619_v14 = vld [vmem:[%s17866_s27 + $0x80] sm:$0xff] }
 0x2f2   : > { %16058 = vmatmul.mubr.msk.f32.gmra.mrb[6].mxu1 %vm236_vm1, %v13466_v2  ;;  %16766 = vmatmul.mubr.msk.f32.gmra.mrb[14].mxu0 %vm236_vm1, %v19905_v31  ;;  %v20483_v31 = vld [vmem:[%s17866_s27 + $0x82] sm:$0xff]  ;;  %v12228_v2 = vld [vmem:[%s20935_s1 + $0x90] sm:$0x7] }
 0x2f3   : > { %16060 = vmatprep.mubr.msk.f32.mxu1 %vm236_vm1, %v13467_v11  ;;  %16768 = vmatprep.mubr.msk.f32.mxu0 %vm236_vm1, %v14363_v41  ;;  %v20632_v11 = vld [vmem:[%s17866_s27 + $0x88] sm:$0xff]  ;;  %v20637_v41 = vld [vmem:[%s17866_s27 + $0x90] sm:$0xff] }
 0x2f6   : > { %16061 = vmatmul.mubr.msk.f32.gmra.mrb[8].mxu1 %vm236_vm1, %v20466_v43  ;;  %16769 = vmatmul.mubr.msk.f32.gmra.mrb[16].mxu0 %vm236_vm1, %v14364_v29  ;;  %v20652_v29 = vld [vmem:[%s17866_s27 + $0xa0] sm:$0xff] }
 0x2f7   : > { %16063 = vmatprep.mubr.msk.f32.mxu1 %vm236_vm1, %v20470_v21  ;;  %16773 = vmatprep.mubr.msk.f32.mxu0 %vm236_vm1, %v20473_v50 }
 0x2fa   : > { %16064 = vmatmul.mubr.msk.f32.gmra.mrb[10].mxu1 %vm236_vm1, %v20483_v31  ;;  %16774 = vmatmul.mubr.msk.f32.vlgmr.msra.gmra.mrb[0].mxu0 %vm236_vm1, %v20486_v36 }
 0x2fb   : > { %16801 = vmatpush3.msk.msra.mxu0 %vm291_vm0, %v20365_v10  ;;  %16066 = vmatprep.mubr.msk.f32.mxu1 %vm236_vm1, %v20489_v20  ;;  %v21100_v10 = vld [vmem:[#allocation10_spill] sm:$0xff] }
 0x2fc   : > { %16776 = vmatprep.mubr.msk.f32.mxu0 %vm236_vm1, %v20492_v30  ;;  %16829 = vmatprep.subr.msk.mxu0 %vm291_vm0, %v20497_v62 }
 0x2fe   : > { %16067 = vmatmul.mubr.msk.f32.gmra.mrb[12].mxu1 %vm236_vm1, %v20508_v34  ;;  %16777 = vmatmul.mubr.msk.f32.gmra.mrb[2].mxu0 %vm236_vm1, %v20511_v44 }
 0x2ff   : > { %16069 = vmatprep.mubr.msk.f32.mxu1 %vm236_vm1, %v20516_v26  ;;  %16779 = vmatprep.mubr.msk.f32.mxu0 %vm236_vm1, %v20519_v28 }
 0x302   : > { %16070 = vmatmul.mubr.msk.f32.gmra.mrb[14].mxu1 %vm236_vm1, %v20532_v38  ;;  %16780 = vmatmul.mubr.msk.f32.gmra.mrb[4].mxu0 %vm236_vm1, %v20535_v6 }
 0x303   : > { %16072 = vmatprep.mubr.msk.f32.mxu1 %vm236_vm1, %v20538_v55  ;;  %16782 = vmatprep.mubr.msk.f32.mxu0 %vm236_vm1, %v20541_v5 }
 0x306   : > { %16073 = vmatmul.mubr.msk.f32.gmra.mrb[16].mxu1 %vm236_vm1, %v20552_v54  ;;  %16783 = vmatmul.mubr.msk.f32.gmra.mrb[6].mxu0 %vm236_vm1, %v19969_v35  ;;  %v21096_v35 = vld [vmem:[#allocation6_spill] sm:$0xff] }
 0x307   : > { %16077 = vmatprep.mubr.msk.f32.mxu1 %vm236_vm1, %v19972_v61  ;;  %16785 = vmatprep.mubr.msk.f32.mxu0 %vm236_vm1, %v19975_v58  ;;  %v21097_v61 = vld [vmem:[#allocation7_spill] sm:$0xff]  ;;  %v21098_v58 = vld [vmem:[#allocation8_spill] sm:$0xff] }
 0x30a   : > { %16078 = vmatmul.mubr.msk.f32.vlgmr.msra.gmra.mrb[0].mxu1 %vm236_vm1, %v19990_v37  ;;  %16786 = vmatmul.mubr.msk.f32.gmra.mrb[8].mxu0 %vm236_vm1, %v19993_v4  ;;  %v21099_v37 = vld [vmem:[#allocation9_spill] sm:$0xff] }
 0x30b   : > { %16080 = vmatprep.mubr.msk.f32.mxu1 %vm236_vm1, %v19997_v3  ;;  %16788 = vmatprep.mubr.msk.f32.mxu0 %vm236_vm1, %v21096_v35  ;;  %v13501_v4 = vld [vmem:[%s17866_s27 + $0x5e] sm:$0xff]  ;;  %v13502_v3 = vld [vmem:[%s17866_s27 + $0x66] sm:$0xff] }
 0x30c   : > { %16105 = vmatpush3.msk.msra.mxu1 %vm291_vm0, %v20432_v33  ;;  %v21102_v33 = vld [vmem:[#allocation12_spill] sm:$0xff]  ;;  %v14471_v35 = vld [vmem:[%s17866_s27 + $0xd9] sm:$0xff] }
 0x30d   : > { %16133 = vmatprep.subr.msk.mxu1 %vm291_vm0, %v20569_v23 }
 0x30e   : > { %16081 = vmatmul.mubr.msk.f32.gmra.mrb[2].mxu1 %vm236_vm1, %v20013_v42  ;;  %16789 = vmatmul.mubr.msk.f32.gmra.mrb[10].mxu0 %vm236_vm1, %v21097_v61  ;;  %v21101_v42 = vld [vmem:[#allocation11_spill] sm:$0xff] }
 0x30f   : > { %16083 = vmatprep.mubr.msk.f32.mxu1 %vm236_vm1, %v21098_v58  ;;  %16791 = vmatprep.mubr.msk.f32.mxu0 %vm236_vm1, %v21099_v37  ;;  %v13576_v61 = vld [vmem:[%s17866_s27 + $0x68] sm:$0xff] }
 0x310   : > { %v14472_v58 = vld [vmem:[%s17866_s27 + $0xe1] sm:$0xff]  ;;  %v14473_v37 = vld [vmem:[%s17866_s27 + $0xe9] sm:$0xff] }
 0x312   : > { %16084 = vmatmul.mubr.msk.f32.gmra.mrb[4].mxu1 %vm236_vm1, %v13501_v4  ;;  %16792 = vmatmul.mubr.msk.f32.gmra.mrb[12].mxu0 %vm236_vm1, %v21100_v10  ;;  %v14474_v4 = vld [vmem:[%s17866_s27 + $0xf1] sm:$0xff]  ;;  %v13584_v10 = vld [vmem:[%s17866_s27 + $0xa8] sm:$0xff] }
 0x313   : > { %16086 = vmatprep.mubr.msk.f32.mxu1 %vm236_vm1, %v13502_v3  ;;  %16794 = vmatprep.mubr.msk.f32.mxu0 %vm236_vm1, %v21101_v42  ;;  %v14475_v3 = vld [vmem:[%s17866_s27 + $0xf9] sm:$0xff] }
 0x316   : > { %16087 = vmatmul.mubr.msk.f32.gmra.mrb[6].mxu1 %vm236_vm1, %v13503_v18  ;;  %16795 = vmatmul.mubr.msk.f32.gmra.mrb[14].mxu0 %vm236_vm1, %v21102_v33 }
 0x317   : > { %16089 = vmatprep.mubr.msk.f32.mxu1 %vm236_vm1, %v13504_v45  ;;  %16797 = vmatprep.mubr.msk.f32.mxu0 %vm236_vm1, %v14400_v51 }
 0x31a   : > { %16090 = vmatmul.mubr.msk.f32.gmra.mrb[8].mxu1 %vm236_vm1, %v13505_v7  ;;  %16798 = vmatmul.mubr.msk.f32.gmra.mrb[16].mxu0 %vm236_vm1, %v14401_v52 }
 0x31b   : > { %16092 = vmatprep.mubr.msk.f32.mxu1 %vm236_vm1, %v13506_v9  ;;  %16802 = vmatprep.mubr.msk.f32.mxu0 %vm236_vm1, %v20607_v15 }
 0x31e   : > { %16093 = vmatmul.mubr.msk.f32.gmra.mrb[10].mxu1 %vm236_vm1, %v13507_v17  ;;  %16803 = vmatmul.mubr.msk.f32.vlgmr.msra.gmra.mrb[0].mxu0 %vm236_vm1, %v20616_v1 }
 0x31f   : > { %16830 = vmatpush3.msk.msra.mxu0 %vm291_vm0, %v20497_v62  ;;  %16095 = vmatprep.mubr.msk.f32.mxu1 %vm236_vm1, %v20071_v16  ;;  %v20649_v16 = vld [vmem:[%s17866_s27 + $0x98] sm:$0xff]  ;;  %v14437_v62 = vld [vmem:[%s17866_s27 + $0xf0] sm:$0xff] }
 0x320   : > { %16805 = vmatprep.mubr.msk.f32.mxu0 %vm236_vm1, %v20619_v14  ;;  %16858 = vmatprep.subr.msk.mxu0 %vm291_vm0, %v12228_v2 }
 0x322   : > { %16096 = vmatmul.mubr.msk.f32.gmra.mrb[12].mxu1 %vm236_vm1, %v20083_v57  ;;  %16806 = vmatmul.mubr.msk.f32.gmra.mrb[2].mxu0 %vm236_vm1, %v20632_v11  ;;  %v13535_v57 = vld [vmem:[%s17866_s27 + $0x47] sm:$0xff] }
 0x323   : > { %16098 = vmatprep.mubr.msk.f32.mxu1 %vm236_vm1, %v20086_v60  ;;  %16808 = vmatprep.mubr.msk.f32.mxu0 %vm236_vm1, %v20637_v41  ;;  %v13533_v60 = vld [vmem:[%s17866_s27 + $0x37] sm:$0xff] }
 0x326   : > { %16099 = vmatmul.mubr.msk.f32.gmra.mrb[14].mxu1 %vm236_vm1, %v20097_v46  ;;  %16809 = vmatmul.mubr.msk.f32.gmra.mrb[4].mxu0 %vm236_vm1, %v20649_v16  ;;  %v13534_v46 = vld [vmem:[%s17866_s27 + $0x3f] sm:$0xff] }
 0x327   : > { %16101 = vmatprep.mubr.msk.f32.mxu1 %vm236_vm1, %v20420_v48  ;;  %16811 = vmatprep.mubr.msk.f32.mxu0 %vm236_vm1, %v20652_v29  ;;  %v17779_v48 = vld [vmem:[%s20935_s1 + $0x48] sm:$0x7] }
 0x32a   : > { %16102 = vmatmul.mubr.msk.f32.gmra.mrb[16].mxu1 %vm236_vm1, %v20424_v8  ;;  %16812 = vmatmul.mubr.msk.f32.gmra.mrb[6].mxu0 %vm236_vm1, %v20108_v59  ;;  %v13536_v59 = vld [vmem:[%s17866_s27 + $0x4f] sm:$0xff]  ;;  %v21103_v8 = vld [vmem:[#allocation13_spill] sm:$0xff] }
 0x32b   : > { %16106 = vmatprep.mubr.msk.f32.mxu1 %vm236_vm1, %v13533_v60  ;;  %16814 = vmatprep.mubr.msk.f32.mxu0 %vm236_vm1, %v20111_v49  ;;  %v13537_v49 = vld [vmem:[%s17866_s27 + $0x57] sm:$0xff] }
 0x32e   : > { %16107 = vmatmul.mubr.msk.f32.vlgmr.msra.gmra.mrb[0].mxu1 %vm236_vm1, %v13534_v46  ;;  %16815 = vmatmul.mubr.msk.f32.gmra.mrb[8].mxu0 %vm236_vm1, %v20125_v47  ;;  %v13538_v47 = vld [vmem:[%s17866_s27 + $0x5f] sm:$0xff] }
 0x32f   : > { %16109 = vmatprep.mubr.msk.f32.mxu1 %vm236_vm1, %v13535_v57  ;;  %16817 = vmatprep.mubr.msk.f32.mxu0 %vm236_vm1, %v20130_v13  ;;  %v13539_v13 = vld [vmem:[%s17866_s27 + $0x67] sm:$0xff] }
 0x330   : > { %16134 = vmatpush3.msk.msra.mxu1 %vm291_vm0, %v20569_v23  ;;  %v13575_v23 = vld [vmem:[%s17866_s27 + $0x60] sm:$0xff] }
 0x331   : > { %16887 = vmatprep.subr.msk.mxu1 %vm291_vm0, %v17779_v48 }
 0x332   : > { %16110 = vmatmul.mubr.msk.f32.gmra.mrb[2].mxu1 %vm236_vm1, %v13536_v59  ;;  %16818 = vmatmul.mubr.msk.f32.gmra.mrb[10].mxu0 %vm236_vm1, %v20142_v32  ;;  %v14438_v32 = vld [vmem:[%s17866_s27 + $0xf8] sm:$0xff] }
 0x333   : > { %16112 = vmatprep.mubr.msk.f32.mxu1 %vm236_vm1, %v13537_v49  ;;  %16820 = vmatprep.mubr.msk.f32.mxu0 %vm236_vm1, %v20145_v53  ;;  %v13547_v53 = vld [vmem:[%s17866_s27 + $0xa7] sm:$0xff] }
 0x336   : > { %16113 = vmatmul.mubr.msk.f32.gmra.mrb[4].mxu1 %vm236_vm1, %v13538_v47  ;;  %16821 = vmatmul.mubr.msk.f32.gmra.mrb[12].mxu0 %vm236_vm1, %v20156_v56  ;;  %v13548_v56 = vld [vmem:[%s17866_s27 + $0xaf] sm:$0xff] }
 0x337   : > { %16115 = vmatprep.mubr.msk.f32.mxu1 %vm236_vm1, %v13539_v13  ;;  %16823 = vmatprep.mubr.msk.f32.mxu0 %vm236_vm1, %v21103_v8 }
 0x33a   : > { %16116 = vmatmul.mubr.msk.f32.gmra.mrb[6].mxu1 %vm236_vm1, %v20473_v50  ;;  %16824 = vmatmul.mubr.msk.f32.gmra.mrb[14].mxu0 %vm236_vm1, %v20170_v0  ;;  %v13549_v0 = vld [vmem:[%s17866_s27 + $0xb7] sm:$0xff] }
 0x33b   : > { %16118 = vmatprep.mubr.msk.f32.mxu1 %vm236_vm1, %v20486_v36  ;;  %16826 = vmatprep.mubr.msk.f32.mxu0 %vm236_vm1, %v14437_v62  ;;  %v20751_v50 = vld [vmem:[%s17866_s27 + $0xb9] sm:$0xff]  ;;  %v13572_v36 = vld [vmem:[%s17866_s27 + $0x48] sm:$0xff] }
 0x33e   : > { %16119 = vmatmul.mubr.msk.f32.gmra.mrb[8].mxu1 %vm236_vm1, %v20492_v30  ;;  %16827 = vmatmul.mubr.msk.f32.gmra.mrb[16].mxu0 %vm236_vm1, %v14438_v32  ;;  %v20755_v30 = vld [vmem:[%s17866_s27 + $0xc1] sm:$0xff] }
 0x33f   : > { %16121 = vmatprep.mubr.msk.f32.mxu1 %vm236_vm1, %v20511_v44  ;;  %16831 = vmatprep.mubr.msk.f32.mxu0 %vm236_vm1, %v20343_v19  ;;  %v13550_v19 = vld [vmem:[%s17866_s27 + $0xbf] sm:$0xff]  ;;  %v13573_v44 = vld [vmem:[%s17866_s27 + $0x50] sm:$0xff] }
 0x342   : > { %16122 = vmatmul.mubr.msk.f32.gmra.mrb[10].mxu1 %vm236_vm1, %v20519_v28  ;;  %16832 = vmatmul.mubr.msk.f32.vlgmr.msra.gmra.mrb[0].mxu0 %vm236_vm1, %v20347_v24  ;;  %v13570_v24 = vld [vmem:[%s17866_s27 + $0x38] sm:$0xff]  ;;  %v14469_v28 = vld [vmem:[%s17866_s27 + $0xc9] sm:$0xff] }
 0x343   : > { %16859 = vmatpush3.msk.msra.mxu0 %vm291_vm0, %v12228_v2  ;;  %16124 = vmatprep.mubr.msk.f32.mxu1 %vm236_vm1, %v20535_v6  ;;  %v13574_v6 = vld [vmem:[%s17866_s27 + $0x58] sm:$0xff] }
 0x344   : > { %16834 = vmatprep.mubr.msk.f32.mxu0 %vm236_vm1, %v20357_v22  ;;  %v13571_v22 = vld [vmem:[%s17866_s27 + $0x40] sm:$0xff] }
 0x346   : > { %16125 = vmatmul.mubr.msk.f32.gmra.mrb[12].mxu1 %vm236_vm1, %v20541_v5  ;;  %16835 = vmatmul.mubr.msk.f32.gmra.mrb[2].mxu0 %vm236_vm1, %v20360_v25  ;;  %v14470_v5 = vld [vmem:[%s17866_s27 + $0xd1] sm:$0xff] }
 0x347   : > { %16127 = vmatprep.mubr.msk.f32.mxu1 %vm236_vm1, %v13547_v53  ;;  %16837 = vmatprep.mubr.msk.f32.mxu0 %vm236_vm1, %v20376_v40 }
 0x34a   : > { %16128 = vmatmul.mubr.msk.f32.gmra.mrb[14].mxu1 %vm236_vm1, %v13548_v56  ;;  %16838 = vmatmul.mubr.msk.f32.gmra.mrb[4].mxu0 %vm236_vm1, %v20381_v27 }
 0x34b   : > { %16130 = vmatprep.mubr.msk.f32.mxu1 %vm236_vm1, %v13549_v0  ;;  %16840 = vmatprep.mubr.msk.f32.mxu0 %vm236_vm1, %v20394_v39 }
 0x34e   : > { %16131 = vmatmul.mubr.msk.f32.gmra.mrb[16].mxu1 %vm236_vm1, %v13550_v19  ;;  %16841 = vmatmul.mubr.msk.f32.gmra.mrb[6].mxu0 %vm236_vm1, %v20397_v63 }
 0x34f   : > { %16135 = vmatprep.mubr.msk.f32.mxu1 %vm236_vm1, %v13570_v24  ;;  %16843 = vmatprep.mubr.msk.f32.mxu0 %vm236_vm1, %v20408_v12 }
 0x352   : > { %16136 = vmatmul.mubr.msk.f32.vlgmr.msra.gmra.mrb[0].mxu1 %vm236_vm1, %v13571_v22  ;;  %16844 = vmatmul.mubr.msk.f32.gmra.mrb[8].mxu0 %vm236_vm1, %v20751_v50 }
 0x353   : > { %16138 = vmatprep.mubr.msk.f32.mxu1 %vm236_vm1, %v13572_v36  ;;  %16846 = vmatprep.mubr.msk.f32.mxu0 %vm236_vm1, %v20755_v30 }
 0x354   : > { %16888 = vmatpush3.msk.msra.mxu1 %vm291_vm0, %v17779_v48 }
 0x356   : > { %16139 = vmatmul.mubr.msk.f32.gmra.mrb[2].mxu1 %vm236_vm1, %v13573_v44  ;;  %16847 = vmatmul.mubr.msk.f32.gmra.mrb[10].mxu0 %vm236_vm1, %v14469_v28 }
 0x357   : > { %16141 = vmatprep.mubr.msk.f32.mxu1 %vm236_vm1, %v13574_v6  ;;  %16849 = vmatprep.mubr.msk.f32.mxu0 %vm236_vm1, %v14470_v5 }
 0x35a   : > { %16142 = vmatmul.mubr.msk.f32.gmra.mrb[4].mxu1 %vm236_vm1, %v13575_v23  ;;  %16850 = vmatmul.mubr.msk.f32.gmra.mrb[12].mxu0 %vm236_vm1, %v14471_v35 }
 0x35b   : > { %16144 = vmatprep.mubr.msk.f32.mxu1 %vm236_vm1, %v13576_v61  ;;  %16852 = vmatprep.mubr.msk.f32.mxu0 %vm236_vm1, %v14472_v58 }
 0x35e   : > { %16145 = vmatmul.mubr.msk.f32.gmra.mrb[6].mxu1 %vm236_vm1, %v20607_v15  ;;  %16853 = vmatmul.mubr.msk.f32.gmra.mrb[14].mxu0 %vm236_vm1, %v14473_v37  ;;  %v20864_v15 = vld [vmem:[%s20936_s2] ss:$0 sm:$0xff] }
 0x35f   : > { %16147 = vmatprep.mubr.msk.f32.mxu1 %vm236_vm1, %v20616_v1  ;;  %16855 = vmatprep.mubr.msk.f32.mxu0 %vm236_vm1, %v14474_v4 }
 0x362   : > { %16148 = vmatmul.mubr.msk.f32.gmra.mrb[8].mxu1 %vm236_vm1, %v20619_v14  ;;  %16856 = vmatmul.mubr.msk.f32.gmra.mrb[16].mxu0 %vm236_vm1, %v14475_v3 }
 0x363   : > { %16150 = vmatprep.mubr.msk.f32.mxu1 %vm236_vm1, %v20632_v11  ;;  %16860 = vmatprep.mubr.msk.f32.mxu0 %vm236_vm1, %v20466_v43  ;;  %v13585_v43 = vld [vmem:[%s17866_s27 + $0xb0] sm:$0xff] }
 0x366   : > { %16151 = vmatmul.mubr.msk.f32.gmra.mrb[10].mxu1 %vm236_vm1, %v20637_v41  ;;  %16861 = vmatmul.mubr.msk.f32.vlgmr.msra.gmra.mrb[0].mxu0 %vm236_vm1, %v20470_v21  ;;  %v13586_v21 = vld [vmem:[%s17866_s27 + $0xb8] sm:$0xff] }
 0x367   : > { %16153 = vmatprep.mubr.msk.f32.mxu1 %vm236_vm1, %v20649_v16  ;;  %16863 = vmatprep.mubr.msk.f32.mxu0 %vm236_vm1, %v20483_v31  ;;  %v13587_v31 = vld [vmem:[%s17866_s27 + $0xc0] sm:$0xff] }
 0x36a   : > { %16154 = vmatmul.mubr.msk.f32.gmra.mrb[12].mxu1 %vm236_vm1, %v20652_v29  ;;  %16864 = vmatmul.mubr.msk.f32.gmra.mrb[2].mxu0 %vm236_vm1, %v20489_v20  ;;  %v14504_v20 = vld [vmem:[%s17866_s27 + $0xba] sm:$0xff] }
 0x36b   : > { %16156 = vmatprep.mubr.msk.f32.mxu1 %vm236_vm1, %v13584_v10  ;;  %16866 = vmatprep.mubr.msk.f32.mxu0 %vm236_vm1, %v20508_v34  ;;  %v14505_v34 = vld [vmem:[%s17866_s27 + $0xc2] sm:$0xff] }
 0x36e   : > { %16157 = vmatmul.mubr.msk.f32.gmra.mrb[14].mxu1 %vm236_vm1, %v13585_v43  ;;  %16867 = vmatmul.mubr.msk.f32.gmra.mrb[4].mxu0 %vm236_vm1, %v20516_v26  ;;  %v14506_v26 = vld [vmem:[%s17866_s27 + $0xca] sm:$0xff] }
 0x36f   : > { %16159 = vmatprep.mubr.msk.f32.mxu1 %vm236_vm1, %v13586_v21  ;;  %16869 = vmatprep.mubr.msk.f32.mxu0 %vm236_vm1, %v20532_v38  ;;  %v14507_v38 = vld [vmem:[%s17866_s27 + $0xd2] sm:$0xff] }
 0x372   : > { %16160 = vmatmul.mubr.msk.f32.gmra.mrb[16].mxu1 %vm236_vm1, %v13587_v31  ;;  %16870 = vmatmul.mubr.msk.f32.gmra.mrb[6].mxu0 %vm236_vm1, %v20538_v55 }
 0x373   : > { %16179 = vmatprep.mubr.msk.f32.mxu1 %vm236_vm1, %v20360_v25  ;;  %16872 = vmatprep.mubr.msk.f32.mxu0 %vm236_vm1, %v20552_v54  ;;  %v14508_v25 = vld [vmem:[%s17866_s27 + $0xda] sm:$0xff] }
 0x376   : > { %16180 = vmatmul.mubr.msk.f32.vlgmr.msra.gmra.mrb[10].mxu1 %vm236_vm1, %v20376_v40  ;;  %16873 = vmatmul.mubr.msk.f32.gmra.mrb[8].mxu0 %vm236_vm1, %v14504_v20  ;;  %v14509_v40 = vld [vmem:[%s17866_s27 + $0xe2] sm:$0xff] }
 0x377   : > { %16182 = vmatprep.mubr.msk.f32.mxu1 %vm236_vm1, %v20381_v27  ;;  %16875 = vmatprep.mubr.msk.f32.mxu0 %vm236_vm1, %v14505_v34  ;;  %v14510_v27 = vld [vmem:[%s17866_s27 + $0xea] sm:$0xff] }
 0x37a   : > { %16183 = vmatmul.mubr.msk.f32.gmra.mrb[12].mxu1 %vm236_vm1, %v20394_v39  ;;  %16876 = vmatmul.mubr.msk.f32.gmra.mrb[10].mxu0 %vm236_vm1, %v14506_v26  ;;  %v14511_v39 = vld [vmem:[%s17866_s27 + $0xf2] sm:$0xff] }
 0x37b   : > { %16185 = vmatprep.mubr.msk.f32.mxu1 %vm236_vm1, %v20397_v63  ;;  %16878 = vmatprep.mubr.msk.f32.mxu0 %vm236_vm1, %v14507_v38  ;;  %v14512_v63 = vld [vmem:[%s17866_s27 + $0xfa] sm:$0xff] }
 0x37e   : > { %16186 = vmatmul.mubr.msk.f32.gmra.mrb[14].mxu1 %vm236_vm1, %v20408_v12  ;;  %16879 = vmatmul.mubr.msk.f32.gmra.mrb[12].mxu0 %vm236_vm1, %v14508_v25 }
 0x37f   : > { %16188 = vmatprep.mubr.msk.f32.mxu1 %vm236_vm1, %v20751_v50  ;;  %16881 = vmatprep.mubr.msk.f32.mxu0 %vm236_vm1, %v14509_v40 }
 0x382   : > { %16189 = vmatmul.mubr.msk.f32.gmra.mrb[16].mxu1 %vm236_vm1, %v20755_v30  ;;  %16882 = vmatmul.mubr.msk.f32.gmra.mrb[14].mxu0 %vm236_vm1, %v14510_v27 }
 0x383   : > { %16884 = vmatprep.mubr.msk.f32.mxu0 %vm236_vm1, %v14511_v39 }
 0x386   : > { %16885 = vmatmul.mubr.msk.f32.gmra.mrb[16].mxu0 %vm236_vm1, %v14512_v63 }
 0x425   : > { %v16137_v12 = vpop.f32.mrb[0].mxu1 }
 0x426   : > { %v6077_v55 = vpop.f32.mrb[1].mxu1 }
 0x429   : > { %v16140_v54 = vpop.f32.mrb[2].mxu1 }
 0x42a   : > { %v6087_v42 = vpop.f32.mrb[3].mxu1 }
 0x42d   : > { %v16143_v18 = vpop.f32.mrb[4].mxu1 }
 0x42e   : > { %v6097_v45 = vpop.f32.mrb[5].mxu1 }
 0x431   : > { %v16146_v51 = vpop.f32.mrb[6].mxu1 }
 0x432   : > { %v6107_v33 = vpop.f32.mrb[7].mxu1 }
 0x435   : > { %v16149_v7 = vpop.f32.mrb[8].mxu1 }
 0x436   : > { %v6117_v52 = vpop.f32.mrb[9].mxu1 }
 0x439   : > { %v16862_v9 = vpop.f32.mrb[0].mxu0 }
 0x43a   : > { %v16889_v17 = vadd.f32 %v16862_v9, %v16137_v12  ;;  %v12352_v1 = vpop.f32.mrb[1].mxu0 }
 0x43b   : > { %v16890_v14 = vadd.f32 %v12352_v1, %v6077_v55 }
 0x43c   : > { %v12467_v2 = vadd.f32 %v16889_v17, %v20864_v15 }
 0x43d   : > { %v12466_v11 = vadd.f32 %v16890_v14, %v20864_v15  ;;  %v16865_v41 = vpop.f32.mrb[2].mxu0 }
 0x43e   : > { %12486 = vst.msk [vmem:[%s20869_s9 + $0x8] sm:$0xff] %vm12484_vm2, %v12467_v2  ;;  %v16891_v16 = vadd.f32 %v16865_v41, %v16140_v54  ;;  %v12362_v29 = vpop.f32.mrb[3].mxu0 }
 0x43f   : > { %12485 = vst.msk [vmem:[%s20869_s9] sm:$0xff] %vm12484_vm2, %v12466_v11  ;;  %v16892_v60 = vadd.f32 %v12362_v29, %v6087_v42 }
 0x440   : > { %v12469_v46 = vadd.f32 %v16891_v16, %v20864_v15 }
 0x441   : > { %v12468_v57 = vadd.f32 %v16892_v60, %v20864_v15  ;;  %v16868_v59 = vpop.f32.mrb[4].mxu0 }
 0x442   : > { %12488 = vst.msk [vmem:[%s20869_s9 + $0x18] sm:$0xff] %vm12484_vm2, %v12469_v46  ;;  %v16893_v49 = vadd.f32 %v16868_v59, %v16143_v18  ;;  %v12372_v48 = vpop.f32.mrb[5].mxu0 }
 0x443   : > { %12487 = vst.msk [vmem:[%s20869_s9 + $0x10] sm:$0xff] %vm12484_vm2, %v12468_v57  ;;  %v16894_v47 = vadd.f32 %v12372_v48, %v6097_v45 }
 0x444   : > { %v12471_v13 = vadd.f32 %v16893_v49, %v20864_v15 }
 0x445   : > { %v12470_v8 = vadd.f32 %v16894_v47, %v20864_v15  ;;  %v16871_v62 = vpop.f32.mrb[6].mxu0 }
 0x446   : > { %12490 = vst.msk [vmem:[%s20869_s9 + $0x28] sm:$0xff] %vm12484_vm2, %v12471_v13  ;;  %v16895_v32 = vadd.f32 %v16871_v62, %v16146_v51  ;;  %v12382_v53 = vpop.f32.mrb[7].mxu0 }
 0x447   : > { %12489 = vst.msk [vmem:[%s20869_s9 + $0x20] sm:$0xff] %vm12484_vm2, %v12470_v8  ;;  %v16896_v56 = vadd.f32 %v12382_v53, %v6107_v33 }
 0x448   : > { %v12473_v0 = vadd.f32 %v16895_v32, %v20864_v15 }
 0x449   : > { %v12472_v19 = vadd.f32 %v16896_v56, %v20864_v15  ;;  %v16181_v24 = vpop.f32.mrb[10].mxu1  ;;  %v16874_v22 = vpop.f32.mrb[8].mxu0 }
 0x44a   : > { %12492 = vst.msk [vmem:[%s20869_s9 + $0x38] sm:$0xff] %vm12484_vm2, %v12473_v0  ;;  %v16897_v50 = vadd.f32 %v16874_v22, %v16149_v7  ;;  %v6378_v36 = vpop.f32.mrb[11].mxu1  ;;  %v12392_v30 = vpop.f32.mrb[9].mxu0 }
 0x44b   : > { %12491 = vst.msk [vmem:[%s20869_s9 + $0x30] sm:$0xff] %vm12484_vm2, %v12472_v19  ;;  %v16898_v44 = vadd.f32 %v12392_v30, %v6117_v52 }
 0x44c   : > { %v12475_v28 = vadd.f32 %v16897_v50, %v20864_v15 }
 0x44d   : > { %v12474_v6 = vadd.f32 %v16898_v44, %v20864_v15  ;;  %v16184_v5 = vpop.f32.mrb[12].mxu1  ;;  %v16877_v23 = vpop.f32.mrb[10].mxu0 }
 0x44e   : > { %12494 = vst.msk [vmem:[%s20869_s9 + $0x48] sm:$0xff] %vm12484_vm2, %v12475_v28  ;;  %v16899_v35 = vadd.f32 %v16877_v23, %v16181_v24  ;;  %v6388_v61 = vpop.f32.mrb[13].mxu1  ;;  %v12402_v58 = vpop.f32.mrb[11].mxu0 }
 0x44f   : > { %12493 = vst.msk [vmem:[%s20869_s9 + $0x40] sm:$0xff] %vm12484_vm2, %v12474_v6  ;;  %v16900_v37 = vadd.f32 %v12402_v58, %v6378_v36 }
 0x450   : > { %v12477_v4 = vadd.f32 %v16899_v35, %v20864_v15 }
 0x451   : > { %v12476_v3 = vadd.f32 %v16900_v37, %v20864_v15  ;;  %v16187_v10 = vpop.f32.mrb[14].mxu1  ;;  %v16880_v43 = vpop.f32.mrb[12].mxu0 }
 0x452   : > { %12496 = vst.msk [vmem:[%s20869_s9 + $0x58] sm:$0xff] %vm12484_vm2, %v12477_v4  ;;  %v16901_v21 = vadd.f32 %v16880_v43, %v16184_v5  ;;  %v6398_v31 = vpop.f32.mrb[15].mxu1  ;;  %v12412_v20 = vpop.f32.mrb[13].mxu0 }
 0x453   : > { %12495 = vst.msk [vmem:[%s20869_s9 + $0x50] sm:$0xff] %vm12484_vm2, %v12476_v3  ;;  %v16902_v34 = vadd.f32 %v12412_v20, %v6388_v61 }
 0x454   : > { %v12479_v26 = vadd.f32 %v16901_v21, %v20864_v15 }
 0x455   : > { %v12478_v38 = vadd.f32 %v16902_v34, %v20864_v15  ;;  %v16190_v25 = vpop.f32.mrb[16].mxu1  ;;  %v16883_v40 = vpop.f32.mrb[14].mxu0 }
 0x456   : > { %12498 = vst.msk [vmem:[%s20869_s9 + $0x68] sm:$0xff] %vm12484_vm2, %v12479_v26  ;;  %v16903_v27 = vadd.f32 %v16883_v40, %v16187_v10  ;;  %v6408_v39 = vpop.f32.mrb[17].mxu1  ;;  %v12422_v63 = vpop.f32.mrb[15].mxu0 }
 0x457   : > { %12497 = vst.msk [vmem:[%s20869_s9 + $0x60] sm:$0xff] %vm12484_vm2, %v12478_v38  ;;  %v16904_v12 = vadd.f32 %v12422_v63, %v6398_v31 }
 0x458   : > { %v12481_v55 = vadd.f32 %v16903_v27, %v20864_v15 }
 0x459   : > { %v12480_v54 = vadd.f32 %v16904_v12, %v20864_v15  ;;  %v16886_v42 = vpop.f32.mrb[16].mxu0 }
 0x45a   : > { %12500 = vst.msk [vmem:[%s20869_s9 + $0x78] sm:$0xff] %vm12484_vm2, %v12481_v55  ;;  %v16905_v18 = vadd.f32 %v16886_v42, %v16190_v25  ;;  %v12432_v45 = vpop.f32.mrb[17].mxu0 }
 0x45b   : > { %12499 = vst.msk [vmem:[%s20869_s9 + $0x70] sm:$0xff] %vm12484_vm2, %v12480_v54  ;;  %v16906_v51 = vadd.f32 %v12432_v45, %v6408_v39 }
 0x45c   : > { %v12483_v33 = vadd.f32 %v16905_v18, %v20864_v15 }
 0x45d   : > { %v12482_v7 = vadd.f32 %v16906_v51, %v20864_v15 }
 0x45e   : > { %12502 = vst.msk [vmem:[%s20869_s9 + $0x88] sm:$0xff] %vm12484_vm2, %v12483_v33 }
 0x45f   : > { %12501 = vst.msk [vmem:[%s20869_s9 + $0x80] sm:$0xff] %vm12484_vm2, %v12482_v7 }
 0x460 PF: > { %s13_s14 = sadd.s32 1, %s17802_s14   ;;  %s21104_s12 = smov %s17798_s13 }
 0x461   : > { %p10_p5 = scmp.ge.s32.totalorder %s13_s14, 4   ;;  %s21105_s13 = smov %s21107_s15 }
 0x463   :  { %12 = sbr.rel (!%p10_p5) target bundleno = 2 (0x2), region = 111 }

</bundles_post_ra>
